<compile_context>
chip_gen: v5e
topology: v5e:2x2
jax: 0.10.0
libtpu: 0.0.40
codegen_flags: <defaults>
</compile_context>

<pallas_src>
import functools

import jax
import jax.numpy as jnp
from jax.experimental import pallas as pl
from jax.experimental.pallas import tpu as pltpu

# Fixed hidden sizes from the module definition.
HIDDEN = (2048, 512, 128, 32)


def _valuenet_kernel(x_ref,
                     w1_ref, b1_ref,
                     w2_ref, b2_ref,
                     w3_ref, b3_ref,
                     w4_ref, b4_ref,
                     w5_ref, b5_ref,
                     o_ref):
    """Whole MLP forward in one kernel invocation (everything fits in VMEM).

    Weights/biases arrive as bf16; all matmuls use the MXU bf16 path with f32
    accumulation, activations are kept in f32 and cast to bf16 at each dot.
    """
    h = x_ref[...].astype(jnp.float32)

    def linear_relu(h, w_ref, b_ref):
        y = jnp.dot(h.astype(jnp.bfloat16), w_ref[...],
                    preferred_element_type=jnp.float32)
        y = y + b_ref[...].astype(jnp.float32)
        return jnp.maximum(y, 0.0)

    # layer1..layer4: Linear + ReLU
    h = linear_relu(h, w1_ref, b1_ref)
    h = linear_relu(h, w2_ref, b2_ref)
    h = linear_relu(h, w3_ref, b3_ref)
    h = linear_relu(h, w4_ref, b4_ref)

    # layer5: Linear + Softmax(dim=0)  (softmax over the batch/leading axis)
    logits = jnp.dot(h.astype(jnp.bfloat16), w5_ref[...],
                     preferred_element_type=jnp.float32)
    logits = logits + b5_ref[...].astype(jnp.float32)
    m = jnp.max(logits, axis=0, keepdims=True)
    e = jnp.exp(logits - m)
    denom = jnp.sum(e, axis=0, keepdims=True)
    # approx=False: exact reciprocal keeps the softmax normalization tight.
    o_ref[...] = (e * pl.reciprocal(denom, approx=False)).astype(o_ref.dtype)


@functools.partial(jax.jit, static_argnames=())
def valuenet_forward(x, params):
    """params = ((w1,b1), ..., (w5,b5)); w_i: (in, out) bf16, b_i: (1, out) bf16.

    NOTE: if this net is called repeatedly in a serving / RL loop, the weight
    arguments should be kept resident on-chip (weight-stationary kernel /
    cross-call prefetch) instead of re-streamed from HBM each call; here we do
    a single-shot invocation so per-call DMA of ~2.5 MB bf16 is the floor.
    """
    batch = x.shape[0]
    out_dim = params[-1][0].shape[1]

    flat = [x]
    for w, b in params:
        flat += [w, b]

    n_inputs = len(flat)
    vmem_spec = pl.BlockSpec(memory_space=pltpu.MemorySpace.VMEM)

    return pl.pallas_call(
        _valuenet_kernel,
        out_shape=jax.ShapeDtypeStruct((batch, out_dim), jnp.float32),
        in_specs=[vmem_spec] * n_inputs,
        out_specs=vmem_spec,
        # ~3 MiB of bf16 params + tiny activations; 16 MiB leaves plenty of
        # headroom on every generation (incl. v7x's 64 MiB per-core VMEM).
        compiler_params=pltpu.CompilerParams(vmem_limit_bytes=16 << 20),
    )(*flat)


def init_params(key, in_dim, out_dim):
    """Deterministic synthetic parameters (shapes match nn.Linear layers).

    Weights/biases are returned in bf16 (the kernel's storage dtype)."""
    dims = (in_dim,) + HIDDEN + (out_dim,)
    params = []
    for i in range(len(dims) - 1):
        key, kw, kb = jax.random.split(key, 3)
        fan_in = dims[i]
        scale = 1.0 / jnp.sqrt(jnp.float32(fan_in))
        w = jax.random.uniform(kw, (dims[i], dims[i + 1]), jnp.float32,
                               minval=-scale, maxval=scale)
        b = jax.random.uniform(kb, (1, dims[i + 1]), jnp.float32,
                               minval=-scale, maxval=scale)
        params.append((w.astype(jnp.bfloat16), b.astype(jnp.bfloat16)))
    return tuple(params)


def reference_forward(x, params):
    """Pure-JAX reference using the SAME bf16 weights + f32 accumulation."""
    h = x.astype(jnp.float32)
    for w, b in params[:-1]:
        y = jax.lax.dot(h.astype(jnp.bfloat16), w,
                        preferred_element_type=jnp.float32)
        h = jnp.maximum(y + b.astype(jnp.float32), 0.0)
    w5, b5 = params[-1]
    logits = jax.lax.dot(h.astype(jnp.bfloat16), w5,
                         preferred_element_type=jnp.float32)
    logits = logits + b5.astype(jnp.float32)
    return jax.nn.softmax(logits, axis=0)


if __name__ == "__main__":
    key = jax.random.PRNGKey(0)
    key, kx = jax.random.split(key)

    batch, in_dim, out_dim = 4, 64, 8
    x = jax.random.normal(kx, (batch, in_dim), jnp.float32)
    params = init_params(key, in_dim, out_dim)

    out = valuenet_forward(x, params)
    out = jax.block_until_ready(out)

    ref = reference_forward(x, params)
    assert out.shape == (batch, out_dim)
    # bf16 weights + (MXU vs XLA) accumulation-order differences -> relaxed tol.
    assert jnp.allclose(out, ref, atol=1e-3, rtol=1e-3), "mismatch vs reference"

    print("KERNEL_OK")
</pallas_src>

<mosaic_0001>
module attributes {stable_mosaic.version = 11 : i64} {
  func.func @_valuenet_kernel(%arg0: memref<4x64xf32, #tpu.memory_space<vmem>>, %arg1: memref<64x2048xbf16, #tpu.memory_space<vmem>>, %arg2: memref<1x2048xbf16, #tpu.memory_space<vmem>>, %arg3: memref<2048x512xbf16, #tpu.memory_space<vmem>>, %arg4: memref<1x512xbf16, #tpu.memory_space<vmem>>, %arg5: memref<512x128xbf16, #tpu.memory_space<vmem>>, %arg6: memref<1x128xbf16, #tpu.memory_space<vmem>>, %arg7: memref<128x32xbf16, #tpu.memory_space<vmem>>, %arg8: memref<1x32xbf16, #tpu.memory_space<vmem>>, %arg9: memref<32x8xbf16, #tpu.memory_space<vmem>>, %arg10: memref<1x8xbf16, #tpu.memory_space<vmem>>, %arg11: memref<4x8xf32, #tpu.memory_space<vmem>>) attributes {dimension_semantics = [], scalar_prefetch = 0 : i64, scratch_operands = 0 : i64, tpu.core_type = #tpu.core_type<tc>} {
    %c0 = arith.constant 0 : index
    %c0_0 = arith.constant 0 : index
    %0 = vector.load %arg0[%c0, %c0_0] : memref<4x64xf32, #tpu.memory_space<vmem>>, vector<4x64xf32>
    %1 = arith.truncf %0 : vector<4x64xf32> to vector<4x64xbf16>
    %c0_1 = arith.constant 0 : index
    %c0_2 = arith.constant 0 : index
    %2 = vector.load %arg1[%c0_1, %c0_2] : memref<64x2048xbf16, #tpu.memory_space<vmem>>, vector<64x2048xbf16>
    %cst = arith.constant dense<0.000000e+00> : vector<4x2048xf32>
    %3 = tpu.matmul %1, %2, %cst {dimension_numbers = #tpu.dot_dimension_numbers<[1], [0], [0], [1], [0, 0, 1, 1], [], []>} : vector<4x64xbf16>, vector<64x2048xbf16>, vector<4x2048xf32> -> vector<4x2048xf32>
    %c0_3 = arith.constant 0 : index
    %c0_4 = arith.constant 0 : index
    %4 = vector.load %arg2[%c0_3, %c0_4] : memref<1x2048xbf16, #tpu.memory_space<vmem>>, vector<1x2048xbf16>
    %5 = arith.extf %4 : vector<1x2048xbf16> to vector<1x2048xf32>
    %6 = vector.broadcast %5 : vector<1x2048xf32> to vector<4x2048xf32>
    %7 = arith.addf %3, %6 : vector<4x2048xf32>
    %cst_5 = arith.constant 0.000000e+00 : f32
    %8 = vector.broadcast %cst_5 : f32 to vector<4x2048xf32>
    %9 = arith.maximumf %7, %8 : vector<4x2048xf32>
    %10 = arith.truncf %9 : vector<4x2048xf32> to vector<4x2048xbf16>
    %c0_6 = arith.constant 0 : index
    %c0_7 = arith.constant 0 : index
    %11 = vector.load %arg3[%c0_6, %c0_7] : memref<2048x512xbf16, #tpu.memory_space<vmem>>, vector<2048x512xbf16>
    %cst_8 = arith.constant dense<0.000000e+00> : vector<4x512xf32>
    %12 = tpu.matmul %10, %11, %cst_8 {dimension_numbers = #tpu.dot_dimension_numbers<[1], [0], [0], [1], [0, 0, 1, 1], [], []>} : vector<4x2048xbf16>, vector<2048x512xbf16>, vector<4x512xf32> -> vector<4x512xf32>
    %c0_9 = arith.constant 0 : index
    %c0_10 = arith.constant 0 : index
    %13 = vector.load %arg4[%c0_9, %c0_10] : memref<1x512xbf16, #tpu.memory_space<vmem>>, vector<1x512xbf16>
    %14 = arith.extf %13 : vector<1x512xbf16> to vector<1x512xf32>
    %15 = vector.broadcast %14 : vector<1x512xf32> to vector<4x512xf32>
    %16 = arith.addf %12, %15 : vector<4x512xf32>
    %cst_11 = arith.constant 0.000000e+00 : f32
    %17 = vector.broadcast %cst_11 : f32 to vector<4x512xf32>
    %18 = arith.maximumf %16, %17 : vector<4x512xf32>
    %19 = arith.truncf %18 : vector<4x512xf32> to vector<4x512xbf16>
    %c0_12 = arith.constant 0 : index
    %c0_13 = arith.constant 0 : index
    %20 = vector.load %arg5[%c0_12, %c0_13] : memref<512x128xbf16, #tpu.memory_space<vmem>>, vector<512x128xbf16>
    %cst_14 = arith.constant dense<0.000000e+00> : vector<4x128xf32>
    %21 = tpu.matmul %19, %20, %cst_14 {dimension_numbers = #tpu.dot_dimension_numbers<[1], [0], [0], [1], [0, 0, 1, 1], [], []>} : vector<4x512xbf16>, vector<512x128xbf16>, vector<4x128xf32> -> vector<4x128xf32>
    %c0_15 = arith.constant 0 : index
    %c0_16 = arith.constant 0 : index
    %22 = vector.load %arg6[%c0_15, %c0_16] : memref<1x128xbf16, #tpu.memory_space<vmem>>, vector<1x128xbf16>
    %23 = arith.extf %22 : vector<1x128xbf16> to vector<1x128xf32>
    %24 = vector.broadcast %23 : vector<1x128xf32> to vector<4x128xf32>
    %25 = arith.addf %21, %24 : vector<4x128xf32>
    %cst_17 = arith.constant 0.000000e+00 : f32
    %26 = vector.broadcast %cst_17 : f32 to vector<4x128xf32>
    %27 = arith.maximumf %25, %26 : vector<4x128xf32>
    %28 = arith.truncf %27 : vector<4x128xf32> to vector<4x128xbf16>
    %c0_18 = arith.constant 0 : index
    %c0_19 = arith.constant 0 : index
    %29 = vector.load %arg7[%c0_18, %c0_19] : memref<128x32xbf16, #tpu.memory_space<vmem>>, vector<128x32xbf16>
    %cst_20 = arith.constant dense<0.000000e+00> : vector<4x32xf32>
    %30 = tpu.matmul %28, %29, %cst_20 {dimension_numbers = #tpu.dot_dimension_numbers<[1], [0], [0], [1], [0, 0, 1, 1], [], []>} : vector<4x128xbf16>, vector<128x32xbf16>, vector<4x32xf32> -> vector<4x32xf32>
    %c0_21 = arith.constant 0 : index
    %c0_22 = arith.constant 0 : index
    %31 = vector.load %arg8[%c0_21, %c0_22] : memref<1x32xbf16, #tpu.memory_space<vmem>>, vector<1x32xbf16>
    %32 = arith.extf %31 : vector<1x32xbf16> to vector<1x32xf32>
    %33 = vector.broadcast %32 : vector<1x32xf32> to vector<4x32xf32>
    %34 = arith.addf %30, %33 : vector<4x32xf32>
    %cst_23 = arith.constant 0.000000e+00 : f32
    %35 = vector.broadcast %cst_23 : f32 to vector<4x32xf32>
    %36 = arith.maximumf %34, %35 : vector<4x32xf32>
    %37 = arith.truncf %36 : vector<4x32xf32> to vector<4x32xbf16>
    %c0_24 = arith.constant 0 : index
    %c0_25 = arith.constant 0 : index
    %38 = vector.load %arg9[%c0_24, %c0_25] : memref<32x8xbf16, #tpu.memory_space<vmem>>, vector<32x8xbf16>
    %cst_26 = arith.constant dense<0.000000e+00> : vector<4x8xf32>
    %39 = tpu.matmul %37, %38, %cst_26 {dimension_numbers = #tpu.dot_dimension_numbers<[1], [0], [0], [1], [0, 0, 1, 1], [], []>} : vector<4x32xbf16>, vector<32x8xbf16>, vector<4x8xf32> -> vector<4x8xf32>
    %c0_27 = arith.constant 0 : index
    %c0_28 = arith.constant 0 : index
    %40 = vector.load %arg10[%c0_27, %c0_28] : memref<1x8xbf16, #tpu.memory_space<vmem>>, vector<1x8xbf16>
    %41 = arith.extf %40 : vector<1x8xbf16> to vector<1x8xf32>
    %42 = vector.broadcast %41 : vector<1x8xf32> to vector<4x8xf32>
    %43 = arith.addf %39, %42 : vector<4x8xf32>
    %cst_29 = arith.constant dense<0xFF800000> : vector<8xf32>
    %44 = vector.multi_reduction <maximumf>, %43, %cst_29 [0] : vector<4x8xf32> to vector<8xf32>
    %45 = vector.shape_cast %44 : vector<8xf32> to vector<1x8xf32>
    %46 = vector.broadcast %45 : vector<1x8xf32> to vector<4x8xf32>
    %47 = arith.subf %43, %46 : vector<4x8xf32>
    %48 = math.exp %47 : vector<4x8xf32>
    %cst_30 = arith.constant dense<0.000000e+00> : vector<8xf32>
    %49 = vector.multi_reduction <add>, %48, %cst_30 [0] : vector<4x8xf32> to vector<8xf32>
    %50 = vector.shape_cast %49 : vector<8xf32> to vector<1x8xf32>
    %51 = tpu.reciprocal %50 : vector<1x8xf32> -> vector<1x8xf32>
    %52 = vector.broadcast %51 : vector<1x8xf32> to vector<4x8xf32>
    %53 = arith.mulf %48, %52 : vector<4x8xf32>
    %c0_31 = arith.constant 0 : index
    %c0_32 = arith.constant 0 : index
    %54 = vector.load %arg11[%c0_31, %c0_32] : memref<4x8xf32, #tpu.memory_space<vmem>>, vector<4x8xf32>
    tpu.vector_store %arg11[%c0_31, %c0_32], %53 {strides = array<i32>} : memref<4x8xf32, #tpu.memory_space<vmem>>, vector<4x8xf32>,
    return
  }
}

</mosaic_0001>

<bundles_post_ra>
// kernel: valuenet_forward.1
= control target key start
LH: loop header
LB: loop body
LE: loop exit
PB: predicated region body
PF: predicated region fallthrough
CT: control target
= control target key end

     0   :  { %16 = vsyncpa [#allocation3], 0  ;;  %s9030_s0 = inlined_call_operand.hbm [shape: f32[4,64], index: 0, kind: input, shape index: {}]   ;;  %s9031_s1 = inlined_call_operand.hbm [shape: bf16[64,2048], index: 1, kind: input, shape index: {}]   ;;  %s9032_s2 = inlined_call_operand.hbm [shape: bf16[1,2048], index: 2, kind: input, shape index: {}]   ;;  %s9033_s3 = inlined_call_operand.hbm [shape: bf16[2048,512], index: 3, kind: input, shape index: {}]   ;;  %s9034_s4 = inlined_call_operand.hbm [shape: bf16[1,512], index: 4, kind: input, shape index: {}]   ;;  %s9035_s5 = inlined_call_operand.hbm [shape: bf16[512,128], index: 5, kind: input, shape index: {}]   ;;  %s9036_s6 = inlined_call_operand.hbm [shape: bf16[1,128], index: 6, kind: input, shape index: {}]   ;;  %s9037_s7 = inlined_call_operand.vmem [shape: bf16[128,32], index: 7, kind: input, shape index: {}]   ;;  %s9038_s8 = inlined_call_operand.hbm [shape: bf16[1,32], index: 8, kind: input, shape index: {}]   ;;  %s9039_s9 = inlined_call_operand.vmem [shape: bf16[32,8], index: 9, kind: input, shape index: {}]   ;;  %s9040_s10 = inlined_call_operand.hbm [shape: bf16[1,8], index: 10, kind: input, shape index: {}]   ;;  %s9041_s11 = inlined_call_operand.hbm [shape: f32[4,8], index: 11, kind: output, shape index: {}]  }
   0x1   :  { %17 = vsyncpa [#allocation6], 0 }
   0x2   :  { %18 = vsyncpa [#allocation9], 0 }
   0x3   :  { %19 = vsyncpa [#allocation12], 0 }
   0x4   :  { %20 = vsyncpa [#allocation15], 0  ;;  %s37_s19 = sshll.u32 %s9031_s1, 4  ;;  %s38_s19 = int_to_ptr.hbm [resolvable:$true] %s37_s19 }
   0x5   :  { %21 = vsyncpa [#allocation4], 0  ;;  %s8647_s20 = smov [#allocation5]   ;;  %s61_s24 = sshll.u32 %s9033_s3, 4  ;;  %s62_s24 = int_to_ptr.hbm [resolvable:$true] %s61_s24 }
   0x6   :  { %s39_s21 = sshll.u32 %s8647_s20, 4  ;;  %s8648_s25 = smov 1024   ;;  %s40_s21 = int_to_ptr.vmem [resolvable:$true] %s39_s21 }
   0x7   :  { %s8649_s26 = smov 64   ;;  %s8650_s27 = smov [#allocation8]  }
   0x8   :  { %45 = dma.hbm_to_vmem [thread:$0]  %s38_s19, 8192, %s40_s21, [#allocation6], %s8648_s25, %s8648_s25, %s8649_s26  }
   0x9   :  { %s63_s28 = sshll.u32 %s8650_s27, 4  ;;  %s8651_s29 = smov 256   ;;  %s64_s28 = int_to_ptr.vmem [resolvable:$true] %s63_s28 }
   0xa   :  { %s8652_s30 = smov 16   ;;  %s85_s13 = sshll.u32 %s9035_s5, 4  ;;  %s86_s13 = int_to_ptr.hbm [resolvable:$true] %s85_s13 }
   0xb   :  { %69 = dma.hbm_to_vmem [thread:$0]  %s62_s24, 65536, %s64_s28, [#allocation9], %s8651_s29, %s8651_s29, %s8652_s30  }
   0xc   :  { %s8653_s14 = smov [#allocation11]   ;;  %s8654_s16 = smov 4  }
   0xd   :  { %s87_s15 = sshll.u32 %s8653_s14, 4  ;;  %s112_s18 = sshll.u32 %s9038_s8, 4  ;;  %s88_s15 = int_to_ptr.vmem [resolvable:$true] %s87_s15  ;;  %s113_s18 = int_to_ptr.hbm [resolvable:$true] %s112_s18 }
   0xe   :  { %93 = dma.hbm_to_vmem [thread:$0]  %s86_s13, 4096, %s88_s15, [#allocation12], %s8649_s26, %s8649_s26, %s8654_s16  }
   0xf   :  { %s8655_s19 = smov [#allocation14]   ;;  %s27_s23 = sshll.u32 %s9030_s0, 4  ;;  %s28_s23 = int_to_ptr.hbm [resolvable:$true] %s27_s23 }
  0x10   :  { %s114_s20 = sshll.u32 %s8655_s19, 4  ;;  %s8656_s5 = smov [#allocation2]   ;;  %s115_s20 = int_to_ptr.vmem [resolvable:$true] %s114_s20 }
  0x11   :  { %117 = dma.hbm_to_vmem [thread:$0]  %s113_s18, 16, %s115_s20, [#allocation15]  }
  0x12   :  { %s29_s24 = sshll.u32 %s8656_s5, 4  ;;  %s51_s26 = sshll.u32 %s9032_s2, 4  ;;  %s30_s24 = int_to_ptr.vmem [resolvable:$true] %s29_s24  ;;  %s52_s26 = int_to_ptr.hbm [resolvable:$true] %s51_s26 }
  0x13   :  { %32 = dma.hbm_to_vmem [thread:$0]  %s28_s23, 64, %s30_s24, [#allocation3]  }
  0x14   :  { %s75_s29 = sshll.u32 %s9034_s4, 4  ;;  %s8657_s30 = smov [#allocation7]   ;;  %s76_s29 = int_to_ptr.hbm [resolvable:$true] %s75_s29 }
  0x15   :  { %s53_s1 = sshll.u32 %s8657_s30, 4  ;;  %s8658_s0 = smov [#allocation10]   ;;  %s54_s1 = int_to_ptr.vmem [resolvable:$true] %s53_s1 }
  0x16   :  { %56 = dma.hbm_to_vmem [thread:$0]  %s52_s26, 256, %s54_s1, [#allocation6]  }
  0x17   :  { %s77_s12 = sshll.u32 %s8658_s0, 4  ;;  %s99_s15 = sshll.u32 %s9036_s6, 4  ;;  %s78_s12 = int_to_ptr.vmem [resolvable:$true] %s77_s12  ;;  %s100_s15 = int_to_ptr.hbm [resolvable:$true] %s99_s15 }
  0x18   :  { %80 = dma.hbm_to_vmem [thread:$0]  %s76_s29, 64, %s78_s12, [#allocation9]  }
  0x19   :  { %s125_s3 = sshll.u32 %s9040_s10, 4  ;;  %s8659_s17 = smov [#allocation13]   ;;  %s126_s3 = int_to_ptr.hbm [resolvable:$true] %s125_s3 }
  0x1a   :  { %s101_s4 = sshll.u32 %s8659_s17, 4  ;;  %s8660_s18 = smov [#allocation16]   ;;  %s102_s4 = int_to_ptr.vmem [resolvable:$true] %s101_s4 }
  0x1b   :  { %104 = dma.hbm_to_vmem [thread:$0]  %s100_s15, 16, %s102_s4, [#allocation12]  }
  0x1c   :  { %s127_s19 = sshll.u32 %s8660_s18, 4  ;;  %s128_s19 = int_to_ptr.vmem [resolvable:$true] %s127_s19 }
  0x1d   :  { %130 = dma.hbm_to_vmem [thread:$0]  %s126_s3, 16, %s128_s19, [#allocation15]  }
  0x1e   :  { %8635 = dma.done.wait [#allocation3], 64  }
  0x1f   :  { %8636 = vsyncadd [#allocation3], 4294967232 }
  0x20   :  { %8637 = dma.done.wait [#allocation6], 8448  }
  0x21   :  { %8638 = vsyncadd [#allocation6], 4294958848 }
  0x22   :  { %8639 = dma.done.wait [#allocation9], 65600  }
  0x23   :  { %8640 = vsyncadd [#allocation9], 4294901696 }
  0x24   :  { %8641 = dma.done.wait [#allocation12], 4112  }
  0x25   :  { %8642 = vsyncadd [#allocation12], 4294963184 }
  0x26   :  { %8643 = dma.done.wait [#allocation15], 32  }
  0x27   :  { %8644 = vsyncadd [#allocation15], 4294967264  ;;  %v5463_v0 = vld [vmem:[#allocation5 + $0x180] sm:$0xf]  ;;  %v7806_v2 = vld [vmem:[#allocation5 + $0x184] sm:$0xf] }
  0x28   :  { %v7814_v1 = vld [vmem:[#allocation5 + $0x1bc] sm:$0xf0]  ;;  %v5465_v4 = vld [vmem:[#allocation5 + $0x1c0] sm:$0xf0]  ;;  %v7807_v5 = vld [vmem:[#allocation5 + $0x18c] sm:$0xf] }
  0x29   :  { %v5464_v3 = vor.u32 %v7814_v1, %v5463_v0  ;;  %v5473_v6 = vld [vmem:[#allocation5 + $0x1c8] sm:$0xf0]  ;;  %v5468_v7 = vor.u32 %v7806_v2, %v5465_v4  ;;  %v5399_v9 = vld [vmem:[#allocation5 + $0x100] sm:$0xf]  ;;  %v7790_v11 = vld [vmem:[#allocation5 + $0x104] sm:$0xf] }
  0x2a   :  { %v5476_v8 = vor.u32 %v7807_v5, %v5473_v6  ;;  %v7798_v10 = vld [vmem:[#allocation5 + $0x13c] sm:$0xf0]  ;;  %v5401_v13 = vld [vmem:[#allocation5 + $0x140] sm:$0xf0]  ;;  %v7791_v14 = vld [vmem:[#allocation5 + $0x10c] sm:$0xf] }
  0x2b   :  { %620 = vmatpush.bf16.msra.mxu2 %v5464_v3  ;;  %v5400_v12 = vor.u32 %v7798_v10, %v5399_v9  ;;  %v5409_v15 = vld [vmem:[#allocation5 + $0x148] sm:$0xf0]  ;;  %633 = vmatpush.bf16.msra.mxu1 %v5468_v7  ;;  %v5404_v16 = vor.u32 %v7790_v11, %v5401_v13  ;;  %v5335_v18 = vld [vmem:[#allocation5 + $0x80] sm:$0xf]  ;;  %v7774_v20 = vld [vmem:[#allocation5 + $0x84] sm:$0xf] }
  0x2c   :  { %659 = vmatpush.bf16.msra.mxu3 %v5476_v8  ;;  %v5412_v17 = vor.u32 %v7791_v14, %v5409_v15  ;;  %v7782_v19 = vld [vmem:[#allocation5 + $0xbc] sm:$0xf0]  ;;  %v5337_v21 = vld [vmem:[#allocation5 + $0xc0] sm:$0xf0]  ;;  %v7775_v22 = vld [vmem:[#allocation5 + $0x8c] sm:$0xf] }
  0x2d   :  { %v5345_v23 = vld [vmem:[#allocation5 + $0xc8] sm:$0xf0]  ;;  %v5336_v24 = vor.u32 %v7782_v19, %v5335_v18  ;;  %v5340_v25 = vor.u32 %v7774_v20, %v5337_v21  ;;  %v5271_v27 = vld [vmem:[#allocation5] sm:$0xf]  ;;  %v7758_v29 = vld [vmem:[#allocation5 + $0x4] sm:$0xf] }
  0x2e   :  { %v5348_v26 = vor.u32 %v7775_v22, %v5345_v23  ;;  %v7766_v28 = vld [vmem:[#allocation5 + $0x3c] sm:$0xf0]  ;;  %v5273_v30 = vld [vmem:[#allocation5 + $0x40] sm:$0xf0]  ;;  %v7759_v31 = vld [vmem:[#allocation5 + $0xc] sm:$0xf] }
  0x2f   :  { %621 = vmatpush.bf16.msra.mxu2 %v5400_v12  ;;  %634 = vmatpush.bf16.msra.mxu1 %v5404_v16  ;;  %v5281_v32 = vld [vmem:[#allocation5 + $0x48] sm:$0xf0]  ;;  %v168_v33 = vld [vmem:[#allocation2] sm:$0xf]  ;;  %v5471_v34 = vld [vmem:[#allocation5 + $0x188] sm:$0xf]  ;;  %v5272_v36 = vor.u32 %v7766_v28, %v5271_v27  ;;  %v5276_v40 = vor.u32 %v7758_v29, %v5273_v30 }
  0x30   :  { %660 = vmatpush.bf16.msra.mxu3 %v5412_v17  ;;  %v7815_v35 = vld [vmem:[#allocation5 + $0x1c4] sm:$0xf0]  ;;  %v7808_v37 = vld [vmem:[#allocation5 + $0x194] sm:$0xf]  ;;  %v7809_v39 = vld [vmem:[#allocation5 + $0x19c] sm:$0xf]  ;;  %v5284_v41 = vor.u32 %v7759_v31, %v5281_v32  ;;  %v8749_v50 = vpack.c.bf16 %v168_v33, %v168_v33 }
  0x31   :  { %v5481_v38 = vld [vmem:[#allocation5 + $0x1d0] sm:$0xf0]  ;;  %v5489_v42 = vld [vmem:[#allocation5 + $0x1d8] sm:$0xf0]  ;;  %v5479_v43 = vld [vmem:[#allocation5 + $0x190] sm:$0xf]  ;;  %v5472_v45 = vor.u32 %v7815_v35, %v5471_v34 }
  0x32   :  { %v7816_v44 = vld [vmem:[#allocation5 + $0x1cc] sm:$0xf0]  ;;  %vm612_vm0 = vcmask 523264   ;;  %v5407_v46 = vld [vmem:[#allocation5 + $0x108] sm:$0xf]  ;;  %v5484_v48 = vor.u32 %v7808_v37, %v5481_v38  ;;  %v5492_v51 = vor.u32 %v7809_v39, %v5489_v42  ;;  %vm5197_vm1 = vcmask 261120  }
  0x33   :  { %622 = vmatpush.bf16.msra.mxu2 %v5336_v24  ;;  %635 = vmatpush.bf16.msra.mxu1 %v5340_v25  ;;  %v7799_v47 = vld [vmem:[#allocation5 + $0x144] sm:$0xf0]  ;;  %v5480_v49 = vor.u32 %v7816_v44, %v5479_v43  ;;  %v7792_v52 = vld [vmem:[#allocation5 + $0x114] sm:$0xf]  ;;  %v7793_v54 = vld [vmem:[#allocation5 + $0x11c] sm:$0xf] }
  0x34   :  { %661 = vmatpush.bf16.msra.mxu3 %v5348_v26  ;;  %v5417_v53 = vld [vmem:[#allocation5 + $0x150] sm:$0xf0]  ;;  %v5425_v55 = vld [vmem:[#allocation5 + $0x158] sm:$0xf0]  ;;  %v5415_v56 = vld [vmem:[#allocation5 + $0x110] sm:$0xf]  ;;  %v5408_v59 = vor.u32 %v7799_v47, %v5407_v46 }
  0x35   :  { %672 = vmatpush.bf16.msra.mxu0 %v5480_v49  ;;  %v7800_v57 = vld [vmem:[#allocation5 + $0x14c] sm:$0xf0]  ;;  %v5343_v60 = vld [vmem:[#allocation5 + $0x88] sm:$0xf]  ;;  %v5420_v62 = vor.u32 %v7792_v52, %v5417_v53  ;;  %v5428_v0 = vor.u32 %v7793_v54, %v5425_v55  ;;  %v7776_v1 = vld [vmem:[#allocation5 + $0x94] sm:$0xf] }
  0x36   :  { %v5416_v58 = vor.u32 %v7800_v57, %v5415_v56  ;;  %v7783_v61 = vld [vmem:[#allocation5 + $0xc4] sm:$0xf0]  ;;  %v5351_v63 = vld [vmem:[#allocation5 + $0x90] sm:$0xf]  ;;  %v5353_v2 = vld [vmem:[#allocation5 + $0xd0] sm:$0xf0] }
  0x37   :  { %623 = vmatpush.bf16.msra.mxu2 %v5272_v36  ;;  %636 = vmatpush.bf16.msra.mxu1 %v5276_v40  ;;  %v7784_v3 = vld [vmem:[#allocation5 + $0xcc] sm:$0xf0]  ;;  %v7777_v4 = vld [vmem:[#allocation5 + $0x9c] sm:$0xf]  ;;  %v5279_v6 = vld [vmem:[#allocation5 + $0x8] sm:$0xf]  ;;  %v5344_v8 = vor.u32 %v7783_v61, %v5343_v60  ;;  %v5356_v10 = vor.u32 %v7776_v1, %v5353_v2 }
  0x38   :  { %662 = vmatpush.bf16.msra.mxu3 %v5284_v41  ;;  %v5361_v5 = vld [vmem:[#allocation5 + $0xd8] sm:$0xf0]  ;;  %v5352_v7 = vor.u32 %v7784_v3, %v5351_v63  ;;  %v7767_v9 = vld [vmem:[#allocation5 + $0x44] sm:$0xf0]  ;;  %v5287_v11 = vld [vmem:[#allocation5 + $0x10] sm:$0xf] }
  0x39   :  { %673 = vmatpush.bf16.msra.mxu0 %v5416_v58  ;;  %v7768_v12 = vld [vmem:[#allocation5 + $0x4c] sm:$0xf0]  ;;  %v5487_v13 = vld [vmem:[#allocation5 + $0x198] sm:$0xf]  ;;  %v5364_v14 = vor.u32 %v7777_v4, %v5361_v5  ;;  %v7760_v15 = vld [vmem:[#allocation5 + $0x14] sm:$0xf]  ;;  %v5280_v24 = vor.u32 %v7767_v9, %v5279_v6 }
  0x3a   :  { %5525 = vmatmul.msk.bf16.vlgmr.msra.gmra.mxu2 %vm612_vm0, %v8749_v50  ;;  %5526 = vmatmul.msk.bf16.vlgmr.msra.gmra.mxu1 %vm612_vm0, %v8749_v50  ;;  %v5289_v16 = vld [vmem:[#allocation5 + $0x50] sm:$0xf0]  ;;  %v7817_v17 = vld [vmem:[#allocation5 + $0x1d4] sm:$0xf0]  ;;  %v7761_v18 = vld [vmem:[#allocation5 + $0x1c] sm:$0xf]  ;;  %v5288_v20 = vor.u32 %v7768_v12, %v5287_v11 }
  0x3b   :  { %646 = vmatpush.bf16.msrb.mxu2 %v5472_v45  ;;  %685 = vmatpush.bf16.msrb.mxu1 %v5484_v48  ;;  %v5297_v19 = vld [vmem:[#allocation5 + $0x58] sm:$0xf0]  ;;  %v5495_v21 = vld [vmem:[#allocation5 + $0x1a0] sm:$0xf]  ;;  %v7810_v22 = vld [vmem:[#allocation5 + $0x1a4] sm:$0xf]  ;;  %v5292_v25 = vor.u32 %v7760_v15, %v5289_v16  ;;  %v5488_v29 = vor.u32 %v7817_v17, %v5487_v13 }
  0x3c   :  { %711 = vmatpush.bf16.msrb.mxu3 %v5492_v51  ;;  %v5497_v23 = vld [vmem:[#allocation5 + $0x1e0] sm:$0xf0]  ;;  %v7818_v26 = vld [vmem:[#allocation5 + $0x1dc] sm:$0xf0]  ;;  %v7811_v27 = vld [vmem:[#allocation5 + $0x1ac] sm:$0xf]  ;;  %v5300_v30 = vor.u32 %v7761_v18, %v5297_v19 }
  0x3d   :  { %5528 = vmatmul.msk.bf16.vlgmr.msra.gmra.mxu3 %vm612_vm0, %v8749_v50  ;;  %674 = vmatpush.bf16.msra.mxu0 %v5352_v7  ;;  %v5505_v28 = vld [vmem:[#allocation5 + $0x1e8] sm:$0xf0]  ;;  %v5500_v31 = vor.u32 %v7810_v22, %v5497_v23  ;;  %v5423_v32 = vld [vmem:[#allocation5 + $0x118] sm:$0xf]  ;;  %v5496_v34 = vor.u32 %v7818_v26, %v5495_v21  ;;  %v5431_v36 = vld [vmem:[#allocation5 + $0x120] sm:$0xf] }
  0x3e   :  { %v7801_v33 = vld [vmem:[#allocation5 + $0x154] sm:$0xf0]  ;;  %v5508_v35 = vor.u32 %v7811_v27, %v5505_v28  ;;  %v7802_v37 = vld [vmem:[#allocation5 + $0x15c] sm:$0xf0]  ;;  %v7794_v38 = vld [vmem:[#allocation5 + $0x124] sm:$0xf] }
  0x3f   :  { %647 = vmatpush.bf16.msrb.mxu2 %v5408_v59  ;;  %686 = vmatpush.bf16.msrb.mxu1 %v5420_v62  ;;  %v5433_v39 = vld [vmem:[#allocation5 + $0x160] sm:$0xf0]  ;;  %v7795_v40 = vld [vmem:[#allocation5 + $0x12c] sm:$0xf]  ;;  %v5424_v42 = vor.u32 %v7801_v33, %v5423_v32  ;;  %v5359_v43 = vld [vmem:[#allocation5 + $0x98] sm:$0xf]  ;;  %v5432_v45 = vor.u32 %v7802_v37, %v5431_v36 }
  0x40   :  { %712 = vmatpush.bf16.msrb.mxu3 %v5428_v0  ;;  %v5441_v41 = vld [vmem:[#allocation5 + $0x168] sm:$0xf0]  ;;  %v7785_v44 = vld [vmem:[#allocation5 + $0xd4] sm:$0xf0]  ;;  %v5436_v46 = vor.u32 %v7794_v38, %v5433_v39  ;;  %v5367_v48 = vld [vmem:[#allocation5 + $0xa0] sm:$0xf] }
  0x41   :  { %675 = vmatpush.bf16.msra.mxu0 %v5288_v20  ;;  %v5444_v47 = vor.u32 %v7795_v40, %v5441_v41  ;;  %v7786_v49 = vld [vmem:[#allocation5 + $0xdc] sm:$0xf0]  ;;  %v7778_v51 = vld [vmem:[#allocation5 + $0xa4] sm:$0xf]  ;;  %v7779_v53 = vld [vmem:[#allocation5 + $0xac] sm:$0xf]  ;;  %v5360_v55 = vor.u32 %v7785_v44, %v5359_v43 }
  0x42   :  { %v5369_v52 = vld [vmem:[#allocation5 + $0xe0] sm:$0xf0]  ;;  %v5377_v54 = vld [vmem:[#allocation5 + $0xe8] sm:$0xf0]  ;;  %v5295_v56 = vld [vmem:[#allocation5 + $0x18] sm:$0xf]  ;;  %v5368_v60 = vor.u32 %v7786_v49, %v5367_v48 }
  0x43   :  { %648 = vmatpush.bf16.msrb.mxu2 %v5344_v8  ;;  %687 = vmatpush.bf16.msrb.mxu1 %v5356_v10  ;;  %v7769_v57 = vld [vmem:[#allocation5 + $0x54] sm:$0xf0]  ;;  %v5503_v58 = vld [vmem:[#allocation5 + $0x1a8] sm:$0xf]  ;;  %v5303_v61 = vld [vmem:[#allocation5 + $0x20] sm:$0xf]  ;;  %v5372_v62 = vor.u32 %v7778_v51, %v5369_v52  ;;  %v5380_v63 = vor.u32 %v7779_v53, %v5377_v54 }
  0x44   :  { %713 = vmatpush.bf16.msrb.mxu3 %v5364_v14  ;;  %5529 = vmatmul.msk.bf16.vlgmr.msra.gmra.mxu0 %vm612_vm0, %v8749_v50  ;;  %v7819_v59 = vld [vmem:[#allocation5 + $0x1e4] sm:$0xf0]  ;;  %v7770_v0 = vld [vmem:[#allocation5 + $0x5c] sm:$0xf0]  ;;  %v7762_v1 = vld [vmem:[#allocation5 + $0x24] sm:$0xf]  ;;  %v5296_v6 = vor.u32 %v7769_v57, %v5295_v56 }
  0x45   :  { %724 = vmatpush.bf16.msrb.mxu0 %v5496_v34  ;;  %v5305_v2 = vld [vmem:[#allocation5 + $0x60] sm:$0xf0]  ;;  %v7763_v3 = vld [vmem:[#allocation5 + $0x2c] sm:$0xf]  ;;  %v5511_v5 = vld [vmem:[#allocation5 + $0x1b0] sm:$0xf]  ;;  %v5504_v10 = vor.u32 %v7819_v59, %v5503_v58  ;;  %v5304_v11 = vor.u32 %v7770_v0, %v5303_v61 }
  0x46   :  { %v5313_v4 = vld [vmem:[#allocation5 + $0x68] sm:$0xf0]  ;;  %v7820_v7 = vld [vmem:[#allocation5 + $0x1ec] sm:$0xf0]  ;;  %v7812_v8 = vld [vmem:[#allocation5 + $0x1b4] sm:$0xf]  ;;  %v5308_v16 = vor.u32 %v7762_v1, %v5305_v2 }
  0x47   :  { %649 = vmatpush.bf16.msrb.mxu2 %v5280_v24  ;;  %688 = vmatpush.bf16.msrb.mxu1 %v5292_v25  ;;  %v5513_v9 = vld [vmem:[#allocation5 + $0x1f0] sm:$0xf0]  ;;  %v7813_v12 = vld [vmem:[#allocation5 + $0x1bc] sm:$0xf]  ;;  %v5439_v14 = vld [vmem:[#allocation5 + $0x128] sm:$0xf]  ;;  %v5316_v17 = vor.u32 %v7763_v3, %v5313_v4  ;;  %v5512_v18 = vor.u32 %v7820_v7, %v5511_v5 }
  0x48   :  { %714 = vmatpush.bf16.msrb.mxu3 %v5300_v30  ;;  %v5521_v13 = vld [vmem:[#allocation5 + $0x1f8] sm:$0xf0]  ;;  %v7803_v15 = vld [vmem:[#allocation5 + $0x164] sm:$0xf0]  ;;  %v5516_v19 = vor.u32 %v7812_v8, %v5513_v9  ;;  %v5447_v20 = vld [vmem:[#allocation5 + $0x130] sm:$0xf] }
  0x49   :  { %725 = vmatpush.bf16.msrb.mxu0 %v5432_v45  ;;  %v7804_v21 = vld [vmem:[#allocation5 + $0x16c] sm:$0xf0]  ;;  %v5524_v22 = vor.u32 %v7813_v12, %v5521_v13  ;;  %v5440_v23 = vor.u32 %v7803_v15, %v5439_v14  ;;  %v7797_v24 = vld [vmem:[#allocation5 + $0x13c] sm:$0xf]  ;;  %v5375_v26 = vld [vmem:[#allocation5 + $0xa8] sm:$0xf] }
  0x4a   :  { %5527 = vmatmul.msk.bf16.vlgmr.msrb.gmra.mxu2 %vm612_vm0, %v8749_v50  ;;  %5530 = vmatmul.msk.bf16.vlgmr.msrb.gmra.mxu1 %vm612_vm0, %v8749_v50  ;;  %v5457_v25 = vld [vmem:[#allocation5 + $0x178] sm:$0xf0]  ;;  %v7787_v27 = vld [vmem:[#allocation5 + $0xe4] sm:$0xf0]  ;;  %v5448_v28 = vor.u32 %v7804_v21, %v5447_v20  ;;  %v5449_v30 = vld [vmem:[#allocation5 + $0x170] sm:$0xf0] }
  0x4b   :  { %698 = vmatpush.bf16.msra.mxu2 %v5488_v29  ;;  %737 = vmatpush.bf16.msra.mxu1 %v5500_v31  ;;  %v7796_v29 = vld [vmem:[#allocation5 + $0x134] sm:$0xf]  ;;  %v5383_v31 = vld [vmem:[#allocation5 + $0xb0] sm:$0xf]  ;;  %v5460_v33 = vor.u32 %v7797_v24, %v5457_v25  ;;  %v5376_v34 = vor.u32 %v7787_v27, %v5375_v26  ;;  %v5393_v36 = vld [vmem:[#allocation5 + $0xf8] sm:$0xf0] }
  0x4c   :  { %763 = vmatpush.bf16.msra.mxu3 %v5508_v35  ;;  %v7788_v32 = vld [vmem:[#allocation5 + $0xec] sm:$0xf0]  ;;  %v7781_v35 = vld [vmem:[#allocation5 + $0xbc] sm:$0xf]  ;;  %v5311_v37 = vld [vmem:[#allocation5 + $0x28] sm:$0xf]  ;;  %v5452_v39 = vor.u32 %v7796_v29, %v5449_v30 }
  0x4d   :  { %5532 = vmatmul.msk.bf16.vlgmr.msrb.gmra.mxu3 %vm612_vm0, %v8749_v50  ;;  %726 = vmatpush.bf16.msrb.mxu0 %v5368_v60  ;;  %v7771_v38 = vld [vmem:[#allocation5 + $0x64] sm:$0xf0]  ;;  %v7780_v40 = vld [vmem:[#allocation5 + $0xb4] sm:$0xf]  ;;  %v5384_v41 = vor.u32 %v7788_v32, %v5383_v31  ;;  %v5519_v43 = vld [vmem:[#allocation5 + $0x1b8] sm:$0xf] }
  0x4e   :  { %v7821_v44 = vld [vmem:[#allocation5 + $0x1f4] sm:$0xf0]  ;;  %v5319_v45 = vld [vmem:[#allocation5 + $0x30] sm:$0xf]  ;;  %v7765_v48 = vld [vmem:[#allocation5 + $0x3c] sm:$0xf]  ;;  %v5312_v49 = vor.u32 %v7771_v38, %v5311_v37 }
  0x4f   :  { %699 = vmatpush.bf16.msra.mxu2 %v5424_v42  ;;  %738 = vmatpush.bf16.msra.mxu1 %v5436_v46  ;;  %v5385_v42 = vld [vmem:[#allocation5 + $0xf0] sm:$0xf0]  ;;  %v7772_v46 = vld [vmem:[#allocation5 + $0x6c] sm:$0xf0]  ;;  %v5329_v51 = vld [vmem:[#allocation5 + $0x78] sm:$0xf0] }
  0x50   :  { %764 = vmatpush.bf16.msra.mxu3 %v5444_v47  ;;  %v5396_v47 = vor.u32 %v7781_v35, %v5393_v36  ;;  %v5655_v52 = vld [vmem:[#allocation8 + $0xe0] sm:$0xf]  ;;  %v7852_v53 = vld [vmem:[#allocation8 + $0xec] sm:$0xf0]  ;;  %v5388_v54 = vor.u32 %v7780_v40, %v5385_v42  ;;  %v7764_v56 = vld [vmem:[#allocation5 + $0x34] sm:$0xf]  ;;  %v5320_v59 = vor.u32 %v7772_v46, %v5319_v45 }
  0x51   :  { %727 = vmatpush.bf16.msrb.mxu0 %v5304_v11  ;;  %v6039_v57 = vld [vmem:[#allocation8 + $0x3e0] sm:$0xf]  ;;  %v7948_v58 = vld [vmem:[#allocation8 + $0x3ec] sm:$0xf0]  ;;  %v5321_v60 = vld [vmem:[#allocation5 + $0x70] sm:$0xf0]  ;;  %v5656_v2 = vor.u32 %v7852_v53, %v5655_v52 }
  0x52   :  { %v5455_v61 = vld [vmem:[#allocation5 + $0x138] sm:$0xf]  ;;  %v5783_v0 = vld [vmem:[#allocation8 + $0x1e0] sm:$0xf]  ;;  %v7884_v1 = vld [vmem:[#allocation8 + $0x1ec] sm:$0xf0]  ;;  %v6040_v3 = vor.u32 %v7948_v58, %v6039_v57  ;;  %v5324_v5 = vor.u32 %v7764_v56, %v5321_v60 }
  0x53   :  { %700 = vmatpush.bf16.msra.mxu2 %v5360_v55  ;;  %739 = vmatpush.bf16.msra.mxu1 %v5372_v62  ;;  %v5520_v55 = vor.u32 %v7821_v44, %v5519_v43  ;;  %v7805_v62 = vld [vmem:[#allocation5 + $0x174] sm:$0xf0]  ;;  %v5639_v4 = vld [vmem:[#allocation8 + $0xc0] sm:$0xf]  ;;  %v7848_v7 = vld [vmem:[#allocation8 + $0xcc] sm:$0xf0]  ;;  %v5784_v12 = vor.u32 %v7884_v1, %v5783_v0 }
  0x54   :  { %765 = vmatpush.bf16.msra.mxu3 %v5380_v63  ;;  %5533 = vmatmul.msk.bf16.vlgmr.msrb.gmra.mxu0 %vm612_vm0, %v8749_v50  ;;  %v5332_v63 = vor.u32 %v7765_v48, %v5329_v51  ;;  %v6023_v8 = vld [vmem:[#allocation8 + $0x3c0] sm:$0xf]  ;;  %v7944_v9 = vld [vmem:[#allocation8 + $0x3cc] sm:$0xf0]  ;;  %v7789_v11 = vld [vmem:[#allocation5 + $0xf4] sm:$0xf0] }
  0x55   :  { %776 = vmatpush.bf16.msra.mxu0 %v5512_v18  ;;  %v5767_v13 = vld [vmem:[#allocation8 + $0x1c0] sm:$0xf]  ;;  %v7880_v14 = vld [vmem:[#allocation8 + $0x1cc] sm:$0xf0]  ;;  %v5327_v15 = vld [vmem:[#allocation5 + $0x38] sm:$0xf] }
  0x56   :  { %v5623_v20 = vld [vmem:[#allocation8 + $0xa0] sm:$0xf]  ;;  %v7844_v21 = vld [vmem:[#allocation8 + $0xac] sm:$0xf0]  ;;  %vm5214_vm2 = vcmask 60416   ;;  %s5255_s16 = sshll.u32 %s9041_s11, 4  ;;  %s5256_s16 = int_to_ptr.hbm [resolvable:$true] %s5255_s16 }
  0x57   :  { %701 = vmatpush.bf16.msra.mxu2 %v5296_v6  ;;  %740 = vmatpush.bf16.msra.mxu1 %v5308_v16  ;;  %v5456_v6 = vor.u32 %v7805_v62, %v5455_v61  ;;  %v5640_v16 = vor.u32 %v7848_v7, %v5639_v4  ;;  %v6007_v24 = vld [vmem:[#allocation8 + $0x3a0] sm:$0xf]  ;;  %v7940_v25 = vld [vmem:[#allocation8 + $0x3ac] sm:$0xf0]  ;;  %v5624_v29 = vor.u32 %v7844_v21, %v5623_v20 }
  0x58   :  { %766 = vmatpush.bf16.msra.mxu3 %v5316_v17  ;;  %v6024_v17 = vor.u32 %v7944_v9, %v6023_v8  ;;  %v7876_v26 = vld [vmem:[#allocation8 + $0x1ac] sm:$0xf0]  ;;  %v5911_v27 = vld [vmem:[#allocation8 + $0x2e0] sm:$0xf]  ;;  %v6008_v31 = vor.u32 %v7940_v25, %v6007_v24 }
  0x59   :  { %777 = vmatpush.bf16.msra.mxu0 %v5448_v28  ;;  %v7916_v28 = vld [vmem:[#allocation8 + $0x2ec] sm:$0xf0]  ;;  %v5607_v32 = vld [vmem:[#allocation8 + $0x80] sm:$0xf] }
  0x5a   :  { %5531 = vmatmul.msk.bf16.vlgmr.msra.gmra.mxu2 %vm612_vm0, %v8749_v50  ;;  %5534 = vmatmul.msk.bf16.vlgmr.msra.gmra.mxu1 %vm612_vm0, %v8749_v50  ;;  %v5735_v35 = vld [vmem:[#allocation8 + $0x180] sm:$0xf]  ;;  %v7936_v37 = vld [vmem:[#allocation8 + $0x38c] sm:$0xf0]  ;;  %v5912_v38 = vor.u32 %v7916_v28, %v5911_v27 }
  0x5b   :  { %750 = vmatpush.bf16.msrb.mxu2 %v5504_v10  ;;  %789 = vmatpush.bf16.msrb.mxu1 %v5516_v19  ;;  %v5391_v10 = vld [vmem:[#allocation5 + $0xb8] sm:$0xf]  ;;  %v5991_v36 = vld [vmem:[#allocation8 + $0x380] sm:$0xf]  ;;  %v7836_v45 = vld [vmem:[#allocation8 + $0x6c] sm:$0xf0] }
  0x5c   :  { %815 = vmatpush.bf16.msrb.mxu3 %v5524_v22  ;;  %v5392_v18 = vor.u32 %v7789_v11, %v5391_v10  ;;  %v7773_v19 = vld [vmem:[#allocation5 + $0x74] sm:$0xf0]  ;;  %v5768_v22 = vor.u32 %v7880_v14, %v5767_v13  ;;  %v5895_v40 = vld [vmem:[#allocation8 + $0x2c0] sm:$0xf]  ;;  %v5992_v43 = vor.u32 %v7936_v37, %v5991_v36  ;;  %v7868_v52 = vld [vmem:[#allocation8 + $0x16c] sm:$0xf0] }
  0x5d   :  { %5536 = vmatmul.msk.bf16.vlgmr.msra.gmra.mxu3 %vm612_vm0, %v8749_v50  ;;  %778 = vmatpush.bf16.msra.mxu0 %v5384_v41  ;;  %v5328_v30 = vor.u32 %v7773_v19, %v5327_v15  ;;  %v7912_v41 = vld [vmem:[#allocation8 + $0x2cc] sm:$0xf0]  ;;  %v5591_v44 = vld [vmem:[#allocation8 + $0x60] sm:$0xf] }
  0x5e   :  { %v5975_v48 = vld [vmem:[#allocation8 + $0x360] sm:$0xf]  ;;  %v5896_v51 = vor.u32 %v7912_v41, %v5895_v40  ;;  %v7832_v58 = vld [vmem:[#allocation8 + $0x4c] sm:$0xf0] }
  0x5f   :  { %751 = vmatpush.bf16.msrb.mxu2 %v5440_v23  ;;  %790 = vmatpush.bf16.msrb.mxu1 %v5452_v39  ;;  %v5751_v23 = vld [vmem:[#allocation8 + $0x1a0] sm:$0xf]  ;;  %v7872_v39 = vld [vmem:[#allocation8 + $0x18c] sm:$0xf0] }
  0x60   :  { %816 = vmatpush.bf16.msrb.mxu3 %v5460_v33  ;;  %v7840_v33 = vld [vmem:[#allocation8 + $0x8c] sm:$0xf0]  ;;  %v5736_v46 = vor.u32 %v7872_v39, %v5735_v35  ;;  %v5879_v53 = vld [vmem:[#allocation8 + $0x2a0] sm:$0xf] }
  0x61   :  { %779 = vmatpush.bf16.msra.mxu0 %v5320_v59  ;;  %v5608_v42 = vor.u32 %v7840_v33, %v5607_v32  ;;  %v5575_v57 = vld [vmem:[#allocation8 + $0x40] sm:$0xf]  ;;  %v7928_v61 = vld [vmem:[#allocation8 + $0x34c] sm:$0xf0] }
  0x62   :  { %v5959_v60 = vld [vmem:[#allocation8 + $0x340] sm:$0xf]  ;;  %v7864_v0 = vld [vmem:[#allocation8 + $0x14c] sm:$0xf0]  ;;  %v5576_v1 = vor.u32 %v7832_v58, %v5575_v57 }
  0x63   :  { %752 = vmatpush.bf16.msrb.mxu2 %v5376_v34  ;;  %791 = vmatpush.bf16.msrb.mxu1 %v5388_v54  ;;  %v5752_v34 = vor.u32 %v7876_v26, %v5751_v23  ;;  %v7908_v54 = vld [vmem:[#allocation8 + $0x2ac] sm:$0xf0]  ;;  %v5960_v4 = vor.u32 %v7928_v61, %v5959_v60  ;;  %v5943_v8 = vld [vmem:[#allocation8 + $0x320] sm:$0xf] }
  0x64   :  { %817 = vmatpush.bf16.msrb.mxu3 %v5396_v47  ;;  %5537 = vmatmul.msk.bf16.vlgmr.msra.gmra.mxu0 %vm612_vm0, %v8749_v50  ;;  %v5719_v47 = vld [vmem:[#allocation8 + $0x160] sm:$0xf]  ;;  %v5880_v62 = vor.u32 %v7908_v54, %v5879_v53  ;;  %v7924_v9 = vld [vmem:[#allocation8 + $0x32c] sm:$0xf0] }
  0x65   :  { %3943 = vmatpush.bf16.msrb.mxu0 %v5656_v2  ;;  %v5720_v59 = vor.u32 %v7868_v52, %v5719_v47  ;;  %v5863_v2 = vld [vmem:[#allocation8 + $0x280] sm:$0xf]  ;;  %v7860_v11 = vld [vmem:[#allocation8 + $0x12c] sm:$0xf0] }
  0x66   :  { %v5687_v10 = vld [vmem:[#allocation8 + $0x120] sm:$0xf]  ;;  %v7900_v15 = vld [vmem:[#allocation8 + $0x26c] sm:$0xf0] }
  0x67   :  { %753 = vmatpush.bf16.msrb.mxu2 %v5312_v49  ;;  %792 = vmatpush.bf16.msrb.mxu1 %v5324_v5  ;;  %v7932_v49 = vld [vmem:[#allocation8 + $0x36c] sm:$0xf0]  ;;  %v5559_v5 = vld [vmem:[#allocation8 + $0x20] sm:$0xf] }
  0x68   :  { %818 = vmatpush.bf16.msrb.mxu3 %v5332_v63  ;;  %v5976_v56 = vor.u32 %v7932_v49, %v5975_v48  ;;  %v5703_v63 = vld [vmem:[#allocation8 + $0x140] sm:$0xf]  ;;  %v7824_v20 = vld [vmem:[#allocation8 + $0xc] sm:$0xf0] }
  0x69   :  { %3944 = vmatpush.bf16.msrb.mxu0 %v5640_v16  ;;  %v5704_v7 = vor.u32 %v7864_v0, %v5703_v63  ;;  %v5847_v14 = vld [vmem:[#allocation8 + $0x260] sm:$0xf]  ;;  %v7920_v23 = vld [vmem:[#allocation8 + $0x30c] sm:$0xf0] }
  0x6a   :  { %5535 = vmatmul.msk.bf16.vlgmr.msrb.gmra.mxu2 %vm612_vm0, %v8749_v50  ;;  %5538 = vmatmul.msk.bf16.vlgmr.msrb.gmra.mxu1 %vm612_vm0, %v8749_v50  ;;  %v5671_v16 = vld [vmem:[#allocation8 + $0x100] sm:$0xf]  ;;  %v7980_v25 = vld [vmem:[#allocation8 + $0x4ec] sm:$0xf0] }
  0x6b   :  { %802 = vmatpush.bf16.msra.mxu2 %v5520_v55  ;;  %3956 = vmatpush.bf16.msra.mxu1 %v5784_v12  ;;  %v5592_v55 = vor.u32 %v7836_v45, %v5591_v44  ;;  %v5543_v19 = vld [vmem:[#allocation8] sm:$0xf]  ;;  %v8076_v28 = vld [vmem:[#allocation8 + $0x7ec] sm:$0xf0] }
  0x6c   :  { %3982 = vmatpush.bf16.msra.mxu3 %v6040_v3  ;;  %v7904_v3 = vld [vmem:[#allocation8 + $0x28c] sm:$0xf0]  ;;  %v5927_v21 = vld [vmem:[#allocation8 + $0x300] sm:$0xf] }
  0x6d   :  { %5540 = vmatmul.msk.bf16.vlgmr.msrb.gmra.mxu3 %vm612_vm0, %v8749_v50  ;;  %3945 = vmatpush.bf16.msrb.mxu0 %v5624_v29  ;;  %v5864_v12 = vor.u32 %v7904_v3, %v5863_v2  ;;  %v6167_v24 = vld [vmem:[#allocation8 + $0x4e0] sm:$0xf]  ;;  %v5848_v29 = vor.u32 %v7900_v15, %v5847_v14  ;;  %v7896_v33 = vld [vmem:[#allocation8 + $0x24c] sm:$0xf0] }
  0x6e   :  { %v6295_v26 = vld [vmem:[#allocation8 + $0x5e0] sm:$0xf]  ;;  %v6168_v35 = vor.u32 %v7980_v25, %v6167_v24  ;;  %v8008_v44 = vld [vmem:[#allocation8 + $0x5cc] sm:$0xf0] }
  0x6f   :  { %803 = vmatpush.bf16.msra.mxu2 %v5456_v6  ;;  %3957 = vmatpush.bf16.msra.mxu1 %v5768_v22  ;;  %v7828_v6 = vld [vmem:[#allocation8 + $0x2c] sm:$0xf0]  ;;  %v5688_v22 = vor.u32 %v7860_v11, %v5687_v10  ;;  %v6551_v27 = vld [vmem:[#allocation8 + $0x7e0] sm:$0xf] }
  0x70   :  { %3983 = vmatpush.bf16.msra.mxu3 %v6024_v17  ;;  %v5560_v13 = vor.u32 %v7828_v6, %v5559_v5  ;;  %v7856_v17 = vld [vmem:[#allocation8 + $0x10c] sm:$0xf0]  ;;  %v5831_v32 = vld [vmem:[#allocation8 + $0x240] sm:$0xf]  ;;  %v6552_v36 = vor.u32 %v8076_v28, %v6551_v27 }
  0x71   :  { %3946 = vmatpush.bf16.msrb.mxu0 %v5608_v42  ;;  %v6151_v37 = vld [vmem:[#allocation8 + $0x4c0] sm:$0xf]  ;;  %v8072_v42 = vld [vmem:[#allocation8 + $0x7cc] sm:$0xf0] }
  0x72   :  { %v6279_v40 = vld [vmem:[#allocation8 + $0x5c0] sm:$0xf]  ;;  %v8004_v57 = vld [vmem:[#allocation8 + $0x5ac] sm:$0xf0] }
  0x73   :  { %804 = vmatpush.bf16.msra.mxu2 %v5392_v18  ;;  %3958 = vmatpush.bf16.msra.mxu1 %v5752_v34  ;;  %v5944_v18 = vor.u32 %v7924_v9, %v5943_v8  ;;  %v5928_v34 = vor.u32 %v7920_v23, %v5927_v21  ;;  %v6535_v41 = vld [vmem:[#allocation8 + $0x7c0] sm:$0xf]  ;;  %v6280_v52 = vor.u32 %v8008_v44, %v6279_v40  ;;  %v7968_v63 = vld [vmem:[#allocation8 + $0x48c] sm:$0xf0] }
  0x74   :  { %3984 = vmatpush.bf16.msra.mxu3 %v6008_v31  ;;  %v5544_v31 = vor.u32 %v7824_v20, %v5543_v19  ;;  %v5815_v45 = vld [vmem:[#allocation8 + $0x220] sm:$0xf]  ;;  %v6536_v48 = vor.u32 %v8072_v42, %v6535_v41  ;;  %v8064_v2 = vld [vmem:[#allocation8 + $0x78c] sm:$0xf0] }
  0x75   :  { %3947 = vmatpush.bf16.msrb.mxu0 %v5592_v55  ;;  %v6135_v49 = vld [vmem:[#allocation8 + $0x4a0] sm:$0xf]  ;;  %v8068_v55 = vld [vmem:[#allocation8 + $0x7ac] sm:$0xf0] }
  0x76   :  { %v6263_v53 = vld [vmem:[#allocation8 + $0x5a0] sm:$0xf]  ;;  %v8000_v5 = vld [vmem:[#allocation8 + $0x58c] sm:$0xf0] }
  0x77   :  { %805 = vmatpush.bf16.msra.mxu2 %v5328_v30  ;;  %3959 = vmatpush.bf16.msra.mxu1 %v5736_v46  ;;  %v8012_v30 = vld [vmem:[#allocation8 + $0x5ec] sm:$0xf0]  ;;  %v6519_v54 = vld [vmem:[#allocation8 + $0x7a0] sm:$0xf]  ;;  %v6264_v0 = vor.u32 %v8004_v57, %v6263_v53 }
  0x78   :  { %3985 = vmatpush.bf16.msra.mxu3 %v5992_v43  ;;  %v6296_v39 = vor.u32 %v8012_v30, %v6295_v26  ;;  %v5832_v43 = vor.u32 %v7896_v33, %v5831_v32  ;;  %v7892_v46 = vld [vmem:[#allocation8 + $0x22c] sm:$0xf0]  ;;  %v5799_v58 = vld [vmem:[#allocation8 + $0x200] sm:$0xf]  ;;  %v6520_v61 = vor.u32 %v8068_v55, %v6519_v54 }
  0x79   :  { %3948 = vmatpush.bf16.msrb.mxu0 %v5576_v1  ;;  %v6503_v1 = vld [vmem:[#allocation8 + $0x780] sm:$0xf]  ;;  %v7996_v10 = vld [vmem:[#allocation8 + $0x56c] sm:$0xf0] }
  0x7a   :  { %5539 = vmatmul.msk.bf16.vlgmr.msra.gmra.mxu2 %vm612_vm0, %v8749_v50  ;;  %v5672_v50 = vor.u32 %v7856_v17, %v5671_v16  ;;  %v6231_v9 = vld [vmem:[#allocation8 + $0x560] sm:$0xf]  ;;  %v7964_v16 = vld [vmem:[#allocation8 + $0x46c] sm:$0xf0] }
  0x7b   :  { %3969 = vmatpush.bf16.msrb.mxu2 %v5912_v38  ;;  %3960 = vmatpush.bf16.msra.mxu1 %v5720_v59  ;;  %v7976_v38 = vld [vmem:[#allocation8 + $0x4cc] sm:$0xf0]  ;;  %v6232_v11 = vor.u32 %v7996_v10, %v6231_v9  ;;  %v6103_v15 = vld [vmem:[#allocation8 + $0x460] sm:$0xf] }
  0x7c   :  { %3986 = vmatpush.bf16.msra.mxu3 %v5976_v56  ;;  %v6152_v47 = vor.u32 %v7976_v38, %v6151_v37  ;;  %v5816_v56 = vor.u32 %v7892_v46, %v5815_v45  ;;  %v7888_v59 = vld [vmem:[#allocation8 + $0x20c] sm:$0xf0]  ;;  %v6423_v17 = vld [vmem:[#allocation8 + $0x6e0] sm:$0xf] }
  0x7d   :  { %3949 = vmatpush.bf16.msrb.mxu0 %v5560_v13  ;;  %v5800_v3 = vor.u32 %v7888_v59, %v5799_v58  ;;  %v7992_v13 = vld [vmem:[#allocation8 + $0x54c] sm:$0xf0]  ;;  %v6487_v20 = vld [vmem:[#allocation8 + $0x760] sm:$0xf] }
  0x7e   :  { %v8044_v19 = vld [vmem:[#allocation8 + $0x6ec] sm:$0xf0]  ;;  %v6199_v24 = vld [vmem:[#allocation8 + $0x520] sm:$0xf] }
  0x7f   :  { %3970 = vmatpush.bf16.msrb.mxu2 %v5896_v51  ;;  %3961 = vmatpush.bf16.msra.mxu1 %v5704_v7  ;;  %v7972_v51 = vld [vmem:[#allocation8 + $0x4ac] sm:$0xf0]  ;;  %v6504_v7 = vor.u32 %v8064_v2, %v6503_v1  ;;  %v6087_v27 = vld [vmem:[#allocation8 + $0x440] sm:$0xf] }
  0x80   :  { %3987 = vmatpush.bf16.msra.mxu3 %v5960_v4  ;;  %v6136_v60 = vor.u32 %v7972_v51, %v6135_v49  ;;  %v6247_v4 = vld [vmem:[#allocation8 + $0x580] sm:$0xf]  ;;  %v8060_v21 = vld [vmem:[#allocation8 + $0x76c] sm:$0xf0] }
  0x81   :  { %3950 = vmatpush.bf16.msrb.mxu0 %v5544_v31  ;;  %v6248_v8 = vor.u32 %v8000_v5, %v6247_v4  ;;  %v6488_v23 = vor.u32 %v8060_v21, %v6487_v20  ;;  %v7988_v25 = vld [vmem:[#allocation8 + $0x52c] sm:$0xf0]  ;;  %v6471_v32 = vld [vmem:[#allocation8 + $0x740] sm:$0xf] }
  0x82   :  { %v6200_v26 = vor.u32 %v7988_v25, %v6199_v24  ;;  %v7960_v28 = vld [vmem:[#allocation8 + $0x44c] sm:$0xf0]  ;;  %v6071_v38 = vld [vmem:[#allocation8 + $0x420] sm:$0xf] }
  0x83   :  { %3971 = vmatpush.bf16.msrb.mxu2 %v5880_v62  ;;  %3962 = vmatpush.bf16.msra.mxu1 %v5688_v22  ;;  %v6119_v62 = vld [vmem:[#allocation8 + $0x480] sm:$0xf]  ;;  %v6424_v22 = vor.u32 %v8044_v19, %v6423_v17  ;;  %v6088_v30 = vor.u32 %v7960_v28, %v6087_v27  ;;  %v8040_v31 = vld [vmem:[#allocation8 + $0x6cc] sm:$0xf0] }
  0x84   :  { %3988 = vmatpush.bf16.msra.mxu3 %v5944_v18  ;;  %v6120_v6 = vor.u32 %v7968_v63, %v6119_v62  ;;  %v6104_v18 = vor.u32 %v7964_v16, %v6103_v15  ;;  %v8056_v33 = vld [vmem:[#allocation8 + $0x74c] sm:$0xf0]  ;;  %v6391_v40 = vld [vmem:[#allocation8 + $0x6a0] sm:$0xf] }
  0x85   :  { %3995 = vmatpush.bf16.msra.mxu0 %v6168_v35  ;;  %v6472_v35 = vor.u32 %v8056_v33, %v6471_v32  ;;  %v8036_v42 = vld [vmem:[#allocation8 + $0x6ac] sm:$0xf0]  ;;  %v6375_v49 = vld [vmem:[#allocation8 + $0x680] sm:$0xf] }
  0x86   :  { %v8052_v44 = vld [vmem:[#allocation8 + $0x72c] sm:$0xf0]  ;;  %v6392_v45 = vor.u32 %v8036_v42, %v6391_v40  ;;  %v6439_v53 = vld [vmem:[#allocation8 + $0x700] sm:$0xf] }
  0x87   :  { %3972 = vmatpush.bf16.msrb.mxu2 %v5864_v12  ;;  %3963 = vmatpush.bf16.msra.mxu1 %v5672_v50  ;;  %v6215_v12 = vld [vmem:[#allocation8 + $0x540] sm:$0xf]  ;;  %v8048_v54 = vld [vmem:[#allocation8 + $0x70c] sm:$0xf0] }
  0x88   :  { %3989 = vmatpush.bf16.msra.mxu3 %v5928_v34  ;;  %v6216_v14 = vor.u32 %v7992_v13, %v6215_v12  ;;  %v6183_v50 = vld [vmem:[#allocation8 + $0x500] sm:$0xf]  ;;  %v8028_v58 = vld [vmem:[#allocation8 + $0x66c] sm:$0xf0] }
  0x89   :  { %3996 = vmatpush.bf16.msra.mxu0 %v6152_v47  ;;  %v6055_v47 = vld [vmem:[#allocation8 + $0x400] sm:$0xf]  ;;  %v8024_v62 = vld [vmem:[#allocation8 + $0x64c] sm:$0xf0] }
  0x8a   :  { %v6359_v57 = vld [vmem:[#allocation8 + $0x660] sm:$0xf]  ;;  %v8020_v2 = vld [vmem:[#allocation8 + $0x62c] sm:$0xf0] }
  0x8b   :  { %3973 = vmatpush.bf16.msrb.mxu2 %v5848_v29  ;;  %4008 = vmatpush.bf16.msrb.mxu1 %v6296_v39  ;;  %v6407_v29 = vld [vmem:[#allocation8 + $0x6c0] sm:$0xf]  ;;  %v7956_v39 = vld [vmem:[#allocation8 + $0x42c] sm:$0xf0]  ;;  %v6360_v59 = vor.u32 %v8028_v58, %v6359_v57 }
  0x8c   :  { %4034 = vmatpush.bf16.msrb.mxu3 %v6552_v36  ;;  %v6408_v34 = vor.u32 %v8040_v31, %v6407_v29  ;;  %v7984_v36 = vld [vmem:[#allocation8 + $0x50c] sm:$0xf0]  ;;  %v6072_v41 = vor.u32 %v7956_v39, %v6071_v38  ;;  %v6327_v1 = vld [vmem:[#allocation8 + $0x620] sm:$0xf] }
  0x8d   :  { %3997 = vmatpush.bf16.msra.mxu0 %v6136_v60  ;;  %v6184_v37 = vor.u32 %v7984_v36, %v6183_v50  ;;  %v234_v60 = vld [vmem:[#allocation7] sm:$0xff]  ;;  %v6311_v5 = vld [vmem:[#allocation8 + $0x600] sm:$0xf] }
  0x8e   :  { %v6807_v13 = vld [vmem:[#allocation8 + $0x9e0] sm:$0xf]  ;;  %v8108_v27 = vld [vmem:[#allocation8 + $0x8ec] sm:$0xf0] }
  0x8f   :  { %3974 = vmatpush.bf16.msrb.mxu2 %v5832_v43  ;;  %4009 = vmatpush.bf16.msrb.mxu1 %v6280_v52  ;;  %v6455_v43 = vld [vmem:[#allocation8 + $0x720] sm:$0xf]  ;;  %v8032_v52 = vld [vmem:[#allocation8 + $0x68c] sm:$0xf0] }
  0x90   :  { %4035 = vmatpush.bf16.msrb.mxu3 %v6536_v48  ;;  %v6456_v46 = vor.u32 %v8052_v44, %v6455_v43  ;;  %v7952_v48 = vld [vmem:[#allocation8 + $0x40c] sm:$0xf0]  ;;  %v6376_v55 = vor.u32 %v8032_v52, %v6375_v49  ;;  %v6791_v21 = vld [vmem:[#allocation8 + $0x9c0] sm:$0xf] }
  0x91   :  { %3998 = vmatpush.bf16.msra.mxu0 %v6120_v6  ;;  %v6056_v51 = vor.u32 %v7952_v48, %v6055_v47  ;;  %v8016_v6 = vld [vmem:[#allocation8 + $0x60c] sm:$0xf0]  ;;  %v7063_v29 = vld [vmem:[#allocation8 + $0xbe0] sm:$0xf] }
  0x92   :  { %v6775_v50 = vld [vmem:[#allocation8 + $0x9a0] sm:$0xf]  ;;  %v8132_v36 = vld [vmem:[#allocation8 + $0x9ac] sm:$0xf0] }
  0x93   :  { %3975 = vmatpush.bf16.msrb.mxu2 %v5816_v56  ;;  %4010 = vmatpush.bf16.msrb.mxu1 %v6264_v0  ;;  %v6440_v56 = vor.u32 %v8048_v54, %v6439_v53  ;;  %v8783_v0 = vunpack.c.l.bf16 %v234_v60  ;;  %v6663_v40 = vld [vmem:[#allocation8 + $0x8c0] sm:$0xf]  ;;  %v8128_v52 = vld [vmem:[#allocation8 + $0x98c] sm:$0xf0] }
  0x94   :  { %4036 = vmatpush.bf16.msrb.mxu3 %v6520_v61  ;;  %v6343_v61 = vld [vmem:[#allocation8 + $0x640] sm:$0xf]  ;;  %v8100_v57 = vld [vmem:[#allocation8 + $0x8ac] sm:$0xf0] }
  0x95   :  { %3999 = vmatpush.bf16.msra.mxu0 %v6104_v18  ;;  %v6344_v63 = vor.u32 %v8024_v62, %v6343_v61  ;;  %v245_v4 = vperm.slane %v8783_v0, 2  ;;  %v244_v9 = vperm.slane %v8783_v0, 0  ;;  %v247_v10 = vperm.slane %v8783_v0, 6  ;;  %v7047_v44 = vld [vmem:[#allocation8 + $0xbc0] sm:$0xf] }
  0x96   :  { %v246_v53 = vperm.slane %v8783_v0, 4  ;;  %v8196_v61 = vld [vmem:[#allocation8 + $0xbac] sm:$0xf0] }
  0x97   :  { %3976 = vmatpush.bf16.msrb.mxu2 %v5800_v3  ;;  %4011 = vmatpush.bf16.msrb.mxu1 %v6248_v8  ;;  %v6328_v3 = vor.u32 %v8020_v2, %v6327_v1  ;;  %v277_v8 = vperm.slane %v245_v4, 0  ;;  %v276_v15 = vperm.slane %v244_v9, 0  ;;  %v279_v17 = vperm.slane %v247_v10, 0  ;;  %v6743_v4 = vld [vmem:[#allocation8 + $0x960] sm:$0xf] }
  0x98   :  { %4037 = vmatpush.bf16.msrb.mxu3 %v6504_v7  ;;  %v6312_v7 = vor.u32 %v8016_v6, %v6311_v5  ;;  %v8124_v5 = vld [vmem:[#allocation8 + $0x96c] sm:$0xf0]  ;;  %v7015_v9 = vld [vmem:[#allocation8 + $0xb80] sm:$0xf] }
  0x99   :  { %4000 = vmatpush.bf16.msra.mxu0 %v6088_v30  ;;  %v8204_v30 = vld [vmem:[#allocation8 + $0xbec] sm:$0xf0] }
  0x9a   :  { %v7064_v39 = vor.u32 %v8204_v30, %v7063_v29  ;;  %v6999_v30 = vld [vmem:[#allocation8 + $0xb60] sm:$0xf] }
  0x9b   :  { %4012 = vmatpush.bf16.msrb.mxu1 %v6232_v11  ;;  %4021 = vmatpush.bf16.msra.mxu2 %v6424_v22  ;;  %v8136_v22 = vld [vmem:[#allocation8 + $0x9cc] sm:$0xf0] }
  0x9c   :  { %4038 = vmatpush.bf16.msrb.mxu3 %v6488_v23  ;;  %v8790_v23 = vunpack.c.h.bf16 %v234_v60  ;;  %v6792_v32 = vor.u32 %v8136_v22, %v6791_v21  ;;  %v7031_v60 = vld [vmem:[#allocation8 + $0xba0] sm:$0xf] }
  0x9d   :  { %4001 = vmatpush.bf16.msra.mxu0 %v6072_v41  ;;  %v8104_v41 = vld [vmem:[#allocation8 + $0x8cc] sm:$0xf0]  ;;  %v7032_v6 = vor.u32 %v8196_v61, %v7031_v60  ;;  %v7319_v61 = vld [vmem:[#allocation8 + $0xde0] sm:$0xf] }
  0x9e   :  { %v248_v42 = vperm.slane %v8790_v23, 0  ;;  %v6664_v49 = vor.u32 %v8104_v41, %v6663_v40  ;;  %v251_v1 = vperm.slane %v8790_v23, 6  ;;  %v8112_v60 = vld [vmem:[#allocation8 + $0x90c] sm:$0xf0] }
  0x9f   :  { %4013 = vmatpush.bf16.msrb.mxu1 %v6216_v14  ;;  %4022 = vmatpush.bf16.msra.mxu2 %v6408_v34  ;;  %v8140_v14 = vld [vmem:[#allocation8 + $0x9ec] sm:$0xf0] }
  0xa0   :  { %4039 = vmatpush.bf16.msrb.mxu3 %v6472_v35  ;;  %v6808_v18 = vor.u32 %v8140_v14, %v6807_v13  ;;  %v8803_v14 = vld [vmem:[#allocation7 + $0x8] sm:$0xff] }
  0xa1   :  { %4002 = vmatpush.bf16.msra.mxu0 %v6056_v51  ;;  %v6759_v51 = vld [vmem:[#allocation8 + $0x980] sm:$0xf] }
  0xa2   :  { %v6760_v62 = vor.u32 %v8128_v52, %v6759_v51  ;;  %v6919_v51 = vld [vmem:[#allocation8 + $0xac0] sm:$0xf]  ;;  %v8168_v52 = vld [vmem:[#allocation8 + $0xacc] sm:$0xf0] }
  0xa3   :  { %4014 = vmatpush.bf16.msrb.mxu1 %v6200_v26  ;;  %4023 = vmatpush.bf16.msra.mxu2 %v6392_v45  ;;  %v6679_v26 = vld [vmem:[#allocation8 + $0x8e0] sm:$0xf]  ;;  %v8200_v45 = vld [vmem:[#allocation8 + $0xbcc] sm:$0xf0] }
  0xa4   :  { %4040 = vmatpush.bf16.msrb.mxu3 %v6456_v46  ;;  %v6680_v35 = vor.u32 %v8108_v27, %v6679_v26  ;;  %v6776_v46 = vor.u32 %v8132_v36, %v6775_v50  ;;  %v6935_v26 = vld [vmem:[#allocation8 + $0xae0] sm:$0xf]  ;;  %v8172_v27 = vld [vmem:[#allocation8 + $0xaec] sm:$0xf0] }
  0xa5   :  { %v6711_v36 = vld [vmem:[#allocation8 + $0x920] sm:$0xf] }
  0xa7   :  { %4015 = vmatpush.bf16.msrb.mxu1 %v6184_v37  ;;  %4024 = vmatpush.bf16.msra.mxu2 %v6376_v55  ;;  %v249_v37 = vperm.slane %v8790_v23, 2  ;;  %v7048_v55 = vor.u32 %v8200_v45, %v7047_v44  ;;  %v6599_v45 = vld [vmem:[#allocation8 + $0x840] sm:$0xf] }
  0xa8   :  { %4041 = vmatpush.bf16.msrb.mxu3 %v6440_v56  ;;  %v6647_v56 = vld [vmem:[#allocation8 + $0x8a0] sm:$0xf] }
  0xa9   :  { %v281_v54 = vperm.slane %v249_v37, 0  ;;  %v6648_v2 = vor.u32 %v8100_v57, %v6647_v56  ;;  %v8116_v37 = vld [vmem:[#allocation8 + $0x92c] sm:$0xf0]  ;;  %v6695_v57 = vld [vmem:[#allocation8 + $0x900] sm:$0xf] }
  0xaa   :  { %v8184_v56 = vld [vmem:[#allocation8 + $0xb4c] sm:$0xf0] }
  0xab   :  { %4025 = vmatpush.bf16.msra.mxu2 %v6360_v59  ;;  %v280_v59 = vperm.slane %v248_v42, 0  ;;  %v6936_v42 = vor.u32 %v8172_v27, %v6935_v26  ;;  %v8080_v26 = vld [vmem:[#allocation8 + $0x80c] sm:$0xf0]  ;;  %v6887_v27 = vld [vmem:[#allocation8 + $0xa80] sm:$0xf] }
  0xaf   :  { %4026 = vmatpush.bf16.msra.mxu2 %v6344_v63 }
  0xb3   :  { %4027 = vmatpush.bf16.msra.mxu2 %v6328_v3  ;;  %v278_v3 = vperm.slane %v246_v53, 0 }
  0xb7   :  { %4028 = vmatpush.bf16.msra.mxu2 %v6312_v7  ;;  %v638_v11 = vpop.f32.mrf.mxu1  ;;  %v6631_v7 = vld [vmem:[#allocation8 + $0x880] sm:$0xf] }
  0xb8   :  { %v639_v12 = vadd.f32 %v638_v11, %v277_v8  ;;  %v8096_v8 = vld [vmem:[#allocation8 + $0x88c] sm:$0xf0] }
  0xb9   :  { %v8192_v11 = vld [vmem:[#allocation8 + $0xb8c] sm:$0xf0]  ;;  %v6632_v22 = vor.u32 %v8096_v8, %v6631_v7  ;;  %v6903_v8 = vld [vmem:[#allocation8 + $0xaa0] sm:$0xf] }
  0xba   :  { %v825_v16 = vmax.f32 %v639_v12, 0.0  ;;  %v6727_v12 = vld [vmem:[#allocation8 + $0x940] sm:$0xf]  ;;  %v7016_v29 = vor.u32 %v8192_v11, %v7015_v9  ;;  %v8084_v7 = vld [vmem:[#allocation8 + $0x82c] sm:$0xf0] }
  0xbb   :  { %v6967_v11 = vld [vmem:[#allocation8 + $0xb20] sm:$0xf] }
  0xbc   :  { %v8788_v19 = vpack.c.bf16 %v825_v16, %v825_v16  ;;  %v8120_v16 = vld [vmem:[#allocation8 + $0x94c] sm:$0xf0] }
  0xbd   :  { %v625_v20 = vpop.f32.mrf.mxu2  ;;  %v6728_v50 = vor.u32 %v8120_v16, %v6727_v12  ;;  %v8180_v12 = vld [vmem:[#allocation8 + $0xb2c] sm:$0xf0]  ;;  %v7303_v16 = vld [vmem:[#allocation8 + $0xdc0] sm:$0xf] }
  0xbe   :  { %v626_v24 = vadd.f32 %v625_v20, %v276_v15  ;;  %3964 = vmatmul.bf16.vlgmr.msra.gmra.mxu1 %v8788_v19  ;;  %v6744_v15 = vor.u32 %v8124_v5, %v6743_v4  ;;  %v8268_v4 = vld [vmem:[#allocation8 + $0xdec] sm:$0xf0]  ;;  %v6583_v5 = vld [vmem:[#allocation8 + $0x820] sm:$0xf] }
  0xbf   :  { %4060 = vmatpush.bf16.msra.mxu1 %v6808_v18  ;;  %v640_v33 = vpop.f32.mrf.mxu1  ;;  %v283_v18 = vperm.slane %v251_v1, 0 }
  0xc0   :  { %v664_v25 = vpop.f32.mrf.mxu3  ;;  %v824_v31 = vmax.f32 %v626_v24, 0.0  ;;  %v8808_v33 = vunpack.c.l.bf16 %v8803_v14 }
  0xc1   :  { %v665_v28 = vadd.f32 %v664_v25, %v279_v17  ;;  %v677_v47 = vpop.f32.mrf.mxu0  ;;  %v6615_v17 = vld [vmem:[#allocation8 + $0x860] sm:$0xf]  ;;  %v8092_v25 = vld [vmem:[#allocation8 + $0x86c] sm:$0xf0] }
  0xc2   :  { %v8794_v38 = vpack.c.bf16 %v824_v31, %v824_v31  ;;  %v678_v10 = vadd.f32 %v677_v47, %v280_v59  ;;  %v8188_v31 = vld [vmem:[#allocation8 + $0xb6c] sm:$0xf0]  ;;  %v6616_v41 = vor.u32 %v8092_v25, %v6615_v17  ;;  %v253_v47 = vperm.slane %v8808_v33, 2  ;;  %v6567_v25 = vld [vmem:[#allocation8 + $0x800] sm:$0xf] }
  0xc3   :  { %v827_v34 = vmax.f32 %v665_v28, 0.0  ;;  %4061 = vmatpush.bf16.msra.mxu1 %v6792_v32  ;;  %v7000_v44 = vor.u32 %v8188_v31, %v6999_v30  ;;  %v8264_v17 = vld [vmem:[#allocation8 + $0xdcc] sm:$0xf0]  ;;  %v6968_v30 = vor.u32 %v8180_v12, %v6967_v11 }
  0xc4   :  { %3951 = vmatmul.bf16.vlgmr.msrb.gmra.mxu0 %v8794_v38  ;;  %v828_v32 = vmax.f32 %v678_v10, 0.0  ;;  %v8164_v10 = vld [vmem:[#allocation8 + $0xaac] sm:$0xf0] }
  0xc5   :  { %v8797_v43 = vpack.c.bf16 %v827_v34, %v827_v34  ;;  %4047 = vmatpush.bf16.msrb.mxu0 %v6680_v35  ;;  %v627_v48 = vpop.f32.mrf.mxu2  ;;  %v8160_v31 = vld [vmem:[#allocation8 + $0xa8c] sm:$0xf0] }
  0xc6   :  { %v8256_v11 = vld [vmem:[#allocation8 + $0xd8c] sm:$0xf0] }
  0xc7   :  { %3990 = vmatmul.bf16.vlgmr.msra.gmra.mxu3 %v8797_v43  ;;  %4062 = vmatpush.bf16.msra.mxu1 %v6776_v46  ;;  %v690_v63 = vpop.f32.mrf.mxu1  ;;  %v8088_v46 = vld [vmem:[#allocation8 + $0x84c] sm:$0xf0] }
  0xc8   :  { %4086 = vmatpush.bf16.msra.mxu3 %v7064_v39  ;;  %v666_v58 = vpop.f32.mrf.mxu3  ;;  %v691_v0 = vadd.f32 %v690_v63, %v281_v54  ;;  %v252_v54 = vperm.slane %v8808_v33, 0 }
  0xc9   :  { %4048 = vmatpush.bf16.msrb.mxu0 %v6664_v49  ;;  %v679_v20 = vpop.f32.mrf.mxu0  ;;  %v8814_v49 = vpack.c.bf16 %v828_v32, %v828_v32  ;;  %v6712_v58 = vor.u32 %v8116_v37, %v6711_v36  ;;  %v6951_v32 = vld [vmem:[#allocation8 + $0xb00] sm:$0xf]  ;;  %v8236_v36 = vld [vmem:[#allocation8 + $0xcec] sm:$0xf0] }
  0xca   :  { %v829_v13 = vmax.f32 %v691_v0, 0.0  ;;  %v285_v0 = vperm.slane %v253_v47, 0  ;;  %v284_v9 = vperm.slane %v252_v54, 0  ;;  %v255_v20 = vperm.slane %v8808_v33, 6  ;;  %v7287_v47 = vld [vmem:[#allocation8 + $0xda0] sm:$0xf] }
  0xcb   :  { %4063 = vmatpush.bf16.msra.mxu1 %v6760_v62  ;;  %v250_v62 = vperm.slane %v8790_v23, 4 }
  0xcc   :  { %4087 = vmatpush.bf16.msra.mxu3 %v7048_v55  ;;  %v8805_v24 = vpack.c.bf16 %v829_v13, %v829_v13  ;;  %v6983_v55 = vld [vmem:[#allocation8 + $0xb40] sm:$0xf]  ;;  %v6696_v13 = vor.u32 %v8112_v60, %v6695_v57 }
  0xcd   :  { %4049 = vmatpush.bf16.msrb.mxu0 %v6648_v2  ;;  %v651_v21 = vpop.f32.mrf.mxu2  ;;  %v6600_v2 = vor.u32 %v8088_v46, %v6599_v45  ;;  %v7304_v45 = vor.u32 %v8264_v17, %v7303_v16  ;;  %v6568_v46 = vor.u32 %v8080_v26, %v6567_v25  ;;  %v8152_v16 = vld [vmem:[#allocation8 + $0xa4c] sm:$0xf0]  ;;  %v7159_v17 = vld [vmem:[#allocation8 + $0xca0] sm:$0xf] }
  0xce   :  { %v652_v28 = vadd.f32 %v651_v21, %v278_v3  ;;  %4016 = vmatmul.bf16.vlgmr.msrb.gmra.mxu1 %v8805_v24  ;;  %v6920_v3 = vor.u32 %v8168_v52, %v6919_v51  ;;  %v7320_v21 = vor.u32 %v8268_v4, %v7319_v61  ;;  %v8156_v61 = vld [vmem:[#allocation8 + $0xa6c] sm:$0xf0] }
  0xcf   :  { %4064 = vmatpush.bf16.msra.mxu1 %v6744_v15  ;;  %v692_v40 = vpop.f32.mrf.mxu1  ;;  %v282_v15 = vperm.slane %v250_v62, 0  ;;  %v7175_v62 = vld [vmem:[#allocation8 + $0xcc0] sm:$0xf]  ;;  %v8328_v4 = vld [vmem:[#allocation8 + $0xfcc] sm:$0xf0] }
  0xd0   :  { %4088 = vmatpush.bf16.msra.mxu3 %v7032_v6  ;;  %v716_v34 = vpop.f32.mrf.mxu3  ;;  %v826_v35 = vmax.f32 %v652_v28, 0.0  ;;  %v6984_v6 = vor.u32 %v8184_v56, %v6983_v55  ;;  %v8332_v40 = vld [vmem:[#allocation8 + $0xfec] sm:$0xf0]  ;;  %v6871_v56 = vld [vmem:[#allocation8 + $0xa60] sm:$0xf] }
  0xd1   :  { %v717_v39 = vadd.f32 %v716_v34, %v283_v18  ;;  %4050 = vmatpush.bf16.msrb.mxu0 %v6632_v22  ;;  %v729_v63 = vpop.f32.mrf.mxu0  ;;  %v6584_v22 = vor.u32 %v8084_v7, %v6583_v5  ;;  %v8176_v34 = vld [vmem:[#allocation8 + $0xb0c] sm:$0xf0] }
  0xd2   :  { %v8812_v48 = vpack.c.bf16 %v826_v35, %v826_v35  ;;  %v730_v35 = vadd.f32 %v729_v63, %v284_v9  ;;  %v6952_v54 = vor.u32 %v8176_v34, %v6951_v32  ;;  %v8260_v55 = vld [vmem:[#allocation8 + $0xdac] sm:$0xf0]  ;;  %v6839_v32 = vld [vmem:[#allocation8 + $0xa20] sm:$0xf]  ;;  %v8839_v34 = vunpack.c.h.bf16 %v8803_v14 }
  0xd3   :  { %v831_v53 = vmax.f32 %v717_v39, 0.0  ;;  %4065 = vmatpush.bf16.msra.mxu1 %v6728_v50  ;;  %v7191_v50 = vld [vmem:[#allocation8 + $0xce0] sm:$0xf]  ;;  %v8232_v63 = vld [vmem:[#allocation8 + $0xccc] sm:$0xf0] }
  0xd4   :  { %4089 = vmatpush.bf16.msra.mxu3 %v7016_v29  ;;  %3977 = vmatmul.bf16.vlgmr.msrb.gmra.mxu2 %v8812_v48  ;;  %v6904_v29 = vor.u32 %v8164_v10, %v6903_v8  ;;  %v7575_v39 = vld [vmem:[#allocation8 + $0xfe0] sm:$0xf]  ;;  %v832_v57 = vmax.f32 %v730_v35, 0.0  ;;  %v6872_v8 = vor.u32 %v8156_v61, %v6871_v56  ;;  %v8144_v56 = vld [vmem:[#allocation8 + $0xa0c] sm:$0xf0] }
  0xd5   :  { %v8818_v59 = vpack.c.bf16 %v831_v53, %v831_v53  ;;  %4051 = vmatpush.bf16.msrb.mxu0 %v6616_v41  ;;  %4073 = vmatpush.bf16.msrb.mxu2 %v6936_v42  ;;  %v653_v1 = vpop.f32.mrf.mxu2  ;;  %v287_v41 = vperm.slane %v255_v20, 0  ;;  %v6888_v53 = vor.u32 %v8160_v31, %v6887_v27  ;;  %v7576_v60 = vor.u32 %v8332_v40, %v7575_v39  ;;  %v7271_v10 = vld [vmem:[#allocation8 + $0xd80] sm:$0xf]  ;;  %v8252_v31 = vld [vmem:[#allocation8 + $0xd6c] sm:$0xf0] }
  0xd6   :  { %4003 = vmatmul.bf16.vlgmr.msra.gmra.mxu0 %v8814_v49  ;;  %v8829_v9 = vpack.c.bf16 %v832_v57, %v832_v57  ;;  %v7543_v20 = vld [vmem:[#allocation8 + $0xfa0] sm:$0xf]  ;;  %v7272_v27 = vor.u32 %v8256_v11, %v7271_v10  ;;  %v8224_v39 = vld [vmem:[#allocation8 + $0xc8c] sm:$0xf0]  ;;  %v256_v11 = vperm.slane %v8839_v34, 0 }
  0xd7   :  { %4042 = vmatmul.bf16.vlgmr.msrb.gmra.mxu3 %v8818_v59  ;;  %4066 = vmatpush.bf16.msra.mxu1 %v6712_v58  ;;  %v742_v18 = vpop.f32.mrf.mxu1  ;;  %v7192_v58 = vor.u32 %v8236_v36, %v7191_v50  ;;  %v8148_v36 = vld [vmem:[#allocation8 + $0xa2c] sm:$0xf0]  ;;  %v7127_v57 = vld [vmem:[#allocation8 + $0xc60] sm:$0xf] }
  0xd8   :  { %4090 = vmatpush.bf16.msra.mxu3 %v7000_v44  ;;  %v718_v23 = vpop.f32.mrf.mxu3  ;;  %v743_v28 = vadd.f32 %v742_v18, %v285_v0  ;;  %v8228_v18 = vld [vmem:[#allocation8 + $0xcac] sm:$0xf0]  ;;  %v6840_v14 = vor.u32 %v8148_v36, %v6839_v32  ;;  %v7111_v10 = vld [vmem:[#allocation8 + $0xc40] sm:$0xf]  ;;  %v5785_v36 = vld [vmem:[#allocation8 + $0x1f0] sm:$0xf0] }
  0xd9   :  { %4052 = vmatpush.bf16.msrb.mxu0 %v6600_v2  ;;  %4074 = vmatpush.bf16.msrb.mxu2 %v6920_v3  ;;  %v731_v42 = vpop.f32.mrf.mxu0  ;;  %v7559_v3 = vld [vmem:[#allocation8 + $0xfc0] sm:$0xf]  ;;  %v7176_v23 = vor.u32 %v8232_v63, %v7175_v62  ;;  %v7160_v35 = vor.u32 %v8228_v18, %v7159_v17  ;;  %v8300_v61 = vld [vmem:[#allocation8 + $0xeec] sm:$0xf0] }
  0xda   :  { %v833_v37 = vmax.f32 %v743_v28, 0.0  ;;  %v254_v28 = vperm.slane %v8808_v33, 4  ;;  %v8320_v33 = vld [vmem:[#allocation8 + $0xf8c] sm:$0xf0]  ;;  %v257_v42 = vperm.slane %v8839_v34, 2 }
  0xdb   :  { %4067 = vmatpush.bf16.msra.mxu1 %v6696_v13  ;;  %v7560_v13 = vor.u32 %v8328_v4, %v7559_v3  ;;  %v7511_v3 = vld [vmem:[#allocation8 + $0xf60] sm:$0xf]  ;;  %v8316_v4 = vld [vmem:[#allocation8 + $0xf6c] sm:$0xf0] }
  0xdc   :  { %4091 = vmatpush.bf16.msra.mxu3 %v6984_v6  ;;  %v8824_v51 = vpack.c.bf16 %v833_v37, %v833_v37  ;;  %v7288_v6 = vor.u32 %v8260_v55, %v7287_v47  ;;  %v7143_v37 = vld [vmem:[#allocation8 + $0xc80] sm:$0xf]  ;;  %v289_v62 = vperm.slane %v257_v42, 0  ;;  %v8240_v32 = vld [vmem:[#allocation8 + $0xd0c] sm:$0xf0] }
  0xdd   :  { %4053 = vmatpush.bf16.msrb.mxu0 %v6584_v22  ;;  %v703_v44 = vpop.f32.mrf.mxu2  ;;  %4075 = vmatpush.bf16.msrb.mxu2 %v6904_v29  ;;  %v7239_v47 = vld [vmem:[#allocation8 + $0xd40] sm:$0xf] }
  0xde   :  { %v704_v52 = vadd.f32 %v703_v44, %v282_v15  ;;  %4068 = vmatmul.bf16.vlgmr.msra.gmra.mxu1 %v8824_v51  ;;  %v6855_v15 = vld [vmem:[#allocation8 + $0xa40] sm:$0xf] }
  0xdf   :  { %4112 = vmatpush.bf16.msrb.mxu1 %v7320_v21  ;;  %v744_v0 = vpop.f32.mrf.mxu1  ;;  %v8324_v21 = vld [vmem:[#allocation8 + $0xfac] sm:$0xf0]  ;;  %v6856_v29 = vor.u32 %v8152_v16, %v6855_v15  ;;  %v7431_v15 = vld [vmem:[#allocation8 + $0xec0] sm:$0xf]  ;;  %v259_v16 = vperm.slane %v8839_v34, 6 }
  0xe0   :  { %4092 = vmatpush.bf16.msra.mxu3 %v6968_v30  ;;  %v768_v1 = vpop.f32.mrf.mxu3  ;;  %v830_v2 = vmax.f32 %v704_v52, 0.0  ;;  %v7255_v30 = vld [vmem:[#allocation8 + $0xd60] sm:$0xf]  ;;  %v7544_v50 = vor.u32 %v8324_v21, %v7543_v20  ;;  %v8248_v52 = vld [vmem:[#allocation8 + $0xd4c] sm:$0xf0]  ;;  %v7512_v20 = vor.u32 %v8316_v4, %v7511_v3 }
  0xe1   :  { %v769_v5 = vadd.f32 %v768_v1, %v287_v41  ;;  %4054 = vmatpush.bf16.msrb.mxu0 %v6568_v46  ;;  %4076 = vmatpush.bf16.msrb.mxu2 %v6888_v53  ;;  %v8834_v25 = vpop.f32.mrf.mxu0  ;;  %v7527_v41 = vld [vmem:[#allocation8 + $0xf80] sm:$0xf]  ;;  %v286_v46 = vperm.slane %v254_v28, 0  ;;  %v8296_v21 = vld [vmem:[#allocation8 + $0xecc] sm:$0xf0]  ;;  %v291_v42 = vperm.slane %v259_v16, 0 }
  0xe2   :  { %v8827_v7 = vpack.c.bf16 %v830_v2, %v830_v2  ;;  %v6823_v53 = vld [vmem:[#allocation8 + $0xa00] sm:$0xf]  ;;  %v7528_v55 = vor.u32 %v8320_v33, %v7527_v41  ;;  %v7240_v2 = vor.u32 %v8248_v52, %v7239_v47  ;;  %v8212_v33 = vld [vmem:[#allocation8 + $0xc2c] sm:$0xf0] }
  0xe3   :  { %4113 = vmatpush.bf16.msrb.mxu1 %v7304_v45  ;;  %v835_v12 = vmax.f32 %v769_v5, 0.0  ;;  %v7256_v45 = vor.u32 %v8252_v31, %v7255_v30  ;;  %v7223_v5 = vld [vmem:[#allocation8 + $0xd20] sm:$0xf]  ;;  %v8312_v30 = vld [vmem:[#allocation8 + $0xf4c] sm:$0xf0] }
  0xe4   :  { %4093 = vmatpush.bf16.msra.mxu3 %v6952_v54  ;;  %4029 = vmatmul.bf16.vlgmr.msra.gmra.mxu2 %v8827_v7  ;;  %v7144_v54 = vor.u32 %v8224_v39, %v7143_v37  ;;  %v7207_v31 = vld [vmem:[#allocation8 + $0xd00] sm:$0xf]  ;;  %v288_v37 = vperm.slane %v256_v11, 0 }
  0xe5   :  { %4099 = vmatpush.bf16.msra.mxu0 %v7192_v58  ;;  %v8832_v22 = vpack.c.bf16 %v835_v12, %v835_v12  ;;  %v705_v26 = vpop.f32.mrf.mxu2  ;;  %4077 = vmatpush.bf16.msrb.mxu2 %v6872_v8  ;;  %v8220_v58 = vld [vmem:[#allocation8 + $0xc6c] sm:$0xf0]  ;;  %v7095_v41 = vld [vmem:[#allocation8 + $0xc20] sm:$0xf]  ;;  %v7208_v47 = vor.u32 %v8240_v32, %v7207_v31  ;;  %v5641_v31 = vld [vmem:[#allocation8 + $0xd0] sm:$0xf0] }
  0xe6   :  { %4055 = vmatmul.bf16.vlgmr.msrb.gmra.mxu0 %v8829_v9  ;;  %v8244_v8 = vld [vmem:[#allocation8 + $0xd2c] sm:$0xf0]  ;;  %v7128_v12 = vor.u32 %v8220_v58, %v7127_v57  ;;  %v7495_v26 = vld [vmem:[#allocation8 + $0xf40] sm:$0xf]  ;;  %v7878_v57 = vld [vmem:[#allocation8 + $0x1c4] sm:$0xf]  ;;  %v7096_v58 = vor.u32 %v8212_v33, %v7095_v41 }
  0xe7   :  { %4114 = vmatpush.bf16.msrb.mxu1 %v7288_v6  ;;  %4094 = vmatmul.bf16.vlgmr.msra.gmra.mxu3 %v8832_v22  ;;  %v794_v44 = vpop.f32.mrf.mxu1  ;;  %v6824_v6 = vor.u32 %v8144_v56, %v6823_v53  ;;  %v7479_v52 = vld [vmem:[#allocation8 + $0xf20] sm:$0xf]  ;;  %v8308_v53 = vld [vmem:[#allocation8 + $0xf2c] sm:$0xf0]  ;;  %v782_v56 = vadd.f32 %v8834_v25, %v288_v37  ;;  %v7850_v25 = vld [vmem:[#allocation8 + $0xe4] sm:$0xf] }
  0xe8   :  { %4138 = vmatpush.bf16.msrb.mxu3 %v7576_v60  ;;  %v770_v40 = vpop.f32.mrf.mxu3  ;;  %v7447_v60 = vld [vmem:[#allocation8 + $0xee0] sm:$0xf]  ;;  %v7480_v3 = vor.u32 %v8308_v53, %v7479_v52  ;;  %v7942_v37 = vld [vmem:[#allocation8 + $0x3c4] sm:$0xf]  ;;  %v5625_v53 = vld [vmem:[#allocation8 + $0xb0] sm:$0xf0] }
  0xe9   :  { %4100 = vmatpush.bf16.msra.mxu0 %v7176_v23  ;;  %4078 = vmatpush.bf16.msrb.mxu2 %v6856_v29  ;;  %v783_v63 = vpop.f32.mrf.mxu0  ;;  %v7448_v23 = vor.u32 %v8300_v61, %v7447_v60  ;;  %v7224_v29 = vor.u32 %v8244_v8, %v7223_v5  ;;  %v7432_v40 = vor.u32 %v8296_v21, %v7431_v15  ;;  %v5769_v61 = vld [vmem:[#allocation8 + $0x1d0] sm:$0xf0]  ;;  %v7399_v5 = vld [vmem:[#allocation8 + $0xe80] sm:$0xf]  ;;  %v8304_v8 = vld [vmem:[#allocation8 + $0xf0c] sm:$0xf0] }
  0xea   :  { %v8208_v63 = vld [vmem:[#allocation8 + $0xc0c] sm:$0xf0]  ;;  %v836_v11 = vmax.f32 %v782_v56, 0.0  ;;  %v7870_v33 = vld [vmem:[#allocation8 + $0x184] sm:$0xf] }
  0xeb   :  { %4115 = vmatpush.bf16.msrb.mxu1 %v7272_v27  ;;  %v795_v27 = vadd.f32 %v794_v44, %v289_v62  ;;  %v7496_v44 = vor.u32 %v8312_v30, %v7495_v26  ;;  %v7079_v62 = vld [vmem:[#allocation8 + $0xc00] sm:$0xf]  ;;  %v7846_v30 = vld [vmem:[#allocation8 + $0xc4] sm:$0xf] }
  0xec   :  { %4139 = vmatpush.bf16.msrb.mxu3 %v7560_v13  ;;  %v8216_v13 = vld [vmem:[#allocation8 + $0xc4c] sm:$0xf0]  ;;  %v7080_v15 = vor.u32 %v8208_v63, %v7079_v62  ;;  %v7842_v52 = vld [vmem:[#allocation8 + $0xa4] sm:$0xf]  ;;  %v7351_v62 = vld [vmem:[#allocation8 + $0xe20] sm:$0xf] }
  0xed   :  { %4101 = vmatpush.bf16.msra.mxu0 %v7160_v35  ;;  %v755_v1 = vpop.f32.mrf.mxu2  ;;  %4079 = vmatpush.bf16.msrb.mxu2 %v6840_v14  ;;  %v7112_v39 = vor.u32 %v8216_v13, %v7111_v10  ;;  %v837_v14 = vmax.f32 %v795_v27, 0.0  ;;  %v5657_v10 = vld [vmem:[#allocation8 + $0xf0] sm:$0xf0]  ;;  %v7383_v27 = vld [vmem:[#allocation8 + $0xe60] sm:$0xf] }
  0xee   :  { %v756_v0 = vadd.f32 %v755_v1, %v286_v46  ;;  %v8292_v46 = vld [vmem:[#allocation8 + $0xeac] sm:$0xf0]  ;;  %v6041_v13 = vld [vmem:[#allocation8 + $0x3f0] sm:$0xf0]  ;;  %v5660_v26 = vor.u32 %v7850_v25, %v5657_v10 }
  0xef   :  { %4116 = vmatpush.bf16.msrb.mxu1 %v7256_v45  ;;  %v796_v28 = vpop.f32.mrf.mxu1  ;;  %v7415_v45 = vld [vmem:[#allocation8 + $0xea0] sm:$0xf]  ;;  %v8849_v4 = vpack.c.bf16 %v837_v14, %v837_v14  ;;  %v8280_v14 = vld [vmem:[#allocation8 + $0xe4c] sm:$0xf0]  ;;  %v5993_v25 = vld [vmem:[#allocation8 + $0x390] sm:$0xf0] }
  0xf0   :  { %4140 = vmatpush.bf16.msrb.mxu3 %v7544_v50  ;;  %v820_v17 = vpop.f32.mrf.mxu3  ;;  %v834_v18 = vmax.f32 %v756_v0, 0.0  ;;  %v7882_v50 = vld [vmem:[#allocation8 + $0x1e4] sm:$0xf]  ;;  %v7416_v60 = vor.u32 %v8292_v46, %v7415_v45  ;;  %v8288_v0 = vld [vmem:[#allocation8 + $0xe8c] sm:$0xf0]  ;;  %v5644_v45 = vor.u32 %v7846_v30, %v5641_v31 }
  0xf1   :  { %4102 = vmatpush.bf16.msra.mxu0 %v7144_v54  ;;  %4080 = vmatpush.bf16.msrb.mxu2 %v6824_v6  ;;  %v821_v1 = vadd.f32 %v820_v17, %v291_v42  ;;  %v7463_v6 = vld [vmem:[#allocation8 + $0xf00] sm:$0xf]  ;;  %v7400_v16 = vor.u32 %v8288_v0, %v7399_v5  ;;  %v7874_v17 = vld [vmem:[#allocation8 + $0x1a4] sm:$0xf]  ;;  %v8284_v28 = vld [vmem:[#allocation8 + $0xe6c] sm:$0xf0] }
  0xf2   :  { %v8845_v35 = vpack.c.bf16 %v834_v18, %v834_v18  ;;  %v5753_v18 = vld [vmem:[#allocation8 + $0x1b0] sm:$0xf0]  ;;  %v7464_v21 = vor.u32 %v8304_v8, %v7463_v6  ;;  %v7384_v41 = vor.u32 %v8284_v28, %v7383_v27  ;;  %v7367_v46 = vld [vmem:[#allocation8 + $0xe40] sm:$0xf]  ;;  %v8276_v63 = vld [vmem:[#allocation8 + $0xe2c] sm:$0xf0] }
  0xf3   :  { %4117 = vmatpush.bf16.msrb.mxu1 %v7240_v2  ;;  %v5737_v42 = vld [vmem:[#allocation8 + $0x190] sm:$0xf0]  ;;  %v7934_v8 = vld [vmem:[#allocation8 + $0x384] sm:$0xf]  ;;  %v7352_v10 = vor.u32 %v8276_v63, %v7351_v62 }
  0xf4   :  { %4141 = vmatpush.bf16.msrb.mxu3 %v7528_v55  ;;  %4081 = vmatmul.bf16.vlgmr.msrb.gmra.mxu2 %v8845_v35  ;;  %v5788_v55 = vor.u32 %v7882_v50, %v5785_v36  ;;  %v8852_v50 = vpack.c.bf16 %v836_v11, %v836_v11  ;;  %v5756_v36 = vor.u32 %v7874_v17, %v5753_v18  ;;  %v7862_v11 = vld [vmem:[#allocation8 + $0x144] sm:$0xf]  ;;  %v5593_v18 = vld [vmem:[#allocation8 + $0x70] sm:$0xf0] }
  0xf5   :  { %4103 = vmatpush.bf16.msra.mxu0 %v7128_v12  ;;  %4125 = vmatpush.bf16.msra.mxu2 %v7448_v23  ;;  %v757_v54 = vpop.f32.mrf.mxu2  ;;  %v5772_v12 = vor.u32 %v7878_v57, %v5769_v61  ;;  %v7946_v23 = vld [vmem:[#allocation8 + $0x3e4] sm:$0xf]  ;;  %v7368_v57 = vor.u32 %v8280_v14, %v7367_v46  ;;  %v5628_v61 = vor.u32 %v7842_v52, %v5625_v53  ;;  %v5673_v53 = vld [vmem:[#allocation8 + $0x110] sm:$0xf0] }
  0xf6   :  { %v7938_v54 = vld [vmem:[#allocation8 + $0x3a4] sm:$0xf]  ;;  %v5996_v17 = vor.u32 %v7934_v8, %v5993_v25  ;;  %v5881_v62 = vld [vmem:[#allocation8 + $0x2b0] sm:$0xf0] }
  0xf7   :  { %4118 = vmatpush.bf16.msrb.mxu1 %v7224_v29  ;;  %v6044_v29 = vor.u32 %v7946_v23, %v6041_v13  ;;  %v7335_v13 = vld [vmem:[#allocation8 + $0xe00] sm:$0xf]  ;;  %v7930_v28 = vld [vmem:[#allocation8 + $0x364] sm:$0xf]  ;;  %v6281_v8 = vld [vmem:[#allocation8 + $0x5d0] sm:$0xf0] }
  0xf8   :  { %4142 = vmatpush.bf16.msrb.mxu3 %v7512_v20  ;;  %v822_v2 = vpop.f32.mrf.mxu3  ;;  %v839_v20 = vmax.f32 %v821_v1, 0.0  ;;  %v7858_v31 = vld [vmem:[#allocation8 + $0x124] sm:$0xf] }
  0xf9   :  { %4104 = vmatpush.bf16.msra.mxu0 %v7112_v39  ;;  %4126 = vmatpush.bf16.msra.mxu2 %v7432_v40  ;;  %v6025_v39 = vld [vmem:[#allocation8 + $0x3d0] sm:$0xf0]  ;;  %v258_v40 = vperm.slane %v8839_v34, 4  ;;  %v5740_v34 = vor.u32 %v7870_v33, %v5737_v42  ;;  %v7838_v2 = vld [vmem:[#allocation8 + $0x84] sm:$0xf] }
  0xfa   :  { %v7910_v33 = vld [vmem:[#allocation8 + $0x2c4] sm:$0xf]  ;;  %v5897_v42 = vld [vmem:[#allocation8 + $0x2d0] sm:$0xf0] }
  0xfb   :  { %4119 = vmatpush.bf16.msrb.mxu1 %v7208_v47  ;;  %v6028_v47 = vor.u32 %v7942_v37, %v6025_v39  ;;  %v290_v56 = vperm.slane %v258_v40, 0  ;;  %v7830_v39 = vld [vmem:[#allocation8 + $0x44] sm:$0xf] }
  0xfc   :  { %4143 = vmatpush.bf16.msrb.mxu3 %v7496_v44  ;;  %v8855_v44 = vpack.c.bf16 %v839_v20, %v839_v20  ;;  %v7914_v20 = vld [vmem:[#allocation8 + $0x2e4] sm:$0xf] }
  0xfd   :  { %4105 = vmatpush.bf16.msra.mxu0 %v7096_v58  ;;  %4127 = vmatpush.bf16.msra.mxu2 %v7416_v60  ;;  %v807_v32 = vpop.f32.mrf.mxu2  ;;  %v7866_v58 = vld [vmem:[#allocation8 + $0x164] sm:$0xf]  ;;  %v5721_v60 = vld [vmem:[#allocation8 + $0x170] sm:$0xf0] }
  0xfe   :  { %4120 = vmatmul.bf16.vlgmr.msrb.gmra.mxu1 %v8849_v4  ;;  %v5724_v0 = vor.u32 %v7866_v58, %v5721_v60  ;;  %v808_v6 = vadd.f32 %v807_v32, %v290_v56  ;;  %v5689_v32 = vld [vmem:[#allocation8 + $0x130] sm:$0xf0]  ;;  %v7926_v14 = vld [vmem:[#allocation8 + $0x344] sm:$0xf] }
  0xff   :  { %4164 = vmatpush.bf16.msra.mxu1 %v5788_v55  ;;  %v6009_v55 = vld [vmem:[#allocation8 + $0x3b0] sm:$0xf0]  ;;  %v5692_v46 = vor.u32 %v7858_v31, %v5689_v32  ;;  %v7854_v52 = vld [vmem:[#allocation8 + $0x104] sm:$0xf] }
 0x100   :  { %4144 = vmatpush.bf16.msrb.mxu3 %v7480_v3  ;;  %v6012_v1 = vor.u32 %v7938_v54, %v6009_v55  ;;  %v5609_v3 = vld [vmem:[#allocation8 + $0x90] sm:$0xf0]  ;;  %v5900_v54 = vor.u32 %v7910_v33, %v5897_v42  ;;  %v8010_v55 = vld [vmem:[#allocation8 + $0x5e4] sm:$0xf]  ;;  %v5676_v63 = vor.u32 %v7854_v52, %v5673_v53 }
 0x101   :  { %4106 = vmatpush.bf16.msra.mxu0 %v7080_v15  ;;  %4128 = vmatpush.bf16.msra.mxu2 %v7400_v16  ;;  %v5612_v23 = vor.u32 %v7838_v2, %v5609_v3  ;;  %v8272_v15 = vld [vmem:[#allocation8 + $0xe0c] sm:$0xf0]  ;;  %v7834_v16 = vld [vmem:[#allocation8 + $0x64] sm:$0xf]  ;;  %v6297_v56 = vld [vmem:[#allocation8 + $0x5f0] sm:$0xf0] }
 0x102   :  { %v7336_v30 = vor.u32 %v8272_v15, %v7335_v13  ;;  %v5561_v60 = vld [vmem:[#allocation8 + $0x30] sm:$0xf0]  ;;  %v6300_v3 = vor.u32 %v8010_v55, %v6297_v56  ;;  %v7822_v25 = vld [vmem:[#allocation8 + $0x4] sm:$0xf] }
 0x103   :  { %4165 = vmatpush.bf16.msra.mxu1 %v5772_v12  ;;  %v5705_v12 = vld [vmem:[#allocation8 + $0x150] sm:$0xf0]  ;;  %v7918_v13 = vld [vmem:[#allocation8 + $0x304] sm:$0xf] }
 0x104   :  { %4145 = vmatpush.bf16.msrb.mxu3 %v7464_v21  ;;  %4107 = vmatmul.bf16.vlgmr.msra.gmra.mxu0 %v8852_v50  ;;  %v5913_v21 = vld [vmem:[#allocation8 + $0x2f0] sm:$0xf0]  ;;  %v5708_v27 = vor.u32 %v7862_v11, %v5705_v12  ;;  %v7902_v12 = vld [vmem:[#allocation8 + $0x284] sm:$0xf] }
 0x105   :  { %4151 = vmatpush.bf16.msrb.mxu0 %v5660_v26  ;;  %4129 = vmatpush.bf16.msra.mxu2 %v7384_v41  ;;  %v809_v5 = vpop.f32.mrf.mxu2  ;;  %v838_v26 = vmax.f32 %v808_v6, 0.0  ;;  %v5916_v37 = vor.u32 %v7914_v20, %v5913_v21  ;;  %v5577_v41 = vld [vmem:[#allocation8 + $0x50] sm:$0xf0]  ;;  %v8074_v20 = vld [vmem:[#allocation8 + $0x7e4] sm:$0xf] }
 0x106   :  { %v5945_v2 = vld [vmem:[#allocation8 + $0x330] sm:$0xf0]  ;;  %v8006_v5 = vld [vmem:[#allocation8 + $0x5c4] sm:$0xf] }
 0x107   :  { %4166 = vmatpush.bf16.msra.mxu1 %v5756_v36  ;;  %4146 = vmatmul.bf16.vlgmr.msrb.gmra.mxu3 %v8855_v44  ;;  %v5596_v36 = vor.u32 %v7834_v16, %v5593_v18  ;;  %v5929_v15 = vld [vmem:[#allocation8 + $0x310] sm:$0xf0]  ;;  %v7978_v16 = vld [vmem:[#allocation8 + $0x4e4] sm:$0xf]  ;;  %v6284_v18 = vor.u32 %v8006_v5, %v6281_v8 }
 0x108   :  { %4190 = vmatpush.bf16.msra.mxu3 %v6044_v29  ;;  %v5977_v29 = vld [vmem:[#allocation8 + $0x370] sm:$0xf0]  ;;  %v7898_v32 = vld [vmem:[#allocation8 + $0x264] sm:$0xf] }
 0x109   :  { %4152 = vmatpush.bf16.msrb.mxu0 %v5644_v45  ;;  %4130 = vmatpush.bf16.msra.mxu2 %v7368_v57  ;;  %v5980_v40 = vor.u32 %v7930_v28, %v5977_v29  ;;  %v8859_v45 = vpack.c.bf16 %v838_v26, %v838_v26  ;;  %v7826_v57 = vld [vmem:[#allocation8 + $0x24] sm:$0xf]  ;;  %v6553_v21 = vld [vmem:[#allocation8 + $0x7f0] sm:$0xf0] }
 0x10a   :  { %v8002_v28 = vld [vmem:[#allocation8 + $0x5a4] sm:$0xf]  ;;  %v6265_v29 = vld [vmem:[#allocation8 + $0x5b0] sm:$0xf0] }
 0x10b   :  { %4167 = vmatpush.bf16.msra.mxu1 %v5740_v34  ;;  %v5580_v34 = vor.u32 %v7830_v39, %v5577_v41  ;;  %v7974_v39 = vld [vmem:[#allocation8 + $0x4c4] sm:$0xf]  ;;  %v6268_v41 = vor.u32 %v8002_v28, %v6265_v29  ;;  %v6537_v42 = vld [vmem:[#allocation8 + $0x7d0] sm:$0xf0] }
 0x10c   :  { %4191 = vmatpush.bf16.msra.mxu3 %v6028_v47  ;;  %v5961_v47 = vld [vmem:[#allocation8 + $0x350] sm:$0xf0]  ;;  %v8070_v33 = vld [vmem:[#allocation8 + $0x7c4] sm:$0xf] }
 0x10d   :  { %4153 = vmatpush.bf16.msrb.mxu0 %v5628_v61  ;;  %4131 = vmatpush.bf16.msra.mxu2 %v7352_v10  ;;  %v5964_v58 = vor.u32 %v7926_v14, %v5961_v47  ;;  %v7906_v61 = vld [vmem:[#allocation8 + $0x2a4] sm:$0xf]  ;;  %v5545_v10 = vld [vmem:[#allocation8 + $0x10] sm:$0xf0] }
 0x10e   :  { %v5884_v6 = vor.u32 %v7906_v61, %v5881_v62  ;;  %v5548_v26 = vor.u32 %v7822_v25, %v5545_v10  ;;  %v7998_v14 = vld [vmem:[#allocation8 + $0x584] sm:$0xf]  ;;  %v6249_v47 = vld [vmem:[#allocation8 + $0x590] sm:$0xf0] }
 0x10f   :  { %4168 = vmatpush.bf16.msra.mxu1 %v5724_v0  ;;  %v5564_v0 = vor.u32 %v7826_v57, %v5561_v60  ;;  %v7894_v53 = vld [vmem:[#allocation8 + $0x244] sm:$0xf]  ;;  %v6137_v56 = vld [vmem:[#allocation8 + $0x4b0] sm:$0xf0]  ;;  %v6252_v57 = vor.u32 %v7998_v14, %v6249_v47 }
 0x110   :  { %4192 = vmatpush.bf16.msra.mxu3 %v6012_v1  ;;  %v7922_v1 = vld [vmem:[#allocation8 + $0x324] sm:$0xf]  ;;  %v6521_v60 = vld [vmem:[#allocation8 + $0x7b0] sm:$0xf0] }
 0x111   :  { %4154 = vmatpush.bf16.msrb.mxu0 %v5612_v23  ;;  %4132 = vmatpush.bf16.msra.mxu2 %v7336_v30  ;;  %v5948_v11 = vor.u32 %v7922_v1, %v5945_v2  ;;  %v5865_v23 = vld [vmem:[#allocation8 + $0x290] sm:$0xf0]  ;;  %v5932_v30 = vor.u32 %v7918_v13, %v5929_v15  ;;  %v7970_v55 = vld [vmem:[#allocation8 + $0x4a4] sm:$0xf] }
 0x112   :  { %v7994_v62 = vld [vmem:[#allocation8 + $0x564] sm:$0xf]  ;;  %v6140_v1 = vor.u32 %v7970_v55, %v6137_v56  ;;  %v6505_v10 = vld [vmem:[#allocation8 + $0x790] sm:$0xf0] }
 0x113   :  { %4169 = vmatpush.bf16.msra.mxu1 %v5708_v27  ;;  %v5868_v27 = vor.u32 %v7902_v12, %v5865_v23  ;;  %v7890_v2 = vld [vmem:[#allocation8 + $0x224] sm:$0xf]  ;;  %v6217_v23 = vld [vmem:[#allocation8 + $0x550] sm:$0xf0] }
 0x114   :  { %4193 = vmatpush.bf16.msra.mxu3 %v5996_v17  ;;  %4133 = vmatmul.bf16.vlgmr.msra.gmra.mxu2 %v8859_v45  ;;  %v6169_v17 = vld [vmem:[#allocation8 + $0x4f0] sm:$0xf0]  ;;  %v8062_v25 = vld [vmem:[#allocation8 + $0x784] sm:$0xf] }
 0x115   :  { %4155 = vmatpush.bf16.msrb.mxu0 %v5596_v36  ;;  %4177 = vmatpush.bf16.msrb.mxu2 %v5916_v37  ;;  %v6172_v31 = vor.u32 %v7978_v16, %v6169_v17  ;;  %v5849_v36 = vld [vmem:[#allocation8 + $0x270] sm:$0xf0]  ;;  %v6556_v37 = vor.u32 %v8074_v20, %v6553_v21  ;;  %v7990_v12 = vld [vmem:[#allocation8 + $0x544] sm:$0xf] }
 0x116   :  { %v7886_v15 = vld [vmem:[#allocation8 + $0x204] sm:$0xf]  ;;  %v5801_v16 = vld [vmem:[#allocation8 + $0x210] sm:$0xf0] }
 0x117   :  { %4170 = vmatpush.bf16.msra.mxu1 %v5692_v46  ;;  %v5852_v46 = vor.u32 %v7898_v32, %v5849_v36  ;;  %v7962_v17 = vld [vmem:[#allocation8 + $0x464] sm:$0xf]  ;;  %v6105_v20 = vld [vmem:[#allocation8 + $0x470] sm:$0xf0] }
 0x118   :  { %4194 = vmatpush.bf16.msra.mxu3 %v5980_v40  ;;  %v6153_v40 = vld [vmem:[#allocation8 + $0x4d0] sm:$0xf0]  ;;  %v8042_v21 = vld [vmem:[#allocation8 + $0x6e4] sm:$0xf]  ;;  %v6108_v36 = vor.u32 %v7962_v17, %v6105_v20 }
 0x119   :  { %4156 = vmatpush.bf16.msrb.mxu0 %v5580_v34  ;;  %4178 = vmatpush.bf16.msrb.mxu2 %v5900_v54  ;;  %v6156_v52 = vor.u32 %v7974_v39, %v6153_v40  ;;  %v5833_v34 = vld [vmem:[#allocation8 + $0x250] sm:$0xf0]  ;;  %v6540_v54 = vor.u32 %v8070_v33, %v6537_v42  ;;  %v8058_v28 = vld [vmem:[#allocation8 + $0x764] sm:$0xf] }
 0x11a   :  { %v5836_v61 = vor.u32 %v7894_v53, %v5833_v34  ;;  %v6489_v29 = vld [vmem:[#allocation8 + $0x770] sm:$0xf0]  ;;  %v7958_v39 = vld [vmem:[#allocation8 + $0x444] sm:$0xf] }
 0x11b   :  { %4171 = vmatpush.bf16.msra.mxu1 %v5676_v63  ;;  %v6233_v63 = vld [vmem:[#allocation8 + $0x570] sm:$0xf0]  ;;  %v6492_v40 = vor.u32 %v8058_v28, %v6489_v29  ;;  %v8038_v33 = vld [vmem:[#allocation8 + $0x6c4] sm:$0xf] }
 0x11c   :  { %4195 = vmatpush.bf16.msra.mxu3 %v5964_v58  ;;  %v8066_v58 = vld [vmem:[#allocation8 + $0x7a4] sm:$0xf]  ;;  %v6236_v8 = vor.u32 %v7994_v62, %v6233_v63  ;;  %v6201_v32 = vld [vmem:[#allocation8 + $0x530] sm:$0xf0] }
 0x11d   :  { %4157 = vmatpush.bf16.msrb.mxu0 %v5564_v0  ;;  %4179 = vmatpush.bf16.msrb.mxu2 %v5884_v6  ;;  %v6524_v5 = vor.u32 %v8066_v58, %v6521_v60  ;;  %v7966_v0 = vld [vmem:[#allocation8 + $0x484] sm:$0xf]  ;;  %v6121_v6 = vld [vmem:[#allocation8 + $0x490] sm:$0xf0] }
 0x11e   :  { %4172 = vmatmul.bf16.vlgmr.msra.gmra.mxu1 %v8788_v19  ;;  %v6124_v13 = vor.u32 %v7966_v0, %v6121_v6  ;;  %v6409_v42 = vld [vmem:[#allocation8 + $0x6d0] sm:$0xf0]  ;;  %v8054_v14 = vld [vmem:[#allocation8 + $0x744] sm:$0xf] }
 0x11f   :  { %4216 = vmatpush.bf16.msrb.mxu1 %v6300_v3  ;;  %v5817_v3 = vld [vmem:[#allocation8 + $0x230] sm:$0xf0]  ;;  %v8138_v55 = vld [vmem:[#allocation8 + $0x9e4] sm:$0xf] }
 0x120   :  { %4196 = vmatpush.bf16.msra.mxu3 %v5948_v11  ;;  %v5820_v11 = vor.u32 %v7890_v2, %v5817_v3  ;;  %v6473_v47 = vld [vmem:[#allocation8 + $0x750] sm:$0xf0]  ;;  %v8130_v29 = vld [vmem:[#allocation8 + $0x9a4] sm:$0xf] }
 0x121   :  { %4158 = vmatpush.bf16.msrb.mxu0 %v5548_v26  ;;  %4180 = vmatpush.bf16.msrb.mxu2 %v5868_v27  ;;  %v6425_v26 = vld [vmem:[#allocation8 + $0x6f0] sm:$0xf0]  ;;  %v6220_v27 = vor.u32 %v7990_v12, %v6217_v23  ;;  %v6476_v58 = vor.u32 %v8054_v14, %v6473_v47 }
 0x122   :  { %v6185_v53 = vld [vmem:[#allocation8 + $0x510] sm:$0xf0] }
 0x123   :  { %4217 = vmatpush.bf16.msrb.mxu1 %v6284_v18  ;;  %v6508_v18 = vor.u32 %v8062_v25, %v6505_v10  ;;  %v6809_v56 = vld [vmem:[#allocation8 + $0x9f0] sm:$0xf0]  ;;  %v7950_v25 = vld [vmem:[#allocation8 + $0x404] sm:$0xf] }
 0x124   :  { %4197 = vmatpush.bf16.msra.mxu3 %v5932_v30  ;;  %4159 = vmatmul.bf16.vlgmr.msrb.gmra.mxu0 %v8794_v38  ;;  %v5804_v30 = vor.u32 %v7886_v15, %v5801_v16  ;;  %v6073_v60 = vld [vmem:[#allocation8 + $0x430] sm:$0xf0]  ;;  %v6812_v3 = vor.u32 %v8138_v55, %v6809_v56  ;;  %v8106_v16 = vld [vmem:[#allocation8 + $0x8e4] sm:$0xf] }
 0x125   :  { %4203 = vmatpush.bf16.msra.mxu0 %v6172_v31  ;;  %4181 = vmatpush.bf16.msrb.mxu2 %v5852_v46  ;;  %v7986_v31 = vld [vmem:[#allocation8 + $0x524] sm:$0xf]  ;;  %v6393_v62 = vld [vmem:[#allocation8 + $0x6b0] sm:$0xf0] }
 0x126   :  { %v6204_v46 = vor.u32 %v7986_v31, %v6201_v32  ;;  %v6457_v2 = vld [vmem:[#allocation8 + $0x730] sm:$0xf0] }
 0x127   :  { %4218 = vmatpush.bf16.msrb.mxu1 %v6268_v41  ;;  %4198 = vmatmul.bf16.vlgmr.msra.gmra.mxu3 %v8797_v43  ;;  %v6089_v41 = vld [vmem:[#allocation8 + $0x450] sm:$0xf0] }
 0x128   :  { %4242 = vmatpush.bf16.msrb.mxu3 %v6556_v37  ;;  %v6428_v37 = vor.u32 %v8042_v21, %v6425_v26  ;;  %v6092_v34 = vor.u32 %v7958_v39, %v6089_v41  ;;  %v6793_v0 = vld [vmem:[#allocation8 + $0x9d0] sm:$0xf0]  ;;  %v8202_v21 = vld [vmem:[#allocation8 + $0xbe4] sm:$0xf] }
 0x129   :  { %4204 = vmatpush.bf16.msra.mxu0 %v6156_v52  ;;  %4182 = vmatpush.bf16.msrb.mxu2 %v5836_v61  ;;  %v7982_v52 = vld [vmem:[#allocation8 + $0x504] sm:$0xf]  ;;  %v6057_v10 = vld [vmem:[#allocation8 + $0x410] sm:$0xf0] }
 0x12a   :  { %v8034_v61 = vld [vmem:[#allocation8 + $0x6a4] sm:$0xf]  ;;  %v6188_v63 = vor.u32 %v7982_v52, %v6185_v53  ;;  %v6377_v23 = vld [vmem:[#allocation8 + $0x690] sm:$0xf0] }
 0x12b   :  { %4219 = vmatpush.bf16.msrb.mxu1 %v6252_v57  ;;  %v7954_v57 = vld [vmem:[#allocation8 + $0x424] sm:$0xf]  ;;  %v6441_v15 = vld [vmem:[#allocation8 + $0x710] sm:$0xf0] }
 0x12c   :  { %4243 = vmatpush.bf16.msrb.mxu3 %v6540_v54  ;;  %v6412_v54 = vor.u32 %v8038_v33, %v6409_v42  ;;  %v6076_v6 = vor.u32 %v7954_v57, %v6073_v60  ;;  %v6681_v17 = vld [vmem:[#allocation8 + $0x8f0] sm:$0xf0]  ;;  %v8102_v41 = vld [vmem:[#allocation8 + $0x8c4] sm:$0xf] }
 0x12d   :  { %4205 = vmatpush.bf16.msra.mxu0 %v6140_v1  ;;  %4183 = vmatpush.bf16.msrb.mxu2 %v5820_v11  ;;  %v8050_v1 = vld [vmem:[#allocation8 + $0x724] sm:$0xf]  ;;  %v7065_v26 = vld [vmem:[#allocation8 + $0xbf0] sm:$0xf0]  ;;  %v6684_v32 = vor.u32 %v8106_v16, %v6681_v17 }
 0x12e   :  { %v8030_v11 = vld [vmem:[#allocation8 + $0x684] sm:$0xf]  ;;  %v6460_v12 = vor.u32 %v8050_v1, %v6457_v2  ;;  %v6665_v33 = vld [vmem:[#allocation8 + $0x8d0] sm:$0xf0] }
 0x12f   :  { %4220 = vmatpush.bf16.msrb.mxu1 %v6236_v8  ;;  %v6396_v8 = vor.u32 %v8034_v61, %v6393_v62  ;;  %v6380_v28 = vor.u32 %v8030_v11, %v6377_v23  ;;  %v7049_v14 = vld [vmem:[#allocation8 + $0xbd0] sm:$0xf0]  ;;  %v8126_v52 = vld [vmem:[#allocation8 + $0x984] sm:$0xf] }
 0x130   :  { %4244 = vmatpush.bf16.msrb.mxu3 %v6524_v5  ;;  %v8134_v5 = vld [vmem:[#allocation8 + $0x9c4] sm:$0xf]  ;;  %v6761_v53 = vld [vmem:[#allocation8 + $0x990] sm:$0xf0] }
 0x131   :  { %4206 = vmatpush.bf16.msra.mxu0 %v6124_v13  ;;  %4184 = vmatpush.bf16.msrb.mxu2 %v5804_v30  ;;  %v8046_v13 = vld [vmem:[#allocation8 + $0x704] sm:$0xf]  ;;  %v6796_v20 = vor.u32 %v8134_v5, %v6793_v0  ;;  %v6777_v30 = vld [vmem:[#allocation8 + $0x9b0] sm:$0xf0]  ;;  %v6764_v61 = vor.u32 %v8126_v52, %v6761_v53 }
 0x132   :  { %v6444_v31 = vor.u32 %v8046_v13, %v6441_v15  ;;  %v6780_v42 = vor.u32 %v8130_v29, %v6777_v30  ;;  %v6345_v55 = vld [vmem:[#allocation8 + $0x650] sm:$0xf0]  ;;  %v8194_v62 = vld [vmem:[#allocation8 + $0xba4] sm:$0xf] }
 0x133   :  { %4221 = vmatpush.bf16.msrb.mxu1 %v6220_v27  ;;  %v6060_v27 = vor.u32 %v7950_v25, %v6057_v10  ;;  %v6649_v60 = vld [vmem:[#allocation8 + $0x8b0] sm:$0xf0]  ;;  %v8094_v11 = vld [vmem:[#allocation8 + $0x884] sm:$0xf] }
 0x134   :  { %4245 = vmatpush.bf16.msrb.mxu3 %v6508_v18  ;;  %4185 = vmatmul.bf16.vlgmr.msrb.gmra.mxu2 %v8812_v48  ;;  %v1368_v18 = vld [vmem:[#allocation10] sm:$0xf]  ;;  %v6745_v5 = vld [vmem:[#allocation8 + $0x970] sm:$0xf0]  ;;  %v8190_v13 = vld [vmem:[#allocation8 + $0xb84] sm:$0xf] }
 0x135   :  { %4207 = vmatpush.bf16.msra.mxu0 %v6108_v36  ;;  %4229 = vmatpush.bf16.msra.mxu2 %v6428_v37  ;;  %v8026_v36 = vld [vmem:[#allocation8 + $0x664] sm:$0xf]  ;;  %v6361_v37 = vld [vmem:[#allocation8 + $0x670] sm:$0xf0]  ;;  %v8867_v39 = vunpack.c.l.bf16 %v1368_v18 }
 0x136   :  { %v6364_v47 = vor.u32 %v8026_v36, %v6361_v37  ;;  %v6329_v25 = vld [vmem:[#allocation8 + $0x630] sm:$0xf0]  ;;  %v8118_v18 = vld [vmem:[#allocation8 + $0x944] sm:$0xf] }
 0x137   :  { %4222 = vmatpush.bf16.msrb.mxu1 %v6204_v46  ;;  %v8198_v46 = vld [vmem:[#allocation8 + $0xbc4] sm:$0xf]  ;;  %v1371_v56 = vperm.slane %v8867_v39, 0  ;;  %v7017_v15 = vld [vmem:[#allocation8 + $0xb90] sm:$0xf0] }
 0x138   :  { %4246 = vmatpush.bf16.msrb.mxu3 %v6492_v40  ;;  %v7068_v40 = vor.u32 %v8202_v21, %v7065_v26  ;;  %v7052_v57 = vor.u32 %v8198_v46, %v7049_v14  ;;  %v8090_v29 = vld [vmem:[#allocation8 + $0x864] sm:$0xf]  ;;  %v7020_v30 = vor.u32 %v8190_v13, %v7017_v15  ;;  %v6937_v36 = vld [vmem:[#allocation8 + $0xaf0] sm:$0xf0] }
 0x139   :  { %4208 = vmatpush.bf16.msra.mxu0 %v6092_v34  ;;  %4230 = vmatpush.bf16.msra.mxu2 %v6412_v54  ;;  %v6668_v34 = vor.u32 %v8102_v41, %v6665_v33  ;;  %v8022_v54 = vld [vmem:[#allocation8 + $0x644] sm:$0xf]  ;;  %v7001_v33 = vld [vmem:[#allocation8 + $0xb70] sm:$0xf0] }
 0x13a   :  { %v6348_v2 = vor.u32 %v8022_v54, %v6345_v55  ;;  %v8186_v41 = vld [vmem:[#allocation8 + $0xb64] sm:$0xf]  ;;  %v6601_v55 = vld [vmem:[#allocation8 + $0x850] sm:$0xf0] }
 0x13b   :  { %4223 = vmatpush.bf16.msrb.mxu1 %v6188_v63  ;;  %v7033_v63 = vld [vmem:[#allocation8 + $0xbb0] sm:$0xf0]  ;;  %v3965_v1 = vpop.f32.mrf.mxu1  ;;  %v8114_v14 = vld [vmem:[#allocation8 + $0x924] sm:$0xf]  ;;  %v7004_v54 = vor.u32 %v8186_v41, %v7001_v33 }
 0x13c   :  { %4247 = vmatpush.bf16.msrb.mxu3 %v6476_v58  ;;  %v8098_v58 = vld [vmem:[#allocation8 + $0x8a4] sm:$0xf]  ;;  %v7036_v10 = vor.u32 %v8194_v62, %v7033_v63  ;;  %v6969_v15 = vld [vmem:[#allocation8 + $0xb30] sm:$0xf0] }
 0x13d   :  { %4209 = vmatpush.bf16.msra.mxu0 %v6076_v6  ;;  %4231 = vmatpush.bf16.msra.mxu2 %v6396_v8  ;;  %v6652_v0 = vor.u32 %v8098_v58, %v6649_v60  ;;  %v1379_v6 = vperm.slane %v1371_v56, 0  ;;  %v8018_v8 = vld [vmem:[#allocation8 + $0x624] sm:$0xf]  ;;  %v7193_v41 = vld [vmem:[#allocation8 + $0xcf0] sm:$0xf0] }
 0x13e   :  { %4224 = vmatmul.bf16.vlgmr.msrb.gmra.mxu1 %v8805_v24  ;;  %v6332_v17 = vor.u32 %v8018_v8, %v6329_v25  ;;  %v8166_v56 = vld [vmem:[#allocation8 + $0xac4] sm:$0xf] }
 0x13f   :  { %4268 = vmatpush.bf16.msra.mxu1 %v6812_v3  ;;  %v8122_v3 = vld [vmem:[#allocation8 + $0x964] sm:$0xf] }
 0x140   :  { %4248 = vmatpush.bf16.msrb.mxu3 %v6460_v12  ;;  %v6633_v12 = vld [vmem:[#allocation8 + $0x890] sm:$0xf0]  ;;  %v6748_v23 = vor.u32 %v8122_v3, %v6745_v5  ;;  %v8182_v60 = vld [vmem:[#allocation8 + $0xb44] sm:$0xf] }
 0x141   :  { %4210 = vmatpush.bf16.msra.mxu0 %v6060_v27  ;;  %4232 = vmatpush.bf16.msra.mxu2 %v6380_v28  ;;  %v3952_v16 = vpop.f32.mrf.mxu0  ;;  %v6636_v26 = vor.u32 %v8094_v11, %v6633_v12  ;;  %v8014_v27 = vld [vmem:[#allocation8 + $0x604] sm:$0xf]  ;;  %v6313_v28 = vld [vmem:[#allocation8 + $0x610] sm:$0xf0] }
 0x142   :  { %v3953_v21 = vadd.f32 %v3952_v16, %v1379_v6  ;;  %v6316_v46 = vor.u32 %v8014_v27, %v6313_v28  ;;  %v7321_v6 = vld [vmem:[#allocation8 + $0xdf0] sm:$0xf0]  ;;  %v8082_v8 = vld [vmem:[#allocation8 + $0x824] sm:$0xf] }
 0x143   :  { %4269 = vmatpush.bf16.msra.mxu1 %v6796_v20  ;;  %v6729_v20 = vld [vmem:[#allocation8 + $0x950] sm:$0xf0]  ;;  %v8162_v11 = vld [vmem:[#allocation8 + $0xaa4] sm:$0xf] }
 0x144   :  { %4249 = vmatpush.bf16.msrb.mxu3 %v6444_v31  ;;  %4211 = vmatmul.bf16.vlgmr.msra.gmra.mxu0 %v8814_v49  ;;  %v6617_v31 = vld [vmem:[#allocation8 + $0x870] sm:$0xf0]  ;;  %v8872_v37 = vadd.f32 %v3965_v1, %v3953_v21  ;;  %v8110_v1 = vld [vmem:[#allocation8 + $0x904] sm:$0xf] }
 0x145   :  { %4255 = vmatpush.bf16.msrb.mxu0 %v6684_v32  ;;  %4233 = vmatpush.bf16.msra.mxu2 %v6364_v47  ;;  %v8170_v32 = vld [vmem:[#allocation8 + $0xae4] sm:$0xf]  ;;  %v6713_v47 = vld [vmem:[#allocation8 + $0x930] sm:$0xf0]  ;;  %v6620_v52 = vor.u32 %v8090_v29, %v6617_v31 }
 0x146   :  { %v6940_v53 = vor.u32 %v8170_v32, %v6937_v36  ;;  %v6716_v58 = vor.u32 %v8114_v14, %v6713_v47  ;;  %v6905_v12 = vld [vmem:[#allocation8 + $0xab0] sm:$0xf0]  ;;  %v8178_v13 = vld [vmem:[#allocation8 + $0xb24] sm:$0xf] }
 0x147   :  { %4270 = vmatpush.bf16.msra.mxu1 %v6780_v42  ;;  %4250 = vmatmul.bf16.vlgmr.msrb.gmra.mxu3 %v8818_v59  ;;  %v3967_v42 = vpop.f32.mrf.mxu1  ;;  %v6908_v21 = vor.u32 %v8162_v11, %v6905_v12  ;;  %v8078_v27 = vld [vmem:[#allocation8 + $0x804] sm:$0xf]  ;;  %v6569_v28 = vld [vmem:[#allocation8 + $0x810] sm:$0xf0]  ;;  %v6972_v29 = vor.u32 %v8178_v13, %v6969_v15 }
 0x148   :  { %4294 = vmatpush.bf16.msra.mxu3 %v7068_v40  ;;  %v6732_v40 = vor.u32 %v8118_v18, %v6729_v20  ;;  %v8262_v18 = vld [vmem:[#allocation8 + $0xdc4] sm:$0xf]  ;;  %v6889_v31 = vld [vmem:[#allocation8 + $0xa90] sm:$0xf0]  ;;  %v6572_v47 = vor.u32 %v8078_v27, %v6569_v28 }
 0x149   :  { %4256 = vmatpush.bf16.msrb.mxu0 %v6668_v34  ;;  %4234 = vmatpush.bf16.msra.mxu2 %v6348_v2  ;;  %v8086_v34 = vld [vmem:[#allocation8 + $0x844] sm:$0xf]  ;;  %v3954_v63 = vpop.f32.mrf.mxu0  ;;  %v6697_v2 = vld [vmem:[#allocation8 + $0x910] sm:$0xf0] }
 0x14a   :  { %v8874_v62 = vpop.f32.mrf.mxu3  ;;  %v6604_v3 = vor.u32 %v8086_v34, %v6601_v55  ;;  %v8174_v32 = vld [vmem:[#allocation8 + $0xb04] sm:$0xf]  ;;  %v6953_v36 = vld [vmem:[#allocation8 + $0xb10] sm:$0xf0] }
 0x14b   :  { %4271 = vmatpush.bf16.msra.mxu1 %v6764_v61  ;;  %v6985_v61 = vld [vmem:[#allocation8 + $0xb50] sm:$0xf0]  ;;  %v8150_v11 = vld [vmem:[#allocation8 + $0xa44] sm:$0xf] }
 0x14c   :  { %4295 = vmatpush.bf16.msra.mxu3 %v7052_v57  ;;  %v6921_v57 = vld [vmem:[#allocation8 + $0xad0] sm:$0xf0]  ;;  %v6988_v25 = vor.u32 %v8182_v60, %v6985_v61  ;;  %v8230_v61 = vld [vmem:[#allocation8 + $0xcc4] sm:$0xf] }
 0x14d   :  { %4257 = vmatpush.bf16.msrb.mxu0 %v6652_v0  ;;  %4235 = vmatpush.bf16.msra.mxu2 %v6332_v17  ;;  %v6924_v5 = vor.u32 %v8166_v56, %v6921_v57  ;;  %v8266_v0 = vld [vmem:[#allocation8 + $0xde4] sm:$0xf]  ;;  %v7577_v14 = vld [vmem:[#allocation8 + $0xff0] sm:$0xf0] }
 0x14e   :  { %v7324_v17 = vor.u32 %v8266_v0, %v7321_v6  ;;  %v7289_v34 = vld [vmem:[#allocation8 + $0xdb0] sm:$0xf0]  ;;  %v8154_v56 = vld [vmem:[#allocation8 + $0xa64] sm:$0xf] }
 0x14f   :  { %4272 = vmatpush.bf16.msra.mxu1 %v6748_v23  ;;  %v6700_v23 = vor.u32 %v8110_v1, %v6697_v2  ;;  %v8877_v16 = vpop.f32.mrf.mxu1  ;;  %v6873_v57 = vld [vmem:[#allocation8 + $0xa70] sm:$0xf0]  ;;  %v8254_v6 = vld [vmem:[#allocation8 + $0xd84] sm:$0xf] }
 0x150   :  { %4296 = vmatpush.bf16.msra.mxu3 %v7036_v10  ;;  %v6585_v10 = vld [vmem:[#allocation8 + $0x830] sm:$0xf0]  ;;  %v6876_v0 = vor.u32 %v8154_v56, %v6873_v57  ;;  %v8226_v15 = vld [vmem:[#allocation8 + $0xca4] sm:$0xf] }
 0x151   :  { %4258 = vmatpush.bf16.msrb.mxu0 %v6636_v26  ;;  %4236 = vmatpush.bf16.msra.mxu2 %v6316_v46  ;;  %v6588_v20 = vor.u32 %v8082_v8, %v6585_v10  ;;  %v7305_v26 = vld [vmem:[#allocation8 + $0xdd0] sm:$0xf0]  ;;  %v8330_v46 = vld [vmem:[#allocation8 + $0xfe4] sm:$0xf] }
 0x152   :  { %v3993_v33 = vpop.f32.mrf.mxu3  ;;  %v7308_v42 = vor.u32 %v8262_v18, %v7305_v26  ;;  %v7580_v60 = vor.u32 %v8330_v46, %v7577_v14  ;;  %v7177_v63 = vld [vmem:[#allocation8 + $0xcd0] sm:$0xf0]  ;;  %v8250_v28 = vld [vmem:[#allocation8 + $0xd64] sm:$0xf] }
 0x153   :  { %4273 = vmatpush.bf16.msra.mxu1 %v6732_v40  ;;  %v8234_v40 = vld [vmem:[#allocation8 + $0xce4] sm:$0xf]  ;;  %v7273_v8 = vld [vmem:[#allocation8 + $0xd90] sm:$0xf0]  ;;  %v7180_v10 = vor.u32 %v8230_v61, %v7177_v63 }
 0x154   :  { %4297 = vmatpush.bf16.msra.mxu3 %v7020_v30  ;;  %4237 = vmatmul.bf16.vlgmr.msra.gmra.mxu2 %v8827_v7  ;;  %v8158_v30 = vld [vmem:[#allocation8 + $0xa84] sm:$0xf]  ;;  %v7196_v55 = vor.u32 %v8234_v40, %v7193_v41  ;;  %v6857_v12 = vld [vmem:[#allocation8 + $0xa50] sm:$0xf0]  ;;  %v7276_v18 = vor.u32 %v8254_v6, %v7273_v8 }
 0x155   :  { %4259 = vmatpush.bf16.msrb.mxu0 %v6620_v52  ;;  %4281 = vmatpush.bf16.msrb.mxu2 %v6940_v53  ;;  %v6892_v52 = vor.u32 %v8158_v30, %v6889_v31  ;;  %v8258_v53 = vld [vmem:[#allocation8 + $0xda4] sm:$0xf]  ;;  %v6860_v27 = vor.u32 %v8150_v11, %v6857_v12  ;;  %v7129_v63 = vld [vmem:[#allocation8 + $0xc70] sm:$0xf0] }
 0x156   :  { %v7292_v2 = vor.u32 %v8258_v53, %v7289_v34  ;;  %v8146_v31 = vld [vmem:[#allocation8 + $0xa24] sm:$0xf]  ;;  %v7225_v8 = vld [vmem:[#allocation8 + $0xd30] sm:$0xf0] }
 0x157   :  { %4274 = vmatpush.bf16.msra.mxu1 %v6716_v58  ;;  %v4004_v58 = vpop.f32.mrf.mxu0  ;;  %v4019_v1 = vpop.f32.mrf.mxu1  ;;  %v8222_v33 = vld [vmem:[#allocation8 + $0xc84] sm:$0xf] }
 0x158   :  { %4298 = vmatpush.bf16.msra.mxu3 %v7004_v54  ;;  %v6956_v54 = vor.u32 %v8174_v32, %v6953_v36  ;;  %v6841_v32 = vld [vmem:[#allocation8 + $0xa30] sm:$0xf0]  ;;  %v8246_v34 = vld [vmem:[#allocation8 + $0xd44] sm:$0xf] }
 0x159   :  { %4260 = vmatpush.bf16.msrb.mxu0 %v6604_v3  ;;  %4282 = vmatpush.bf16.msrb.mxu2 %v6924_v5  ;;  %v8326_v3 = vld [vmem:[#allocation8 + $0xfc4] sm:$0xf]  ;;  %v7561_v5 = vld [vmem:[#allocation8 + $0xfd0] sm:$0xf0]  ;;  %v6844_v53 = vor.u32 %v8146_v31, %v6841_v32 }
 0x15a   :  { %v7564_v13 = vor.u32 %v8326_v3, %v7561_v5  ;;  %v8884_v30 = vpop.f32.mrf.mxu3  ;;  %v8142_v57 = vld [vmem:[#allocation8 + $0xa04] sm:$0xf] }
 0x15b   :  { %4275 = vmatpush.bf16.msra.mxu1 %v6700_v23  ;;  %v8298_v1 = vld [vmem:[#allocation8 + $0xee4] sm:$0xf] }
 0x15c   :  { %4299 = vmatpush.bf16.msra.mxu3 %v6988_v25  ;;  %v3978_v25 = vpop.f32.mrf.mxu2  ;;  %v8314_v5 = vld [vmem:[#allocation8 + $0xf64] sm:$0xf] }
 0x15d   :  { %4261 = vmatpush.bf16.msrb.mxu0 %v6588_v20  ;;  %4283 = vmatpush.bf16.msrb.mxu2 %v6908_v21  ;;  %v3979_v23 = vadd.f32 %v3978_v25, %v8872_v37  ;;  %v8322_v20 = vld [vmem:[#allocation8 + $0xfa4] sm:$0xf]  ;;  %v7545_v21 = vld [vmem:[#allocation8 + $0xfb0] sm:$0xf0] }
 0x15e   :  { %4276 = vmatmul.bf16.vlgmr.msra.gmra.mxu1 %v8824_v51  ;;  %v7548_v41 = vor.u32 %v8322_v20, %v7545_v21  ;;  %v8242_v6 = vld [vmem:[#allocation8 + $0xd24] sm:$0xf] }
 0x15f   :  { %4320 = vmatpush.bf16.msrb.mxu1 %v7324_v17  ;;  %v7161_v17 = vld [vmem:[#allocation8 + $0xcb0] sm:$0xf0]  ;;  %v3992_v26 = vadd.f32 %v8874_v62, %v3979_v23  ;;  %v4006_v36 = vpop.f32.mrf.mxu0  ;;  %v8886_v46 = vpop.f32.mrf.mxu1  ;;  %v8318_v62 = vld [vmem:[#allocation8 + $0xf84] sm:$0xf]  ;;  %v7228_v21 = vor.u32 %v8242_v6, %v7225_v8  ;;  %v5663_v8 = vld [vmem:[#allocation8 + $0xe8] sm:$0xf] }
 0x160   :  { %4300 = vmatpush.bf16.msra.mxu3 %v6972_v29  ;;  %v7257_v29 = vld [vmem:[#allocation8 + $0xd70] sm:$0xf0]  ;;  %v7164_v37 = vor.u32 %v8226_v15, %v7161_v17  ;;  %v8214_v12 = vld [vmem:[#allocation8 + $0xc44] sm:$0xf]  ;;  %v5791_v36 = vld [vmem:[#allocation8 + $0x1e8] sm:$0xf] }
 0x161   :  { %4262 = vmatpush.bf16.msrb.mxu0 %v6572_v47  ;;  %4284 = vmatpush.bf16.msrb.mxu2 %v6892_v52  ;;  %v4005_v40 = vadd.f32 %v4004_v58, %v3992_v26  ;;  %v7260_v14 = vor.u32 %v8250_v28, %v7257_v29  ;;  %v7529_v47 = vld [vmem:[#allocation8 + $0xf90] sm:$0xf0]  ;;  %v8294_v17 = vld [vmem:[#allocation8 + $0xec4] sm:$0xf] }
 0x162   :  { %v6825_v58 = vld [vmem:[#allocation8 + $0xa10] sm:$0xf0]  ;;  %v7532_v61 = vor.u32 %v8318_v62, %v7529_v47  ;;  %v4045_v25 = vpop.f32.mrf.mxu3  ;;  %v8310_v26 = vld [vmem:[#allocation8 + $0xf44] sm:$0xf] }
 0x163   :  { %4321 = vmatpush.bf16.msrb.mxu1 %v7308_v42  ;;  %v7145_v42 = vld [vmem:[#allocation8 + $0xc90] sm:$0xf0]  ;;  %v4018_v52 = vadd.f32 %v8877_v16, %v4005_v40  ;;  %v6828_v16 = vor.u32 %v8142_v57, %v6825_v58  ;;  %v8238_v28 = vld [vmem:[#allocation8 + $0xd04] sm:$0xf]  ;;  %v7885_v40 = vld [vmem:[#allocation8 + $0x1f4] sm:$0xf0] }
 0x164   :  { %4301 = vmatpush.bf16.msra.mxu3 %v6956_v54  ;;  %4263 = vmatmul.bf16.vlgmr.msrb.gmra.mxu0 %v8829_v9  ;;  %v7241_v54 = vld [vmem:[#allocation8 + $0xd50] sm:$0xf0]  ;;  %v7148_v56 = vor.u32 %v8222_v33, %v7145_v42  ;;  %v8290_v62 = vld [vmem:[#allocation8 + $0xea4] sm:$0xf]  ;;  %v5775_v57 = vld [vmem:[#allocation8 + $0x1c8] sm:$0xf] }
 0x165   :  { %4307 = vmatpush.bf16.msra.mxu0 %v7196_v55  ;;  %4285 = vmatpush.bf16.msrb.mxu2 %v6876_v0  ;;  %v3980_v55 = vpop.f32.mrf.mxu2  ;;  %v7244_v3 = vor.u32 %v8246_v34, %v7241_v54  ;;  %v7513_v0 = vld [vmem:[#allocation8 + $0xf70] sm:$0xf0]  ;;  %v8306_v34 = vld [vmem:[#allocation8 + $0xf24] sm:$0xf]  ;;  %v7853_v25 = vld [vmem:[#allocation8 + $0xf4] sm:$0xf0] }
 0x166   :  { %v7113_v15 = vld [vmem:[#allocation8 + $0xc50] sm:$0xf0]  ;;  %v8302_v6 = vld [vmem:[#allocation8 + $0xf04] sm:$0xf] }
 0x167   :  { %4322 = vmatpush.bf16.msrb.mxu1 %v7292_v2  ;;  %4302 = vmatmul.bf16.vlgmr.msra.gmra.mxu3 %v8832_v22  ;;  %v7449_v2 = vld [vmem:[#allocation8 + $0xef0] sm:$0xf0]  ;;  %v4056_v23 = vpop.f32.mrf.mxu0  ;;  %v4071_v20 = vpop.f32.mrf.mxu1  ;;  %v7116_v31 = vor.u32 %v8214_v12, %v7113_v15  ;;  %v6047_v12 = vld [vmem:[#allocation8 + $0x3e8] sm:$0xf] }
 0x168   :  { %4346 = vmatpush.bf16.msrb.mxu3 %v7580_v60  ;;  %v8218_v60 = vld [vmem:[#allocation8 + $0xc64] sm:$0xf]  ;;  %v7452_v11 = vor.u32 %v8298_v1, %v7449_v2  ;;  %v7209_v29 = vld [vmem:[#allocation8 + $0xd10] sm:$0xf0]  ;;  %v7877_v20 = vld [vmem:[#allocation8 + $0x1b4] sm:$0xf0] }
 0x169   :  { %4308 = vmatpush.bf16.msra.mxu0 %v7180_v10  ;;  %4286 = vmatpush.bf16.msrb.mxu2 %v6860_v27  ;;  %v7132_v10 = vor.u32 %v8218_v60, %v7129_v63  ;;  %v7497_v27 = vld [vmem:[#allocation8 + $0xf50] sm:$0xf0] }
 0x16a   :  { %v7500_v42 = vor.u32 %v8310_v26, %v7497_v27  ;;  %v7417_v47 = vld [vmem:[#allocation8 + $0xeb0] sm:$0xf0]  ;;  %v8891_v2 = vpop.f32.mrf.mxu3  ;;  %v5664_v26 = vor.u32 %v7853_v25, %v5663_v8  ;;  %v8282_v27 = vld [vmem:[#allocation8 + $0xe64] sm:$0xf]  ;;  %v5999_v25 = vld [vmem:[#allocation8 + $0x388] sm:$0xf] }
 0x16b   :  { %4323 = vmatpush.bf16.msrb.mxu1 %v7276_v18  ;;  %v7433_v18 = vld [vmem:[#allocation8 + $0xed0] sm:$0xf0]  ;;  %v7420_v60 = vor.u32 %v8290_v62, %v7417_v47  ;;  %v8278_v62 = vld [vmem:[#allocation8 + $0xe44] sm:$0xf] }
 0x16c   :  { %4347 = vmatpush.bf16.msrb.mxu3 %v7564_v13  ;;  %v7516_v13 = vor.u32 %v8314_v5, %v7513_v0  ;;  %v7436_v32 = vor.u32 %v8294_v17, %v7433_v18  ;;  %v7481_v54 = vld [vmem:[#allocation8 + $0xf30] sm:$0xf0]  ;;  %v8286_v0 = vld [vmem:[#allocation8 + $0xe84] sm:$0xf] }
 0x16d   :  { %4309 = vmatpush.bf16.msra.mxu0 %v7164_v37  ;;  %4287 = vmatpush.bf16.msrb.mxu2 %v6844_v53  ;;  %v4030_v37 = vpop.f32.mrf.mxu2  ;;  %v7212_v53 = vor.u32 %v8238_v28, %v7209_v29  ;;  %v7081_v63 = vld [vmem:[#allocation8 + $0xc10] sm:$0xf0]  ;;  %v7484_v5 = vor.u32 %v8306_v34, %v7481_v54  ;;  %v5631_v34 = vld [vmem:[#allocation8 + $0xa8] sm:$0xf]  ;;  %v7845_v54 = vld [vmem:[#allocation8 + $0xb4] sm:$0xf0] }
 0x16e   :  { %v4031_v33 = vadd.f32 %v4030_v37, %v4018_v52  ;;  %v8206_v52 = vld [vmem:[#allocation8 + $0xc04] sm:$0xf]  ;;  %v7385_v28 = vld [vmem:[#allocation8 + $0xe70] sm:$0xf0]  ;;  %v5647_v37 = vld [vmem:[#allocation8 + $0xc8] sm:$0xf] }
 0x16f   :  { %4324 = vmatpush.bf16.msrb.mxu1 %v7260_v14  ;;  %v7097_v14 = vld [vmem:[#allocation8 + $0xc30] sm:$0xf0]  ;;  %v4058_v1 = vpop.f32.mrf.mxu0  ;;  %v7084_v17 = vor.u32 %v8206_v52, %v7081_v63  ;;  %v5632_v63 = vor.u32 %v7845_v54, %v5631_v34  ;;  %v7913_v34 = vld [vmem:[#allocation8 + $0x2d4] sm:$0xf0] }
 0x170   :  { %4348 = vmatpush.bf16.msrb.mxu3 %v7548_v41  ;;  %v8210_v41 = vld [vmem:[#allocation8 + $0xc24] sm:$0xf]  ;;  %v4044_v55 = vadd.f32 %v8884_v30, %v4031_v33  ;;  %v7465_v30 = vld [vmem:[#allocation8 + $0xf10] sm:$0xf0]  ;;  %v7873_v33 = vld [vmem:[#allocation8 + $0x194] sm:$0xf0] }
 0x171   :  { %4310 = vmatpush.bf16.msra.mxu0 %v7148_v56  ;;  %4288 = vmatpush.bf16.msrb.mxu2 %v6828_v16  ;;  %v5792_v56 = vor.u32 %v7885_v40, %v5791_v36  ;;  %v7100_v58 = vor.u32 %v8210_v41, %v7097_v14  ;;  %v7401_v16 = vld [vmem:[#allocation8 + $0xe90] sm:$0xf0]  ;;  %v7945_v36 = vld [vmem:[#allocation8 + $0x3d4] sm:$0xf0]  ;;  %v7388_v40 = vor.u32 %v8282_v27, %v7385_v28  ;;  %v5743_v41 = vld [vmem:[#allocation8 + $0x188] sm:$0xf] }
 0x172   :  { %v7404_v18 = vor.u32 %v8286_v0, %v7401_v16  ;;  %v7369_v47 = vld [vmem:[#allocation8 + $0xe50] sm:$0xf0]  ;;  %v8274_v1 = vld [vmem:[#allocation8 + $0xe24] sm:$0xf]  ;;  %v5615_v16 = vld [vmem:[#allocation8 + $0x88] sm:$0xf] }
 0x173   :  { %4325 = vmatpush.bf16.msrb.mxu1 %v7244_v3  ;;  %v4057_v3 = vadd.f32 %v4056_v23, %v4044_v55  ;;  %v5759_v23 = vld [vmem:[#allocation8 + $0x1a8] sm:$0xf]  ;;  %v5744_v55 = vor.u32 %v7873_v33, %v5743_v41  ;;  %v7917_v28 = vld [vmem:[#allocation8 + $0x2f4] sm:$0xf0] }
 0x174   :  { %4349 = vmatpush.bf16.msrb.mxu3 %v7532_v61  ;;  %4289 = vmatmul.bf16.vlgmr.msrb.gmra.mxu2 %v8845_v35  ;;  %v7881_v61 = vld [vmem:[#allocation8 + $0x1d4] sm:$0xf0]  ;;  %v5919_v27 = vld [vmem:[#allocation8 + $0x2e8] sm:$0xf] }
 0x175   :  { %4311 = vmatpush.bf16.msra.mxu0 %v7132_v10  ;;  %4333 = vmatpush.bf16.msra.mxu2 %v7452_v11  ;;  %v4070_v10 = vadd.f32 %v8886_v46, %v4057_v3  ;;  %v5776_v11 = vor.u32 %v7881_v61, %v5775_v57  ;;  %v4032_v15 = vpop.f32.mrf.mxu2  ;;  %v7849_v46 = vld [vmem:[#allocation8 + $0xd4] sm:$0xf0]  ;;  %v7353_v3 = vld [vmem:[#allocation8 + $0xe30] sm:$0xf0]  ;;  %v5920_v33 = vor.u32 %v7917_v28, %v5919_v27  ;;  %v5871_v27 = vld [vmem:[#allocation8 + $0x288] sm:$0xf] }
 0x176   :  { %v5648_v14 = vor.u32 %v7849_v46, %v5647_v37  ;;  %v7941_v57 = vld [vmem:[#allocation8 + $0x3b4] sm:$0xf0]  ;;  %v5711_v15 = vld [vmem:[#allocation8 + $0x148] sm:$0xf] }
 0x177   :  { %4326 = vmatpush.bf16.msrb.mxu1 %v7228_v21  ;;  %v7468_v21 = vor.u32 %v8302_v6, %v7465_v30  ;;  %v7869_v61 = vld [vmem:[#allocation8 + $0x174] sm:$0xf0]  ;;  %v5983_v37 = vld [vmem:[#allocation8 + $0x368] sm:$0xf] }
 0x178   :  { %4350 = vmatpush.bf16.msrb.mxu3 %v7516_v13  ;;  %v7949_v13 = vld [vmem:[#allocation8 + $0x3f4] sm:$0xf0] }
 0x179   :  { %4312 = vmatpush.bf16.msra.mxu0 %v7116_v31  ;;  %4334 = vmatpush.bf16.msra.mxu2 %v7436_v32  ;;  %v6048_v29 = vor.u32 %v7949_v13, %v6047_v12  ;;  %v5760_v31 = vor.u32 %v7877_v20, %v5759_v23  ;;  %v6031_v32 = vld [vmem:[#allocation8 + $0x3c8] sm:$0xf]  ;;  %v7841_v6 = vld [vmem:[#allocation8 + $0x94] sm:$0xf0]  ;;  %v7356_v13 = vor.u32 %v8274_v1, %v7353_v3  ;;  %v8270_v23 = vld [vmem:[#allocation8 + $0xe04] sm:$0xf] }
 0x17a   :  { %v7337_v20 = vld [vmem:[#allocation8 + $0xe10] sm:$0xf0]  ;;  %v7933_v46 = vld [vmem:[#allocation8 + $0x374] sm:$0xf0]  ;;  %v6303_v1 = vld [vmem:[#allocation8 + $0x5e8] sm:$0xf] }
 0x17b   :  { %4327 = vmatpush.bf16.msrb.mxu1 %v7212_v53  ;;  %v6032_v53 = vor.u32 %v7945_v36, %v6031_v32  ;;  %v4121_v30 = vpop.f32.mrf.mxu1  ;;  %v5695_v32 = vld [vmem:[#allocation8 + $0x128] sm:$0xf]  ;;  %v7861_v36 = vld [vmem:[#allocation8 + $0x134] sm:$0xf0] }
 0x17c   :  { %4351 = vmatpush.bf16.msrb.mxu3 %v7500_v42  ;;  %v4097_v42 = vpop.f32.mrf.mxu3  ;;  %v8013_v3 = vld [vmem:[#allocation8 + $0x5f4] sm:$0xf0] }
 0x17d   :  { %4313 = vmatpush.bf16.msra.mxu0 %v7100_v58  ;;  %4335 = vmatpush.bf16.msra.mxu2 %v7420_v60  ;;  %v7372_v58 = vor.u32 %v8278_v62, %v7369_v47  ;;  %v5727_v60 = vld [vmem:[#allocation8 + $0x168] sm:$0xf]  ;;  %v4082_v52 = vpop.f32.mrf.mxu2  ;;  %v5984_v62 = vor.u32 %v7933_v46, %v5983_v37  ;;  %v7833_v47 = vld [vmem:[#allocation8 + $0x54] sm:$0xf0] }
 0x17e   :  { %4328 = vmatmul.bf16.vlgmr.msrb.gmra.mxu1 %v8849_v4  ;;  %v5728_v8 = vor.u32 %v7869_v61, %v5727_v60  ;;  %v5583_v42 = vld [vmem:[#allocation8 + $0x48] sm:$0xf]  ;;  %v7857_v61 = vld [vmem:[#allocation8 + $0x114] sm:$0xf0] }
 0x17f   :  { %4372 = vmatpush.bf16.msra.mxu1 %v5792_v56  ;;  %v6015_v56 = vld [vmem:[#allocation8 + $0x3a8] sm:$0xf]  ;;  %v7905_v28 = vld [vmem:[#allocation8 + $0x294] sm:$0xf0] }
 0x180   :  { %4352 = vmatpush.bf16.msrb.mxu3 %v7484_v5  ;;  %v4083_v5 = vadd.f32 %v4082_v52, %v4070_v10  ;;  %v6016_v0 = vor.u32 %v7941_v57, %v6015_v56  ;;  %v5696_v56 = vor.u32 %v7861_v36, %v5695_v32  ;;  %v5967_v57 = vld [vmem:[#allocation8 + $0x348] sm:$0xf]  ;;  %v5584_v52 = vor.u32 %v7833_v47, %v5583_v42  ;;  %v7921_v37 = vld [vmem:[#allocation8 + $0x314] sm:$0xf0] }
 0x181   :  { %4314 = vmatpush.bf16.msra.mxu0 %v7084_v17  ;;  %4336 = vmatpush.bf16.msra.mxu2 %v7404_v18  ;;  %v7865_v17 = vld [vmem:[#allocation8 + $0x154] sm:$0xf0]  ;;  %v5616_v18 = vor.u32 %v7841_v6, %v5615_v16  ;;  %v5679_v60 = vld [vmem:[#allocation8 + $0x108] sm:$0xf] }
 0x182   :  { %v4096_v12 = vadd.f32 %v8891_v2, %v4083_v5  ;;  %v7340_v2 = vor.u32 %v8270_v23, %v7337_v20  ;;  %v5567_v5 = vld [vmem:[#allocation8 + $0x28] sm:$0xf]  ;;  %v7829_v16 = vld [vmem:[#allocation8 + $0x34] sm:$0xf0] }
 0x183   :  { %4373 = vmatpush.bf16.msra.mxu1 %v5776_v11  ;;  %v7937_v11 = vld [vmem:[#allocation8 + $0x394] sm:$0xf0]  ;;  %v4123_v54 = vpop.f32.mrf.mxu1  ;;  %v5887_v6 = vld [vmem:[#allocation8 + $0x2a8] sm:$0xf] }
 0x184   :  { %4353 = vmatpush.bf16.msrb.mxu3 %v7468_v21  ;;  %4315 = vmatmul.bf16.vlgmr.msra.gmra.mxu0 %v8852_v50  ;;  %v5599_v21 = vld [vmem:[#allocation8 + $0x68] sm:$0xf]  ;;  %v6000_v10 = vor.u32 %v7937_v11, %v5999_v25  ;;  %v7925_v11 = vld [vmem:[#allocation8 + $0x334] sm:$0xf0] }
 0x185   :  { %4359 = vmatpush.bf16.msrb.mxu0 %v5664_v26  ;;  %4337 = vmatpush.bf16.msra.mxu2 %v7388_v40  ;;  %v7837_v26 = vld [vmem:[#allocation8 + $0x74] sm:$0xf0]  ;;  %v5951_v25 = vld [vmem:[#allocation8 + $0x328] sm:$0xf] }
 0x186   :  { %v5600_v41 = vor.u32 %v7837_v26, %v5599_v21  ;;  %v8009_v20 = vld [vmem:[#allocation8 + $0x5d4] sm:$0xf0]  ;;  %v5551_v21 = vld [vmem:[#allocation8 + $0x8] sm:$0xf]  ;;  %v5952_v26 = vor.u32 %v7925_v11, %v5951_v25 }
 0x187   :  { %4374 = vmatpush.bf16.msra.mxu1 %v5760_v31  ;;  %4354 = vmatmul.bf16.vlgmr.msrb.gmra.mxu3 %v8855_v44  ;;  %v4108_v31 = vpop.f32.mrf.mxu0  ;;  %v6175_v46 = vld [vmem:[#allocation8 + $0x4e8] sm:$0xf]  ;;  %v8077_v36 = vld [vmem:[#allocation8 + $0x7f4] sm:$0xf0] }
 0x188   :  { %4398 = vmatpush.bf16.msra.mxu3 %v6048_v29  ;;  %v5712_v29 = vor.u32 %v7865_v17, %v5711_v15  ;;  %v4109_v40 = vadd.f32 %v4108_v31, %v4096_v12  ;;  %v6287_v15 = vld [vmem:[#allocation8 + $0x5c8] sm:$0xf]  ;;  %v7981_v31 = vld [vmem:[#allocation8 + $0x4f4] sm:$0xf0] }
 0x189   :  { %4360 = vmatpush.bf16.msrb.mxu0 %v5648_v14  ;;  %4338 = vmatpush.bf16.msra.mxu2 %v7372_v58  ;;  %v4084_v14 = vpop.f32.mrf.mxu2  ;;  %v7929_v58 = vld [vmem:[#allocation8 + $0x354] sm:$0xf0]  ;;  %v6559_v32 = vld [vmem:[#allocation8 + $0x7e8] sm:$0xf] }
 0x18a   :  { %v8901_v12 = vpop.f32.mrf.mxu3  ;;  %v8005_v42 = vld [vmem:[#allocation8 + $0x5b4] sm:$0xf0]  ;;  %v5855_v47 = vld [vmem:[#allocation8 + $0x268] sm:$0xf] }
 0x18b   :  { %4375 = vmatpush.bf16.msra.mxu1 %v5744_v55  ;;  %v8898_v55 = vadd.f32 %v4121_v30, %v4109_v40  ;;  %v7909_v30 = vld [vmem:[#allocation8 + $0x2b4] sm:$0xf0]  ;;  %v6159_v54 = vld [vmem:[#allocation8 + $0x4c8] sm:$0xf] }
 0x18c   :  { %4399 = vmatpush.bf16.msra.mxu3 %v6032_v53  ;;  %v5903_v53 = vld [vmem:[#allocation8 + $0x2c8] sm:$0xf]  ;;  %v5888_v23 = vor.u32 %v7909_v30, %v5887_v6  ;;  %v7973_v30 = vld [vmem:[#allocation8 + $0x4b4] sm:$0xf0] }
 0x18d   :  { %4361 = vmatpush.bf16.msrb.mxu0 %v5632_v63  ;;  %4339 = vmatpush.bf16.msra.mxu2 %v7356_v13  ;;  %v5904_v63 = vor.u32 %v7913_v34, %v5903_v53  ;;  %v6304_v13 = vor.u32 %v8013_v3, %v6303_v1  ;;  %v7901_v53 = vld [vmem:[#allocation8 + $0x274] sm:$0xf0]  ;;  %v6560_v34 = vor.u32 %v8077_v36, %v6559_v32  ;;  %v6143_v6 = vld [vmem:[#allocation8 + $0x4a8] sm:$0xf] }
 0x18e   :  { %v8001_v1 = vld [vmem:[#allocation8 + $0x594] sm:$0xf0]  ;;  %v6527_v25 = vld [vmem:[#allocation8 + $0x7a8] sm:$0xf] }
 0x18f   :  { %4376 = vmatpush.bf16.msra.mxu1 %v5728_v8  ;;  %v5680_v8 = vor.u32 %v7857_v61, %v5679_v60  ;;  %v4110_v17 = vpop.f32.mrf.mxu0  ;;  %v6543_v60 = vld [vmem:[#allocation8 + $0x7c8] sm:$0xf]  ;;  %v8073_v61 = vld [vmem:[#allocation8 + $0x7d4] sm:$0xf0] }
 0x190   :  { %4400 = vmatpush.bf16.msra.mxu3 %v6016_v0  ;;  %v5968_v0 = vor.u32 %v7929_v58, %v5967_v57  ;;  %v8069_v11 = vld [vmem:[#allocation8 + $0x7b4] sm:$0xf0] }
 0x191   :  { %4362 = vmatpush.bf16.msrb.mxu0 %v5616_v18  ;;  %4340 = vmatpush.bf16.msra.mxu2 %v7340_v2  ;;  %v5568_v18 = vor.u32 %v7829_v16, %v5567_v5  ;;  %v6288_v2 = vor.u32 %v8009_v20, %v6287_v15  ;;  %v5839_v5 = vld [vmem:[#allocation8 + $0x248] sm:$0xf]  ;;  %v6544_v16 = vor.u32 %v8073_v61, %v6543_v60  ;;  %v7997_v17 = vld [vmem:[#allocation8 + $0x574] sm:$0xf0] }
 0x192   :  { %v4149_v57 = vpop.f32.mrf.mxu3  ;;  %v6239_v15 = vld [vmem:[#allocation8 + $0x568] sm:$0xf]  ;;  %v6144_v20 = vor.u32 %v7973_v30, %v6143_v6  ;;  %v7961_v30 = vld [vmem:[#allocation8 + $0x454] sm:$0xf0] }
 0x193   :  { %4377 = vmatpush.bf16.msra.mxu1 %v5712_v29  ;;  %v5935_v29 = vld [vmem:[#allocation8 + $0x308] sm:$0xf] }
 0x194   :  { %4401 = vmatpush.bf16.msra.mxu3 %v6000_v10  ;;  %4341 = vmatmul.bf16.vlgmr.msra.gmra.mxu2 %v8859_v45  ;;  %v7825_v10 = vld [vmem:[#allocation8 + $0x14] sm:$0xf0]  ;;  %v5936_v14 = vor.u32 %v7921_v37, %v5935_v29  ;;  %v6127_v29 = vld [vmem:[#allocation8 + $0x488] sm:$0xf] }
 0x195   :  { %4363 = vmatpush.bf16.msrb.mxu0 %v5600_v41  ;;  %4385 = vmatpush.bf16.msrb.mxu2 %v5920_v33  ;;  %v5552_v40 = vor.u32 %v7825_v10, %v5551_v21  ;;  %v5872_v41 = vor.u32 %v7905_v28, %v5871_v27  ;;  %v6271_v33 = vld [vmem:[#allocation8 + $0x5a8] sm:$0xf]  ;;  %v7893_v10 = vld [vmem:[#allocation8 + $0x234] sm:$0xf0]  ;;  %v6528_v28 = vor.u32 %v8069_v11, %v6527_v25 }
 0x196   :  { %v6272_v58 = vor.u32 %v8005_v42, %v6271_v33  ;;  %v5823_v21 = vld [vmem:[#allocation8 + $0x228] sm:$0xf]  ;;  %v7969_v37 = vld [vmem:[#allocation8 + $0x494] sm:$0xf0] }
 0x197   :  { %4378 = vmatpush.bf16.msra.mxu1 %v5696_v56  ;;  %v7977_v56 = vld [vmem:[#allocation8 + $0x4d4] sm:$0xf0]  ;;  %v6128_v42 = vor.u32 %v7969_v37, %v6127_v29  ;;  %v6495_v57 = vld [vmem:[#allocation8 + $0x768] sm:$0xf] }
 0x198   :  { %4402 = vmatpush.bf16.msra.mxu3 %v5984_v62  ;;  %v6176_v62 = vor.u32 %v7981_v31, %v6175_v46  ;;  %v6160_v3 = vor.u32 %v7977_v56, %v6159_v54  ;;  %v6240_v46 = vor.u32 %v7997_v17, %v6239_v15  ;;  %v6511_v31 = vld [vmem:[#allocation8 + $0x788] sm:$0xf]  ;;  %v7993_v33 = vld [vmem:[#allocation8 + $0x554] sm:$0xf0] }
 0x199   :  { %4364 = vmatpush.bf16.msrb.mxu0 %v5584_v52  ;;  %4386 = vmatpush.bf16.msrb.mxu2 %v5904_v63  ;;  %v5856_v52 = vor.u32 %v7901_v53, %v5855_v47  ;;  %v6255_v63 = vld [vmem:[#allocation8 + $0x588] sm:$0xf]  ;;  %v7965_v53 = vld [vmem:[#allocation8 + $0x474] sm:$0xf0] }
 0x19a   :  { %v8045_v54 = vld [vmem:[#allocation8 + $0x6f4] sm:$0xf0]  ;;  %v6207_v61 = vld [vmem:[#allocation8 + $0x528] sm:$0xf] }
 0x19b   :  { %4379 = vmatpush.bf16.msra.mxu1 %v5680_v8  ;;  %v6256_v8 = vor.u32 %v8001_v1, %v6255_v63  ;;  %v4173_v27 = vpop.f32.mrf.mxu1  ;;  %v8041_v25 = vld [vmem:[#allocation8 + $0x6d4] sm:$0xf0] }
 0x19c   :  { %4403 = vmatpush.bf16.msra.mxu3 %v5968_v0  ;;  %v7897_v0 = vld [vmem:[#allocation8 + $0x254] sm:$0xf0] }
 0x19d   :  { %4365 = vmatpush.bf16.msrb.mxu0 %v5568_v18  ;;  %4387 = vmatpush.bf16.msrb.mxu2 %v5888_v23  ;;  %v1372_v18 = vperm.slane %v8867_v39, 2  ;;  %v4134_v23 = vpop.f32.mrf.mxu2  ;;  %v8057_v15 = vld [vmem:[#allocation8 + $0x754] sm:$0xf0] }
 0x19e   :  { %4380 = vmatmul.bf16.vlgmr.msra.gmra.mxu1 %v8788_v19  ;;  %v7957_v37 = vld [vmem:[#allocation8 + $0x434] sm:$0xf0] }
 0x19f   :  { %4424 = vmatpush.bf16.msrb.mxu1 %v6304_v13  ;;  %v5840_v13 = vor.u32 %v7897_v0, %v5839_v5  ;;  %v1380_v36 = vperm.slane %v1372_v18, 0  ;;  %v6095_v5 = vld [vmem:[#allocation8 + $0x448] sm:$0xf] }
 0x1a0   :  { %4404 = vmatpush.bf16.msra.mxu3 %v5952_v26  ;;  %v4135_v26 = vadd.f32 %v4134_v23, %v8898_v55  ;;  %v5807_v55 = vld [vmem:[#allocation8 + $0x208] sm:$0xf]  ;;  %v7985_v23 = vld [vmem:[#allocation8 + $0x514] sm:$0xf0] }
 0x1a1   :  { %4366 = vmatpush.bf16.msrb.mxu0 %v5552_v40  ;;  %4388 = vmatpush.bf16.msrb.mxu2 %v5872_v41  ;;  %v5824_v40 = vor.u32 %v7893_v10, %v5823_v21  ;;  %v6223_v41 = vld [vmem:[#allocation8 + $0x548] sm:$0xf] }
 0x1a2   :  { %v8909_v32 = vadd.f32 %v8901_v12, %v4135_v26  ;;  %v6224_v56 = vor.u32 %v7993_v33, %v6223_v41  ;;  %v8061_v12 = vld [vmem:[#allocation8 + $0x774] sm:$0xf0]  ;;  %v6191_v18 = vld [vmem:[#allocation8 + $0x508] sm:$0xf] }
 0x1a3   :  { %4425 = vmatpush.bf16.msrb.mxu1 %v6288_v2  ;;  %v8065_v2 = vld [vmem:[#allocation8 + $0x794] sm:$0xf0]  ;;  %v6496_v6 = vor.u32 %v8061_v12, %v6495_v57  ;;  %v6815_v10 = vld [vmem:[#allocation8 + $0x9e8] sm:$0xf] }
 0x1a4   :  { %4405 = vmatpush.bf16.msra.mxu3 %v5936_v14  ;;  %4367 = vmatmul.bf16.vlgmr.msrb.gmra.mxu0 %v8794_v38  ;;  %v7889_v14 = vld [vmem:[#allocation8 + $0x214] sm:$0xf0]  ;;  %v6512_v47 = vor.u32 %v8065_v2, %v6511_v31  ;;  %v6447_v57 = vld [vmem:[#allocation8 + $0x708] sm:$0xf] }
 0x1a5   :  { %4411 = vmatpush.bf16.msra.mxu0 %v6176_v62  ;;  %4389 = vmatpush.bf16.msrb.mxu2 %v5856_v52  ;;  %v6111_v62 = vld [vmem:[#allocation8 + $0x468] sm:$0xf]  ;;  %v5808_v60 = vor.u32 %v7889_v14, %v5807_v55  ;;  %v7989_v52 = vld [vmem:[#allocation8 + $0x534] sm:$0xf0]  ;;  %v4136_v0 = vpop.f32.mrf.mxu2 }
 0x1a6   :  { %v6112_v1 = vor.u32 %v7965_v53, %v6111_v62  ;;  %v6208_v11 = vor.u32 %v7989_v52, %v6207_v61  ;;  %v8141_v26 = vld [vmem:[#allocation8 + $0x9f4] sm:$0xf0]  ;;  %v7071_v52 = vld [vmem:[#allocation8 + $0xbe8] sm:$0xf] }
 0x1a7   :  { %4426 = vmatpush.bf16.msrb.mxu1 %v6272_v58  ;;  %4406 = vmatmul.bf16.vlgmr.msra.gmra.mxu3 %v8797_v43  ;;  %v4160_v58 = vpop.f32.mrf.mxu0  ;;  %v8037_v31 = vld [vmem:[#allocation8 + $0x6b4] sm:$0xf0]  ;;  %v6816_v33 = vor.u32 %v8141_v26, %v6815_v10  ;;  %v6767_v10 = vld [vmem:[#allocation8 + $0x988] sm:$0xf] }
 0x1a8   :  { %4450 = vmatpush.bf16.msrb.mxu3 %v6560_v34  ;;  %v6431_v34 = vld [vmem:[#allocation8 + $0x6e8] sm:$0xf]  ;;  %v4161_v63 = vadd.f32 %v4160_v58, %v1380_v36  ;;  %v8137_v62 = vld [vmem:[#allocation8 + $0x9d4] sm:$0xf0] }
 0x1a9   :  { %4412 = vmatpush.bf16.msra.mxu0 %v6160_v3  ;;  %4390 = vmatpush.bf16.msrb.mxu2 %v5840_v13  ;;  %v6432_v3 = vor.u32 %v8045_v54, %v6431_v34  ;;  %v6479_v13 = vld [vmem:[#allocation8 + $0x748] sm:$0xf]  ;;  %v7953_v53 = vld [vmem:[#allocation8 + $0x414] sm:$0xf0] }
 0x1aa   :  { %v8911_v17 = vadd.f32 %v4173_v27, %v4161_v63  ;;  %v6480_v29 = vor.u32 %v8057_v15, %v6479_v13  ;;  %v8913_v2 = vpop.f32.mrf.mxu3  ;;  %v6192_v27 = vor.u32 %v7985_v23, %v6191_v18  ;;  %v6463_v36 = vld [vmem:[#allocation8 + $0x728] sm:$0xf]  ;;  %v8049_v12 = vld [vmem:[#allocation8 + $0x714] sm:$0xf0] }
 0x1ab   :  { %4427 = vmatpush.bf16.msrb.mxu1 %v6256_v8  ;;  %v6415_v8 = vld [vmem:[#allocation8 + $0x6c8] sm:$0xf]  ;;  %v8205_v63 = vld [vmem:[#allocation8 + $0xbf4] sm:$0xf0] }
 0x1ac   :  { %4451 = vmatpush.bf16.msrb.mxu3 %v6544_v16  ;;  %v4175_v16 = vpop.f32.mrf.mxu1  ;;  %v6416_v21 = vor.u32 %v8041_v25, %v6415_v8  ;;  %v6383_v54 = vld [vmem:[#allocation8 + $0x688] sm:$0xf]  ;;  %v8133_v0 = vld [vmem:[#allocation8 + $0x9b4] sm:$0xf0] }
 0x1ad   :  { %4413 = vmatpush.bf16.msra.mxu0 %v6144_v20  ;;  %4391 = vmatpush.bf16.msrb.mxu2 %v5824_v40  ;;  %v6096_v20 = vor.u32 %v7961_v30, %v6095_v5  ;;  %v8053_v40 = vld [vmem:[#allocation8 + $0x734] sm:$0xf0]  ;;  %v6687_v58 = vld [vmem:[#allocation8 + $0x8e8] sm:$0xf]  ;;  %v6448_v16 = vor.u32 %v8049_v12, %v6447_v57 }
 0x1ae   :  { %v6464_v34 = vor.u32 %v8053_v40, %v6463_v36  ;;  %v6783_v5 = vld [vmem:[#allocation8 + $0x9a8] sm:$0xf]  ;;  %v8029_v8 = vld [vmem:[#allocation8 + $0x674] sm:$0xf0] }
 0x1af   :  { %4428 = vmatpush.bf16.msrb.mxu1 %v6240_v46  ;;  %v6399_v46 = vld [vmem:[#allocation8 + $0x6a8] sm:$0xf]  ;;  %v4162_v41 = vpop.f32.mrf.mxu0  ;;  %v8105_v15 = vld [vmem:[#allocation8 + $0x8d4] sm:$0xf0]  ;;  %v6784_v18 = vor.u32 %v8133_v0, %v6783_v5 }
 0x1b0   :  { %4452 = vmatpush.bf16.msrb.mxu3 %v6528_v28  ;;  %v6079_v28 = vld [vmem:[#allocation8 + $0x428] sm:$0xf]  ;;  %v6400_v14 = vor.u32 %v8037_v31, %v6399_v46  ;;  %v8129_v26 = vld [vmem:[#allocation8 + $0x994] sm:$0xf0] }
 0x1b1   :  { %4414 = vmatpush.bf16.msra.mxu0 %v6128_v42  ;;  %4392 = vmatpush.bf16.msrb.mxu2 %v5808_v60  ;;  %v6799_v42 = vld [vmem:[#allocation8 + $0x9c8] sm:$0xf]  ;;  %v6080_v55 = vor.u32 %v7957_v37, %v6079_v28  ;;  %v8109_v60 = vld [vmem:[#allocation8 + $0x8f4] sm:$0xf0]  ;;  %v6768_v36 = vor.u32 %v8129_v26, %v6767_v10 }
 0x1b2   :  { %v6800_v61 = vor.u32 %v8137_v62, %v6799_v42  ;;  %v6367_v30 = vld [vmem:[#allocation8 + $0x668] sm:$0xf]  ;;  %v4201_v25 = vpop.f32.mrf.mxu3  ;;  %v8025_v37 = vld [vmem:[#allocation8 + $0x654] sm:$0xf0] }
 0x1b3   :  { %4429 = vmatpush.bf16.msrb.mxu1 %v6224_v56  ;;  %v8033_v56 = vld [vmem:[#allocation8 + $0x694] sm:$0xf0]  ;;  %v6671_v13 = vld [vmem:[#allocation8 + $0x8c8] sm:$0xf] }
 0x1b4   :  { %4453 = vmatpush.bf16.msrb.mxu3 %v6512_v47  ;;  %4393 = vmatmul.bf16.vlgmr.msrb.gmra.mxu2 %v8812_v48  ;;  %v6063_v47 = vld [vmem:[#allocation8 + $0x408] sm:$0xf]  ;;  %v6672_v28 = vor.u32 %v8105_v15, %v6671_v13  ;;  %v8197_v41 = vld [vmem:[#allocation8 + $0xbb4] sm:$0xf0] }
 0x1b5   :  { %4415 = vmatpush.bf16.msra.mxu0 %v6112_v1  ;;  %4437 = vmatpush.bf16.msra.mxu2 %v6432_v3  ;;  %v6064_v1 = vor.u32 %v7953_v53, %v6063_v47  ;;  %v6384_v3 = vor.u32 %v8033_v56, %v6383_v54  ;;  %v7055_v23 = vld [vmem:[#allocation8 + $0xbc8] sm:$0xf]  ;;  %v8021_v53 = vld [vmem:[#allocation8 + $0x634] sm:$0xf0] }
 0x1b6   :  { %v6655_v31 = vld [vmem:[#allocation8 + $0x8a8] sm:$0xf]  ;;  %v8097_v12 = vld [vmem:[#allocation8 + $0x894] sm:$0xf0] }
 0x1b7   :  { %4430 = vmatpush.bf16.msrb.mxu1 %v6208_v11  ;;  %v7072_v11 = vor.u32 %v8205_v63, %v7071_v52  ;;  %v7039_v40 = vld [vmem:[#allocation8 + $0xba8] sm:$0xf]  ;;  %v8173_v25 = vld [vmem:[#allocation8 + $0xaf4] sm:$0xf0] }
 0x1b8   :  { %4454 = vmatpush.bf16.msrb.mxu3 %v6496_v6  ;;  %v6688_v6 = vor.u32 %v8109_v60, %v6687_v58  ;;  %v6751_v42 = vld [vmem:[#allocation8 + $0x968] sm:$0xf]  ;;  %v7040_v56 = vor.u32 %v8197_v41, %v7039_v40  ;;  %v8189_v15 = vld [vmem:[#allocation8 + $0xb74] sm:$0xf0] }
 0x1b9   :  { %4416 = vmatpush.bf16.msra.mxu0 %v6096_v20  ;;  %4438 = vmatpush.bf16.msra.mxu2 %v6416_v21  ;;  %v8201_v20 = vld [vmem:[#allocation8 + $0xbd4] sm:$0xf0]  ;;  %v6368_v21 = vor.u32 %v8029_v8, %v6367_v30  ;;  %v6335_v47 = vld [vmem:[#allocation8 + $0x628] sm:$0xf] }
 0x1ba   :  { %v7056_v46 = vor.u32 %v8201_v20, %v7055_v23  ;;  %v6639_v57 = vld [vmem:[#allocation8 + $0x888] sm:$0xf]  ;;  %v6336_v63 = vor.u32 %v8021_v53, %v6335_v47  ;;  %v8093_v30 = vld [vmem:[#allocation8 + $0x874] sm:$0xf0] }
 0x1bb   :  { %4431 = vmatpush.bf16.msrb.mxu1 %v6192_v27  ;;  %v8101_v27 = vld [vmem:[#allocation8 + $0x8b4] sm:$0xf0]  ;;  %v4225_v54 = vpop.f32.mrf.mxu1  ;;  %v7023_v60 = vld [vmem:[#allocation8 + $0xb88] sm:$0xf]  ;;  %v6640_v5 = vor.u32 %v8097_v12, %v6639_v57 }
 0x1bc   :  { %4455 = vmatpush.bf16.msrb.mxu3 %v6480_v29  ;;  %v6351_v29 = vld [vmem:[#allocation8 + $0x648] sm:$0xf]  ;;  %v6656_v62 = vor.u32 %v8101_v27, %v6655_v31  ;;  %v8117_v20 = vld [vmem:[#allocation8 + $0x934] sm:$0xf0] }
 0x1bd   :  { %4417 = vmatpush.bf16.msra.mxu0 %v6080_v55  ;;  %4439 = vmatpush.bf16.msra.mxu2 %v6400_v14  ;;  %v8125_v55 = vld [vmem:[#allocation8 + $0x974] sm:$0xf0]  ;;  %v4186_v14 = vpop.f32.mrf.mxu2  ;;  %v6319_v0 = vld [vmem:[#allocation8 + $0x608] sm:$0xf] }
 0x1be   :  { %4432 = vmatmul.bf16.vlgmr.msrb.gmra.mxu1 %v8805_v24  ;;  %v6752_v58 = vor.u32 %v8125_v55, %v6751_v42  ;;  %v6943_v8 = vld [vmem:[#allocation8 + $0xae8] sm:$0xf]  ;;  %v8089_v31 = vld [vmem:[#allocation8 + $0x854] sm:$0xf0] }
 0x1bf   :  { %4476 = vmatpush.bf16.msra.mxu1 %v6816_v33  ;;  %v6352_v33 = vor.u32 %v8025_v37, %v6351_v29  ;;  %v7007_v13 = vld [vmem:[#allocation8 + $0xb68] sm:$0xf]  ;;  %v8085_v12 = vld [vmem:[#allocation8 + $0x834] sm:$0xf0] }
 0x1c0   :  { %4456 = vmatpush.bf16.msrb.mxu3 %v6464_v34  ;;  %v4187_v34 = vadd.f32 %v4186_v14, %v8911_v17  ;;  %v6623_v17 = vld [vmem:[#allocation8 + $0x868] sm:$0xf]  ;;  %v8113_v14 = vld [vmem:[#allocation8 + $0x914] sm:$0xf0] }
 0x1c1   :  { %4418 = vmatpush.bf16.msra.mxu0 %v6064_v1  ;;  %4440 = vmatpush.bf16.msra.mxu2 %v6384_v3  ;;  %v6735_v1 = vld [vmem:[#allocation8 + $0x948] sm:$0xf]  ;;  %v8121_v3 = vld [vmem:[#allocation8 + $0x954] sm:$0xf0]  ;;  %v6624_v26 = vor.u32 %v8093_v30, %v6623_v17 }
 0x1c2   :  { %v4200_v52 = vadd.f32 %v8913_v2, %v4187_v34  ;;  %v6719_v23 = vld [vmem:[#allocation8 + $0x928] sm:$0xf]  ;;  %v8269_v34 = vld [vmem:[#allocation8 + $0xdf4] sm:$0xf0] }
 0x1c3   :  { %4477 = vmatpush.bf16.msra.mxu1 %v6800_v61  ;;  %v8193_v61 = vld [vmem:[#allocation8 + $0xb94] sm:$0xf0]  ;;  %v6607_v29 = vld [vmem:[#allocation8 + $0x848] sm:$0xf]  ;;  %v4227_v37 = vpop.f32.mrf.mxu1  ;;  %v6720_v40 = vor.u32 %v8117_v20, %v6719_v23 }
 0x1c4   :  { %4457 = vmatpush.bf16.msrb.mxu3 %v6448_v16  ;;  %4419 = vmatmul.bf16.vlgmr.msra.gmra.mxu0 %v8814_v49  ;;  %v8017_v16 = vld [vmem:[#allocation8 + $0x614] sm:$0xf0]  ;;  %v6927_v27 = vld [vmem:[#allocation8 + $0xac8] sm:$0xf] }
 0x1c5   :  { %4463 = vmatpush.bf16.msrb.mxu0 %v6688_v6  ;;  %4441 = vmatpush.bf16.msra.mxu2 %v6368_v21  ;;  %v7024_v6 = vor.u32 %v8193_v61, %v7023_v60  ;;  %v6320_v2 = vor.u32 %v8017_v16, %v6319_v0  ;;  %v4188_v10 = vpop.f32.mrf.mxu2  ;;  %v6991_v41 = vld [vmem:[#allocation8 + $0xb48] sm:$0xf]  ;;  %v8165_v60 = vld [vmem:[#allocation8 + $0xab4] sm:$0xf0] }
 0x1c6   :  { %v6703_v55 = vld [vmem:[#allocation8 + $0x908] sm:$0xf]  ;;  %v8265_v17 = vld [vmem:[#allocation8 + $0xdd4] sm:$0xf0] }
 0x1c7   :  { %4478 = vmatpush.bf16.msra.mxu1 %v6784_v18  ;;  %4458 = vmatmul.bf16.vlgmr.msrb.gmra.mxu3 %v8818_v59  ;;  %v4212_v18 = vpop.f32.mrf.mxu0  ;;  %v7327_v53 = vld [vmem:[#allocation8 + $0xde8] sm:$0xf]  ;;  %v8081_v30 = vld [vmem:[#allocation8 + $0x814] sm:$0xf0] }
 0x1c8   :  { %4502 = vmatpush.bf16.msra.mxu3 %v7072_v11  ;;  %v6736_v11 = vor.u32 %v8121_v3, %v6735_v1  ;;  %v4213_v21 = vadd.f32 %v4212_v18, %v4200_v52  ;;  %v6975_v52 = vld [vmem:[#allocation8 + $0xb28] sm:$0xf]  ;;  %v7328_v3 = vor.u32 %v8269_v34, %v7327_v53  ;;  %v8257_v34 = vld [vmem:[#allocation8 + $0xd94] sm:$0xf0] }
 0x1c9   :  { %4464 = vmatpush.bf16.msrb.mxu0 %v6672_v28  ;;  %4442 = vmatpush.bf16.msra.mxu2 %v6352_v33  ;;  %v6944_v28 = vor.u32 %v8173_v25, %v6943_v8  ;;  %v8185_v33 = vld [vmem:[#allocation8 + $0xb54] sm:$0xf0]  ;;  %v6895_v25 = vld [vmem:[#allocation8 + $0xa88] sm:$0xf] }
 0x1ca   :  { %v8921_v42 = vadd.f32 %v4225_v54, %v4213_v21  ;;  %v6992_v57 = vor.u32 %v8185_v33, %v6991_v41  ;;  %v8923_v61 = vpop.f32.mrf.mxu3  ;;  %v6704_v54 = vor.u32 %v8113_v14, %v6703_v55  ;;  %v7199_v18 = vld [vmem:[#allocation8 + $0xce8] sm:$0xf]  ;;  %v8333_v21 = vld [vmem:[#allocation8 + $0xff4] sm:$0xf0] }
 0x1cb   :  { %4479 = vmatpush.bf16.msra.mxu1 %v6768_v36  ;;  %v8169_v36 = vld [vmem:[#allocation8 + $0xad4] sm:$0xf0]  ;;  %v7583_v20 = vld [vmem:[#allocation8 + $0xfe8] sm:$0xf] }
 0x1cc   :  { %4503 = vmatpush.bf16.msra.mxu3 %v7056_v46  ;;  %v7008_v46 = vor.u32 %v8189_v15, %v7007_v13  ;;  %v6928_v47 = vor.u32 %v8169_v36, %v6927_v27  ;;  %v6959_v13 = vld [vmem:[#allocation8 + $0xb08] sm:$0xf]  ;;  %v8177_v15 = vld [vmem:[#allocation8 + $0xb14] sm:$0xf0] }
 0x1cd   :  { %4465 = vmatpush.bf16.msrb.mxu0 %v6656_v62  ;;  %4443 = vmatpush.bf16.msra.mxu2 %v6336_v63  ;;  %v6608_v62 = vor.u32 %v8089_v31, %v6607_v29  ;;  %v8181_v63 = vld [vmem:[#allocation8 + $0xb34] sm:$0xf0]  ;;  %v6960_v37 = vor.u32 %v8177_v15, %v6959_v13  ;;  %v6879_v31 = vld [vmem:[#allocation8 + $0xa68] sm:$0xf] }
 0x1ce   :  { %v6976_v8 = vor.u32 %v8181_v63, %v6975_v52  ;;  %v8261_v29 = vld [vmem:[#allocation8 + $0xdb4] sm:$0xf0]  ;;  %v7183_v41 = vld [vmem:[#allocation8 + $0xcc8] sm:$0xf] }
 0x1cf   :  { %4480 = vmatpush.bf16.msra.mxu1 %v6752_v58  ;;  %v6911_v58 = vld [vmem:[#allocation8 + $0xaa8] sm:$0xf]  ;;  %v4214_v1 = vpop.f32.mrf.mxu0  ;;  %v8157_v27 = vld [vmem:[#allocation8 + $0xa74] sm:$0xf0] }
 0x1d0   :  { %4504 = vmatpush.bf16.msra.mxu3 %v7040_v56  ;;  %v6591_v56 = vld [vmem:[#allocation8 + $0x828] sm:$0xf]  ;;  %v6912_v16 = vor.u32 %v8165_v60, %v6911_v58  ;;  %v8233_v33 = vld [vmem:[#allocation8 + $0xcd4] sm:$0xf0] }
 0x1d1   :  { %4466 = vmatpush.bf16.msrb.mxu0 %v6640_v5  ;;  %4444 = vmatpush.bf16.msra.mxu2 %v6320_v2  ;;  %v7311_v5 = vld [vmem:[#allocation8 + $0xdc8] sm:$0xf]  ;;  %v6592_v0 = vor.u32 %v8085_v12, %v6591_v56  ;;  %v8237_v2 = vld [vmem:[#allocation8 + $0xcf4] sm:$0xf0]  ;;  %v7184_v56 = vor.u32 %v8233_v33, %v7183_v41 }
 0x1d2   :  { %v7312_v23 = vor.u32 %v8265_v17, %v7311_v5  ;;  %v4253_v36 = vpop.f32.mrf.mxu3  ;;  %v7567_v14 = vld [vmem:[#allocation8 + $0xfc8] sm:$0xf]  ;;  %v8153_v12 = vld [vmem:[#allocation8 + $0xa54] sm:$0xf0] }
 0x1d3   :  { %4481 = vmatpush.bf16.msra.mxu1 %v6736_v11  ;;  %v8161_v11 = vld [vmem:[#allocation8 + $0xa94] sm:$0xf0]  ;;  %v7279_v53 = vld [vmem:[#allocation8 + $0xd88] sm:$0xf] }
 0x1d4   :  { %4505 = vmatpush.bf16.msra.mxu3 %v7024_v6  ;;  %4445 = vmatmul.bf16.vlgmr.msra.gmra.mxu2 %v8827_v7  ;;  %v6575_v6 = vld [vmem:[#allocation8 + $0x808] sm:$0xf]  ;;  %v7280_v52 = vor.u32 %v8257_v34, %v7279_v53  ;;  %v8325_v1 = vld [vmem:[#allocation8 + $0xfb4] sm:$0xf0] }
 0x1d5   :  { %4467 = vmatpush.bf16.msrb.mxu0 %v6624_v26  ;;  %4489 = vmatpush.bf16.msrb.mxu2 %v6944_v28  ;;  %v6576_v10 = vor.u32 %v8081_v30, %v6575_v6  ;;  %v6896_v26 = vor.u32 %v8161_v11, %v6895_v25  ;;  %v7295_v28 = vld [vmem:[#allocation8 + $0xda8] sm:$0xf]  ;;  %v8149_v30 = vld [vmem:[#allocation8 + $0xa34] sm:$0xf0] }
 0x1d6   :  { %v7296_v55 = vor.u32 %v8261_v29, %v7295_v28  ;;  %v7167_v60 = vld [vmem:[#allocation8 + $0xca8] sm:$0xf]  ;;  %v8225_v15 = vld [vmem:[#allocation8 + $0xc94] sm:$0xf0] }
 0x1d7   :  { %4482 = vmatpush.bf16.msra.mxu1 %v6720_v40  ;;  %v7584_v40 = vor.u32 %v8333_v21, %v7583_v20  ;;  %v7551_v63 = vld [vmem:[#allocation8 + $0xfa8] sm:$0xf]  ;;  %v8301_v36 = vld [vmem:[#allocation8 + $0xef4] sm:$0xf0] }
 0x1d8   :  { %4506 = vmatpush.bf16.msra.mxu3 %v7008_v46  ;;  %v7200_v46 = vor.u32 %v8237_v2, %v7199_v18  ;;  %v7263_v5 = vld [vmem:[#allocation8 + $0xd68] sm:$0xf]  ;;  %v7552_v11 = vor.u32 %v8325_v1, %v7551_v63  ;;  %v8317_v33 = vld [vmem:[#allocation8 + $0xf74] sm:$0xf0] }
 0x1d9   :  { %4468 = vmatpush.bf16.msrb.mxu0 %v6608_v62  ;;  %4490 = vmatpush.bf16.msrb.mxu2 %v6928_v47  ;;  %v8329_v62 = vld [vmem:[#allocation8 + $0xfd4] sm:$0xf0]  ;;  %v6880_v47 = vor.u32 %v8157_v27, %v6879_v31  ;;  %v6847_v6 = vld [vmem:[#allocation8 + $0xa28] sm:$0xf] }
 0x1da   :  { %v7568_v58 = vor.u32 %v8329_v62, %v7567_v14  ;;  %v7151_v13 = vld [vmem:[#allocation8 + $0xc88] sm:$0xf]  ;;  %v6848_v21 = vor.u32 %v8149_v30, %v6847_v6  ;;  %v8221_v31 = vld [vmem:[#allocation8 + $0xc74] sm:$0xf0]  ;;  %v7883_v30 = vld [vmem:[#allocation8 + $0x1ec] sm:$0xf] }
 0x1db   :  { %4483 = vmatpush.bf16.msra.mxu1 %v6704_v54  ;;  %v8229_v54 = vld [vmem:[#allocation8 + $0xcb4] sm:$0xf0]  ;;  %v4277_v25 = vpop.f32.mrf.mxu1  ;;  %v7535_v2 = vld [vmem:[#allocation8 + $0xf88] sm:$0xf]  ;;  %v7152_v28 = vor.u32 %v8225_v15, %v7151_v13 }
 0x1dc   :  { %4507 = vmatpush.bf16.msra.mxu3 %v6992_v57  ;;  %v6863_v57 = vld [vmem:[#allocation8 + $0xa48] sm:$0xf]  ;;  %v7168_v17 = vor.u32 %v8229_v54, %v7167_v60  ;;  %v8245_v62 = vld [vmem:[#allocation8 + $0xd34] sm:$0xf0] }
 0x1dd   :  { %4469 = vmatpush.bf16.msrb.mxu0 %v6592_v0  ;;  %4491 = vmatpush.bf16.msrb.mxu2 %v6912_v16  ;;  %v8253_v0 = vld [vmem:[#allocation8 + $0xd74] sm:$0xf0]  ;;  %v4238_v16 = vpop.f32.mrf.mxu2  ;;  %v6831_v29 = vld [vmem:[#allocation8 + $0xa08] sm:$0xf] }
 0x1de   :  { %4484 = vmatmul.bf16.vlgmr.msra.gmra.mxu1 %v8824_v51  ;;  %v7264_v18 = vor.u32 %v8253_v0, %v7263_v5  ;;  %v7455_v27 = vld [vmem:[#allocation8 + $0xee8] sm:$0xf]  ;;  %v8217_v60 = vld [vmem:[#allocation8 + $0xc54] sm:$0xf0] }
 0x1df   :  { %4528 = vmatpush.bf16.msrb.mxu1 %v7328_v3  ;;  %v6864_v3 = vor.u32 %v8153_v12, %v6863_v57  ;;  %v7519_v41 = vld [vmem:[#allocation8 + $0xf68] sm:$0xf]  ;;  %v8213_v15 = vld [vmem:[#allocation8 + $0xc34] sm:$0xf0] }
 0x1e0   :  { %4508 = vmatpush.bf16.msra.mxu3 %v6976_v8  ;;  %v4239_v8 = vadd.f32 %v4238_v16, %v8921_v42  ;;  %v7135_v42 = vld [vmem:[#allocation8 + $0xc68] sm:$0xf]  ;;  %v8241_v16 = vld [vmem:[#allocation8 + $0xd14] sm:$0xf0] }
 0x1e1   :  { %4470 = vmatpush.bf16.msrb.mxu0 %v6576_v10  ;;  %4492 = vmatpush.bf16.msrb.mxu2 %v6896_v26  ;;  %v7247_v10 = vld [vmem:[#allocation8 + $0xd48] sm:$0xf]  ;;  %v8249_v26 = vld [vmem:[#allocation8 + $0xd54] sm:$0xf0]  ;;  %v7136_v34 = vor.u32 %v8221_v31, %v7135_v42  ;;  %v5777_v42 = vld [vmem:[#allocation8 + $0x1d8] sm:$0xf0] }
 0x1e2   :  { %v4252_v20 = vadd.f32 %v8923_v61, %v4239_v8  ;;  %v7231_v14 = vld [vmem:[#allocation8 + $0xd28] sm:$0xf]  ;;  %v5793_v8 = vld [vmem:[#allocation8 + $0x1f8] sm:$0xf0]  ;;  %v8209_v31 = vld [vmem:[#allocation8 + $0xc14] sm:$0xf0] }
 0x1e3   :  { %4529 = vmatpush.bf16.msrb.mxu1 %v7312_v23  ;;  %v8321_v23 = vld [vmem:[#allocation8 + $0xf94] sm:$0xf0]  ;;  %v7119_v57 = vld [vmem:[#allocation8 + $0xc48] sm:$0xf]  ;;  %v4279_v12 = vpop.f32.mrf.mxu1  ;;  %v7232_v63 = vor.u32 %v8245_v62, %v7231_v14  ;;  %v7947_v62 = vld [vmem:[#allocation8 + $0x3ec] sm:$0xf] }
 0x1e4   :  { %4509 = vmatpush.bf16.msra.mxu3 %v6960_v37  ;;  %4471 = vmatmul.bf16.vlgmr.msrb.gmra.mxu0 %v8829_v9  ;;  %v8145_v37 = vld [vmem:[#allocation8 + $0xa14] sm:$0xf0]  ;;  %v7439_v54 = vld [vmem:[#allocation8 + $0xec8] sm:$0xf] }
 0x1e5   :  { %4515 = vmatpush.bf16.msra.mxu0 %v7200_v46  ;;  %4493 = vmatpush.bf16.msrb.mxu2 %v6880_v47  ;;  %v7536_v46 = vor.u32 %v8321_v23, %v7535_v2  ;;  %v6832_v61 = vor.u32 %v8145_v37, %v6831_v29  ;;  %v4240_v53 = vpop.f32.mrf.mxu2  ;;  %v7503_v1 = vld [vmem:[#allocation8 + $0xf48] sm:$0xf]  ;;  %v8293_v2 = vld [vmem:[#allocation8 + $0xeb4] sm:$0xf0] }
 0x1e6   :  { %v7215_v0 = vld [vmem:[#allocation8 + $0xd08] sm:$0xf] }
 0x1e7   :  { %4530 = vmatpush.bf16.msrb.mxu1 %v7296_v55  ;;  %4510 = vmatmul.bf16.vlgmr.msra.gmra.mxu3 %v8832_v22  ;;  %v4264_v55 = vpop.f32.mrf.mxu0 }
 0x1e8   :  { %4554 = vmatpush.bf16.msrb.mxu3 %v7584_v40  ;;  %v7248_v40 = vor.u32 %v8249_v26, %v7247_v10  ;;  %v4265_v47 = vadd.f32 %v4264_v55, %v4252_v20  ;;  %v7487_v20 = vld [vmem:[#allocation8 + $0xf28] sm:$0xf]  ;;  %v5796_v26 = vor.u32 %v7883_v30, %v5793_v8  ;;  %v7851_v55 = vld [vmem:[#allocation8 + $0xec] sm:$0xf]  ;;  %v5745_v8 = vld [vmem:[#allocation8 + $0x198] sm:$0xf0] }
 0x1e9   :  { %4516 = vmatpush.bf16.msra.mxu0 %v7184_v56  ;;  %4494 = vmatpush.bf16.msrb.mxu2 %v6864_v3  ;;  %v7456_v56 = vor.u32 %v8301_v36, %v7455_v27  ;;  %v8313_v3 = vld [vmem:[#allocation8 + $0xf54] sm:$0xf0]  ;;  %v7407_v36 = vld [vmem:[#allocation8 + $0xe88] sm:$0xf]  ;;  %v7871_v30 = vld [vmem:[#allocation8 + $0x18c] sm:$0xf] }
 0x1ea   :  { %v8931_v5 = vadd.f32 %v4277_v25, %v4265_v47  ;;  %v7504_v13 = vor.u32 %v8313_v3, %v7503_v1  ;;  %v8933_v23 = vpop.f32.mrf.mxu3  ;;  %v7216_v25 = vor.u32 %v8241_v16, %v7215_v0  ;;  %v6049_v47 = vld [vmem:[#allocation8 + $0x3f8] sm:$0xf0]  ;;  %v7847_v1 = vld [vmem:[#allocation8 + $0xcc] sm:$0xf] }
 0x1eb   :  { %4531 = vmatpush.bf16.msrb.mxu1 %v7280_v52  ;;  %v8297_v52 = vld [vmem:[#allocation8 + $0xed4] sm:$0xf0]  ;;  %v5649_v3 = vld [vmem:[#allocation8 + $0xd8] sm:$0xf0]  ;;  %v7943_v16 = vld [vmem:[#allocation8 + $0x3cc] sm:$0xf] }
 0x1ec   :  { %4555 = vmatpush.bf16.msrb.mxu3 %v7568_v58  ;;  %v7520_v58 = vor.u32 %v8317_v33, %v7519_v41  ;;  %v7440_v6 = vor.u32 %v8297_v52, %v7439_v54  ;;  %v7471_v41 = vld [vmem:[#allocation8 + $0xf08] sm:$0xf]  ;;  %v8305_v33 = vld [vmem:[#allocation8 + $0xf14] sm:$0xf0] }
 0x1ed   :  { %4517 = vmatpush.bf16.msra.mxu0 %v7168_v17  ;;  %4495 = vmatpush.bf16.msrb.mxu2 %v6848_v21  ;;  %v7120_v17 = vor.u32 %v8217_v60, %v7119_v57  ;;  %v8309_v21 = vld [vmem:[#allocation8 + $0xf34] sm:$0xf0]  ;;  %v5761_v57 = vld [vmem:[#allocation8 + $0x1b8] sm:$0xf0]  ;;  %v7472_v12 = vor.u32 %v8305_v33, %v7471_v41  ;;  %v7391_v60 = vld [vmem:[#allocation8 + $0xe68] sm:$0xf] }
 0x1ee   :  { %v7488_v27 = vor.u32 %v8309_v21, %v7487_v20  ;;  %v8285_v54 = vld [vmem:[#allocation8 + $0xe74] sm:$0xf0]  ;;  %v5748_v20 = vor.u32 %v7871_v30, %v5745_v8  ;;  %v7939_v21 = vld [vmem:[#allocation8 + $0x3ac] sm:$0xf]  ;;  %v5617_v33 = vld [vmem:[#allocation8 + $0x98] sm:$0xf0] }
 0x1ef   :  { %4532 = vmatpush.bf16.msrb.mxu1 %v7264_v18  ;;  %v7423_v18 = vld [vmem:[#allocation8 + $0xea8] sm:$0xf]  ;;  %v4266_v10 = vpop.f32.mrf.mxu0  ;;  %v7839_v41 = vld [vmem:[#allocation8 + $0x8c] sm:$0xf] }
 0x1f0   :  { %4556 = vmatpush.bf16.msrb.mxu3 %v7552_v11  ;;  %v7103_v11 = vld [vmem:[#allocation8 + $0xc28] sm:$0xf]  ;;  %v7424_v37 = vor.u32 %v8293_v2, %v7423_v18  ;;  %v7843_v2 = vld [vmem:[#allocation8 + $0xac] sm:$0xf]  ;;  %v6017_v10 = vld [vmem:[#allocation8 + $0x3b8] sm:$0xf0] }
 0x1f1   :  { %4518 = vmatpush.bf16.msra.mxu0 %v7152_v28  ;;  %4496 = vmatpush.bf16.msrb.mxu2 %v6832_v61  ;;  %v7879_v28 = vld [vmem:[#allocation8 + $0x1cc] sm:$0xf]  ;;  %v7104_v29 = vor.u32 %v8213_v15, %v7103_v11  ;;  %v5665_v61 = vld [vmem:[#allocation8 + $0xf8] sm:$0xf0]  ;;  %v5652_v11 = vor.u32 %v7847_v1, %v5649_v3  ;;  %v8281_v15 = vld [vmem:[#allocation8 + $0xe54] sm:$0xf0] }
 0x1f2   :  { %v5780_v14 = vor.u32 %v7879_v28, %v5777_v42  ;;  %v4305_v52 = vpop.f32.mrf.mxu3  ;;  %v7867_v28 = vld [vmem:[#allocation8 + $0x16c] sm:$0xf]  ;;  %v5985_v3 = vld [vmem:[#allocation8 + $0x378] sm:$0xf0] }
 0x1f3   :  { %4533 = vmatpush.bf16.msrb.mxu1 %v7248_v40  ;;  %v8289_v40 = vld [vmem:[#allocation8 + $0xe94] sm:$0xf0]  ;;  %v5921_v52 = vld [vmem:[#allocation8 + $0x2f8] sm:$0xf0]  ;;  %v7931_v1 = vld [vmem:[#allocation8 + $0x36c] sm:$0xf] }
 0x1f4   :  { %4557 = vmatpush.bf16.msrb.mxu3 %v7536_v46  ;;  %4497 = vmatmul.bf16.vlgmr.msrb.gmra.mxu2 %v8845_v35  ;;  %v7087_v46 = vld [vmem:[#allocation8 + $0xc08] sm:$0xf] }
 0x1f5   :  { %4519 = vmatpush.bf16.msra.mxu0 %v7136_v34  ;;  %4541 = vmatpush.bf16.msra.mxu2 %v7456_v56  ;;  %v7088_v53 = vor.u32 %v8209_v31, %v7087_v46  ;;  %v7408_v34 = vor.u32 %v8289_v40, %v7407_v36  ;;  %v7875_v56 = vld [vmem:[#allocation8 + $0x1ac] sm:$0xf]  ;;  %v7359_v46 = vld [vmem:[#allocation8 + $0xe28] sm:$0xf]  ;;  %v8277_v31 = vld [vmem:[#allocation8 + $0xe34] sm:$0xf0]  ;;  %v6020_v40 = vor.u32 %v7939_v21, %v6017_v10 }
 0x1f6   :  { %v5764_v0 = vor.u32 %v7875_v56, %v5761_v57  ;;  %v5620_v56 = vor.u32 %v7839_v41, %v5617_v33  ;;  %v7343_v57 = vld [vmem:[#allocation8 + $0xe08] sm:$0xf]  ;;  %v7927_v10 = vld [vmem:[#allocation8 + $0x34c] sm:$0xf]  ;;  %v5569_v33 = vld [vmem:[#allocation8 + $0x38] sm:$0xf0] }
 0x1f7   :  { %4534 = vmatpush.bf16.msrb.mxu1 %v7232_v63  ;;  %v6052_v63 = vor.u32 %v7947_v62, %v6049_v47  ;;  %v7360_v47 = vor.u32 %v8277_v31, %v7359_v46  ;;  %v8011_v31 = vld [vmem:[#allocation8 + $0x5ec] sm:$0xf] }
 0x1f8   :  { %4558 = vmatpush.bf16.msrb.mxu3 %v7520_v58  ;;  %v5668_v58 = vor.u32 %v7851_v55, %v5665_v61  ;;  %v7935_v61 = vld [vmem:[#allocation8 + $0x38c] sm:$0xf] }
 0x1f9   :  { %4520 = vmatpush.bf16.msra.mxu0 %v7120_v17  ;;  %4542 = vmatpush.bf16.msra.mxu2 %v7440_v6  ;;  %v6033_v17 = vld [vmem:[#allocation8 + $0x3d8] sm:$0xf0]  ;;  %v7392_v6 = vor.u32 %v8285_v54, %v7391_v60  ;;  %v7915_v54 = vld [vmem:[#allocation8 + $0x2ec] sm:$0xf] }
 0x1fa   :  { %v6036_v18 = vor.u32 %v7943_v16, %v6033_v17  ;;  %v5601_v60 = vld [vmem:[#allocation8 + $0x78] sm:$0xf0]  ;;  %v7859_v16 = vld [vmem:[#allocation8 + $0x12c] sm:$0xf] }
 0x1fb   :  { %4535 = vmatpush.bf16.msrb.mxu1 %v7216_v25  ;;  %v5633_v25 = vld [vmem:[#allocation8 + $0xb8] sm:$0xf0]  ;;  %v4329_v36 = vpop.f32.mrf.mxu1 }
 0x1fc   :  { %4559 = vmatpush.bf16.msrb.mxu3 %v7504_v13  ;;  %v7375_v13 = vld [vmem:[#allocation8 + $0xe48] sm:$0xf]  ;;  %v5636_v42 = vor.u32 %v7843_v2, %v5633_v25  ;;  %v5697_v17 = vld [vmem:[#allocation8 + $0x138] sm:$0xf0]  ;;  %v7911_v25 = vld [vmem:[#allocation8 + $0x2cc] sm:$0xf] }
 0x1fd   :  { %4521 = vmatpush.bf16.msra.mxu0 %v7104_v29  ;;  %4543 = vmatpush.bf16.msra.mxu2 %v7424_v37  ;;  %v5729_v29 = vld [vmem:[#allocation8 + $0x178] sm:$0xf0]  ;;  %v4290_v37 = vpop.f32.mrf.mxu2  ;;  %v5700_v21 = vor.u32 %v7859_v16, %v5697_v17  ;;  %v8075_v17 = vld [vmem:[#allocation8 + $0x7ec] sm:$0xf] }
 0x1fe   :  { %4536 = vmatmul.bf16.vlgmr.msrb.gmra.mxu1 %v8849_v4  ;;  %v5732_v55 = vor.u32 %v7867_v28, %v5729_v29  ;;  %v5585_v2 = vld [vmem:[#allocation8 + $0x58] sm:$0xf0]  ;;  %v7855_v29 = vld [vmem:[#allocation8 + $0x10c] sm:$0xf] }
 0x1ff   :  { %4580 = vmatpush.bf16.msra.mxu1 %v5796_v26  ;;  %v7376_v26 = vor.u32 %v8281_v15, %v7375_v13  ;;  %v7831_v13 = vld [vmem:[#allocation8 + $0x4c] sm:$0xf] }
 0x200   :  { %4560 = vmatpush.bf16.msrb.mxu3 %v7488_v27  ;;  %v4291_v27 = vadd.f32 %v4290_v37, %v8931_v5  ;;  %v7835_v5 = vld [vmem:[#allocation8 + $0x6c] sm:$0xf]  ;;  %v5681_v37 = vld [vmem:[#allocation8 + $0x118] sm:$0xf0] }
 0x201   :  { %4522 = vmatpush.bf16.msra.mxu0 %v7088_v53  ;;  %4544 = vmatpush.bf16.msra.mxu2 %v7408_v34  ;;  %v7863_v53 = vld [vmem:[#allocation8 + $0x14c] sm:$0xf]  ;;  %v5713_v34 = vld [vmem:[#allocation8 + $0x158] sm:$0xf0]  ;;  %v5604_v8 = vor.u32 %v7835_v5, %v5601_v60 }
 0x202   :  { %v4304_v62 = vadd.f32 %v8933_v23, %v4291_v27  ;;  %v6305_v27 = vld [vmem:[#allocation8 + $0x5f8] sm:$0xf0] }
 0x203   :  { %4581 = vmatpush.bf16.msra.mxu1 %v5780_v14  ;;  %v6001_v14 = vld [vmem:[#allocation8 + $0x398] sm:$0xf0]  ;;  %v4331_v15 = vpop.f32.mrf.mxu1 }
 0x204   :  { %4561 = vmatpush.bf16.msrb.mxu3 %v7472_v12  ;;  %4523 = vmatmul.bf16.vlgmr.msra.gmra.mxu0 %v8852_v50  ;;  %v8273_v12 = vld [vmem:[#allocation8 + $0xe14] sm:$0xf0]  ;;  %v6289_v5 = vld [vmem:[#allocation8 + $0x5d8] sm:$0xf0] }
 0x205   :  { %4567 = vmatpush.bf16.msrb.mxu0 %v5668_v58  ;;  %4545 = vmatpush.bf16.msra.mxu2 %v7392_v6  ;;  %v6004_v58 = vor.u32 %v7935_v61, %v6001_v14  ;;  %v7344_v23 = vor.u32 %v8273_v12, %v7343_v57  ;;  %v4292_v30 = vpop.f32.mrf.mxu2  ;;  %v5889_v61 = vld [vmem:[#allocation8 + $0x2b8] sm:$0xf0] }
 0x206   :  { %v5553_v60 = vld [vmem:[#allocation8 + $0x18] sm:$0xf0] }
 0x207   :  { %4582 = vmatpush.bf16.msra.mxu1 %v5764_v0  ;;  %4562 = vmatmul.bf16.vlgmr.msrb.gmra.mxu3 %v8855_v44  ;;  %v4316_v0 = vpop.f32.mrf.mxu0 }
 0x208   :  { %4606 = vmatpush.bf16.msra.mxu3 %v6052_v63  ;;  %v5716_v63 = vor.u32 %v7863_v53, %v5713_v34  ;;  %v4317_v6 = vadd.f32 %v4316_v0, %v4304_v62  ;;  %v7923_v62 = vld [vmem:[#allocation8 + $0x32c] sm:$0xf]  ;;  %v6308_v34 = vor.u32 %v8011_v31, %v6305_v27  ;;  %v6257_v27 = vld [vmem:[#allocation8 + $0x598] sm:$0xf0] }
 0x209   :  { %4568 = vmatpush.bf16.msrb.mxu0 %v5652_v11  ;;  %4546 = vmatpush.bf16.msra.mxu2 %v7376_v26  ;;  %v5924_v11 = vor.u32 %v7915_v54, %v5921_v52  ;;  %v5969_v26 = vld [vmem:[#allocation8 + $0x358] sm:$0xf0]  ;;  %v7903_v52 = vld [vmem:[#allocation8 + $0x28c] sm:$0xf] }
 0x20a   :  { %v8941_v28 = vadd.f32 %v4329_v36, %v4317_v6  ;;  %v5972_v41 = vor.u32 %v7927_v10, %v5969_v26  ;;  %v8943_v14 = vpop.f32.mrf.mxu3  ;;  %v5684_v36 = vor.u32 %v7855_v29, %v5681_v37  ;;  %v7979_v0 = vld [vmem:[#allocation8 + $0x4ec] sm:$0xf]  ;;  %v6561_v6 = vld [vmem:[#allocation8 + $0x7f8] sm:$0xf0] }
 0x20b   :  { %4583 = vmatpush.bf16.msra.mxu1 %v5748_v20  ;;  %v5905_v20 = vld [vmem:[#allocation8 + $0x2d8] sm:$0xf0]  ;;  %v7975_v10 = vld [vmem:[#allocation8 + $0x4cc] sm:$0xf] }
 0x20c   :  { %4607 = vmatpush.bf16.msra.mxu3 %v6036_v18  ;;  %v5988_v18 = vor.u32 %v7931_v1, %v5985_v3  ;;  %v5908_v46 = vor.u32 %v7911_v25, %v5905_v20  ;;  %v7919_v1 = vld [vmem:[#allocation8 + $0x30c] sm:$0xf]  ;;  %v5937_v3 = vld [vmem:[#allocation8 + $0x318] sm:$0xf0] }
 0x20d   :  { %4569 = vmatpush.bf16.msrb.mxu0 %v5636_v42  ;;  %4547 = vmatpush.bf16.msra.mxu2 %v7360_v47  ;;  %v5588_v42 = vor.u32 %v7831_v13, %v5585_v2  ;;  %v5953_v47 = vld [vmem:[#allocation8 + $0x338] sm:$0xf0]  ;;  %v5940_v15 = vor.u32 %v7919_v1, %v5937_v3  ;;  %v7899_v2 = vld [vmem:[#allocation8 + $0x26c] sm:$0xf] }
 0x20e   :  { %v5956_v54 = vor.u32 %v7923_v62, %v5953_v47  ;;  %v6273_v13 = vld [vmem:[#allocation8 + $0x5b8] sm:$0xf0]  ;;  %v8071_v37 = vld [vmem:[#allocation8 + $0x7cc] sm:$0xf] }
 0x20f   :  { %4584 = vmatpush.bf16.msra.mxu1 %v5732_v55  ;;  %v7907_v55 = vld [vmem:[#allocation8 + $0x2ac] sm:$0xf]  ;;  %v4318_v53 = vpop.f32.mrf.mxu0  ;;  %v5857_v25 = vld [vmem:[#allocation8 + $0x278] sm:$0xf0] }
 0x210   :  { %4608 = vmatpush.bf16.msra.mxu3 %v6020_v40  ;;  %v7827_v40 = vld [vmem:[#allocation8 + $0x2c] sm:$0xf]  ;;  %v5892_v12 = vor.u32 %v7907_v55, %v5889_v61  ;;  %v6161_v26 = vld [vmem:[#allocation8 + $0x4d8] sm:$0xf0] }
 0x211   :  { %4570 = vmatpush.bf16.msrb.mxu0 %v5620_v56  ;;  %4548 = vmatpush.bf16.msra.mxu2 %v7344_v23  ;;  %v8007_v56 = vld [vmem:[#allocation8 + $0x5cc] sm:$0xf]  ;;  %v5572_v57 = vor.u32 %v7827_v40, %v5569_v33  ;;  %v6177_v23 = vld [vmem:[#allocation8 + $0x4f8] sm:$0xf0] }
 0x212   :  { %v6292_v16 = vor.u32 %v8007_v56, %v6289_v5  ;;  %v4357_v20 = vpop.f32.mrf.mxu3  ;;  %v7999_v31 = vld [vmem:[#allocation8 + $0x58c] sm:$0xf]  ;;  %v6145_v61 = vld [vmem:[#allocation8 + $0x4b8] sm:$0xf0] }
 0x213   :  { %4585 = vmatpush.bf16.msra.mxu1 %v5716_v63  ;;  %v5873_v63 = vld [vmem:[#allocation8 + $0x298] sm:$0xf0]  ;;  %v7895_v40 = vld [vmem:[#allocation8 + $0x24c] sm:$0xf] }
 0x214   :  { %4609 = vmatpush.bf16.msra.mxu3 %v6004_v58  ;;  %4549 = vmatmul.bf16.vlgmr.msra.gmra.mxu2 %v8859_v45  ;;  %v7823_v58 = vld [vmem:[#allocation8 + $0xc] sm:$0xf]  ;;  %v6529_v47 = vld [vmem:[#allocation8 + $0x7b8] sm:$0xf0] }
 0x215   :  { %4571 = vmatpush.bf16.msrb.mxu0 %v5604_v8  ;;  %4593 = vmatpush.bf16.msrb.mxu2 %v5924_v11  ;;  %v5556_v30 = vor.u32 %v7823_v58, %v5553_v60  ;;  %v5876_v8 = vor.u32 %v7903_v52, %v5873_v63  ;;  %v8003_v11 = vld [vmem:[#allocation8 + $0x5ac] sm:$0xf]  ;;  %v6241_v56 = vld [vmem:[#allocation8 + $0x578] sm:$0xf0] }
 0x216   :  { %v6276_v29 = vor.u32 %v8003_v11, %v6273_v13  ;;  %v7971_v55 = vld [vmem:[#allocation8 + $0x4ac] sm:$0xf]  ;;  %v5825_v60 = vld [vmem:[#allocation8 + $0x238] sm:$0xf0] }
 0x217   :  { %4586 = vmatpush.bf16.msra.mxu1 %v5700_v21  ;;  %v6564_v21 = vor.u32 %v8075_v17, %v6561_v6  ;;  %v8067_v62 = vld [vmem:[#allocation8 + $0x7ac] sm:$0xf]  ;;  %v6148_v5 = vor.u32 %v7971_v55, %v6145_v61  ;;  %v6129_v1 = vld [vmem:[#allocation8 + $0x498] sm:$0xf0] }
 0x218   :  { %4610 = vmatpush.bf16.msra.mxu3 %v5988_v18  ;;  %v6180_v18 = vor.u32 %v7979_v0, %v6177_v23  ;;  %v7891_v58 = vld [vmem:[#allocation8 + $0x22c] sm:$0xf]  ;;  %v6532_v52 = vor.u32 %v8067_v62, %v6529_v47  ;;  %v6513_v0 = vld [vmem:[#allocation8 + $0x798] sm:$0xf0] }
 0x219   :  { %4572 = vmatpush.bf16.msrb.mxu0 %v5588_v42  ;;  %4594 = vmatpush.bf16.msrb.mxu2 %v5908_v46  ;;  %v6545_v42 = vld [vmem:[#allocation8 + $0x7d8] sm:$0xf0]  ;;  %v5860_v46 = vor.u32 %v7899_v2, %v5857_v25  ;;  %v7967_v63 = vld [vmem:[#allocation8 + $0x48c] sm:$0xf]  ;;  %v5828_v17 = vor.u32 %v7891_v58, %v5825_v60 }
 0x21a   :  { %v6548_v33 = vor.u32 %v8071_v37, %v6545_v42  ;;  %v8063_v3 = vld [vmem:[#allocation8 + $0x78c] sm:$0xf]  ;;  %v5809_v11 = vld [vmem:[#allocation8 + $0x218] sm:$0xf0] }
 0x21b   :  { %4587 = vmatpush.bf16.msra.mxu1 %v5684_v36  ;;  %v6260_v36 = vor.u32 %v7999_v31, %v6257_v27  ;;  %v7991_v6 = vld [vmem:[#allocation8 + $0x54c] sm:$0xf]  ;;  %v6433_v25 = vld [vmem:[#allocation8 + $0x6f8] sm:$0xf0] }
 0x21c   :  { %4611 = vmatpush.bf16.msra.mxu3 %v5972_v41  ;;  %v5841_v41 = vld [vmem:[#allocation8 + $0x258] sm:$0xf0]  ;;  %v7963_v13 = vld [vmem:[#allocation8 + $0x46c] sm:$0xf] }
 0x21d   :  { %4573 = vmatpush.bf16.msrb.mxu0 %v5572_v57  ;;  %4595 = vmatpush.bf16.msrb.mxu2 %v5892_v12  ;;  %v5844_v53 = vor.u32 %v7895_v40, %v5841_v41  ;;  %v1373_v57 = vperm.slane %v8867_v39, 4  ;;  %v4342_v12 = vpop.f32.mrf.mxu2  ;;  %v8043_v2 = vld [vmem:[#allocation8 + $0x6ec] sm:$0xf]  ;;  %v6209_v37 = vld [vmem:[#allocation8 + $0x538] sm:$0xf0] }
 0x21e   :  { %4588 = vmatmul.bf16.vlgmr.msra.gmra.mxu1 %v8788_v19  ;;  %v6164_v19 = vor.u32 %v7975_v10, %v6161_v26  ;;  %v6436_v27 = vor.u32 %v8043_v2, %v6433_v25  ;;  %v8039_v55 = vld [vmem:[#allocation8 + $0x6cc] sm:$0xf]  ;;  %v6417_v61 = vld [vmem:[#allocation8 + $0x6d8] sm:$0xf0] }
 0x21f   :  { %4632 = vmatpush.bf16.msrb.mxu1 %v6308_v34  ;;  %v7995_v34 = vld [vmem:[#allocation8 + $0x56c] sm:$0xf]  ;;  %v6481_v47 = vld [vmem:[#allocation8 + $0x758] sm:$0xf0] }
 0x220   :  { %4612 = vmatpush.bf16.msra.mxu3 %v5956_v54  ;;  %v4343_v54 = vadd.f32 %v4342_v12, %v8941_v28  ;;  %v7887_v28 = vld [vmem:[#allocation8 + $0x20c] sm:$0xf]  ;;  %v6420_v12 = vor.u32 %v8039_v55, %v6417_v61  ;;  %v6817_v58 = vld [vmem:[#allocation8 + $0x9f8] sm:$0xf0] }
 0x221   :  { %4574 = vmatpush.bf16.msrb.mxu0 %v5556_v30  ;;  %4596 = vmatpush.bf16.msrb.mxu2 %v5876_v8  ;;  %v6225_v30 = vld [vmem:[#allocation8 + $0x558] sm:$0xf0]  ;;  %v6132_v8 = vor.u32 %v7967_v63, %v6129_v1  ;;  %v4368_v10 = vpop.f32.mrf.mxu0  ;;  %v5812_v26 = vor.u32 %v7887_v28, %v5809_v11  ;;  %v8055_v62 = vld [vmem:[#allocation8 + $0x74c] sm:$0xf] }
 0x222   :  { %v8952_v23 = vadd.f32 %v8943_v14, %v4343_v54  ;;  %v6228_v20 = vor.u32 %v7991_v6, %v6225_v30  ;;  %v6497_v14 = vld [vmem:[#allocation8 + $0x778] sm:$0xf0]  ;;  %v7955_v60 = vld [vmem:[#allocation8 + $0x42c] sm:$0xf]  ;;  %v6484_v54 = vor.u32 %v8055_v62, %v6481_v47 }
 0x223   :  { %4633 = vmatpush.bf16.msrb.mxu1 %v6292_v16  ;;  %v1381_v16 = vperm.slane %v1373_v57, 0  ;;  %v8035_v63 = vld [vmem:[#allocation8 + $0x6ac] sm:$0xf]  ;;  %v6401_v1 = vld [vmem:[#allocation8 + $0x6b8] sm:$0xf0] }
 0x224   :  { %4613 = vmatpush.bf16.msra.mxu3 %v5940_v15  ;;  %4575 = vmatmul.bf16.vlgmr.msrb.gmra.mxu0 %v8794_v38  ;;  %v4381_v38 = vpop.f32.mrf.mxu1  ;;  %v6516_v15 = vor.u32 %v8063_v3, %v6513_v0  ;;  %v8051_v3 = vld [vmem:[#allocation8 + $0x72c] sm:$0xf]  ;;  %v6465_v0 = vld [vmem:[#allocation8 + $0x738] sm:$0xf0] }
 0x225   :  { %4619 = vmatpush.bf16.msra.mxu0 %v6180_v18  ;;  %4597 = vmatpush.bf16.msrb.mxu2 %v5860_v46  ;;  %v6113_v18 = vld [vmem:[#allocation8 + $0x478] sm:$0xf0]  ;;  %v4369_v42 = vadd.f32 %v4368_v10, %v1381_v16  ;;  %v4344_v46 = vpop.f32.mrf.mxu2  ;;  %v8135_v6 = vld [vmem:[#allocation8 + $0x9cc] sm:$0xf] }
 0x226   :  { %v6116_v31 = vor.u32 %v7963_v13, %v6113_v18  ;;  %v6801_v28 = vld [vmem:[#allocation8 + $0x9d8] sm:$0xf0]  ;;  %v7951_v11 = vld [vmem:[#allocation8 + $0x40c] sm:$0xf] }
 0x227   :  { %4634 = vmatpush.bf16.msrb.mxu1 %v6276_v29  ;;  %4614 = vmatmul.bf16.vlgmr.msra.gmra.mxu3 %v8797_v43  ;;  %v6244_v43 = vor.u32 %v7995_v34, %v6241_v56  ;;  %v7987_v29 = vld [vmem:[#allocation8 + $0x52c] sm:$0xf]  ;;  %v6193_v56 = vld [vmem:[#allocation8 + $0x518] sm:$0xf0] }
 0x228   :  { %4658 = vmatpush.bf16.msrb.mxu3 %v6564_v21  ;;  %v8059_v21 = vld [vmem:[#allocation8 + $0x76c] sm:$0xf]  ;;  %v6065_v13 = vld [vmem:[#allocation8 + $0x418] sm:$0xf0] }
 0x229   :  { %4620 = vmatpush.bf16.msra.mxu0 %v6164_v19  ;;  %4598 = vmatpush.bf16.msrb.mxu2 %v5844_v53  ;;  %v7959_v19 = vld [vmem:[#allocation8 + $0x44c] sm:$0xf]  ;;  %v6500_v41 = vor.u32 %v8059_v21, %v6497_v14  ;;  %v8954_v53 = vadd.f32 %v4381_v38, %v4369_v42  ;;  %v4370_v16 = vpop.f32.mrf.mxu0  ;;  %v6385_v2 = vld [vmem:[#allocation8 + $0x698] sm:$0xf0]  ;;  %v6804_v14 = vor.u32 %v8135_v6, %v6801_v28 }
 0x22a   :  { %v7983_v34 = vld [vmem:[#allocation8 + $0x50c] sm:$0xf]  ;;  %v6689_v21 = vld [vmem:[#allocation8 + $0x8f8] sm:$0xf0] }
 0x22b   :  { %4635 = vmatpush.bf16.msrb.mxu1 %v6260_v36  ;;  %v6212_v36 = vor.u32 %v7987_v29, %v6209_v37  ;;  %v6196_v38 = vor.u32 %v7983_v34, %v6193_v56  ;;  %v8031_v18 = vld [vmem:[#allocation8 + $0x68c] sm:$0xf]  ;;  %v6068_v29 = vor.u32 %v7951_v11, %v6065_v13  ;;  %v6785_v46 = vld [vmem:[#allocation8 + $0x9b8] sm:$0xf0] }
 0x22c   :  { %4659 = vmatpush.bf16.msrb.mxu3 %v6548_v33  ;;  %v4383_v40 = vpop.f32.mrf.mxu1  ;;  %v6097_v33 = vld [vmem:[#allocation8 + $0x458] sm:$0xf0]  ;;  %v8047_v25 = vld [vmem:[#allocation8 + $0x70c] sm:$0xf]  ;;  %v6388_v37 = vor.u32 %v8031_v18, %v6385_v2 }
 0x22d   :  { %4621 = vmatpush.bf16.msra.mxu0 %v6148_v5  ;;  %4599 = vmatpush.bf16.msrb.mxu2 %v5828_v17  ;;  %v6100_v57 = vor.u32 %v7959_v19, %v6097_v33  ;;  %v8139_v5 = vld [vmem:[#allocation8 + $0x9ec] sm:$0xf]  ;;  %v6369_v40 = vld [vmem:[#allocation8 + $0x678] sm:$0xf0] }
 0x22e   :  { %v6820_v17 = vor.u32 %v8139_v5, %v6817_v58  ;;  %v8203_v10 = vld [vmem:[#allocation8 + $0xbec] sm:$0xf]  ;;  %v6673_v61 = vld [vmem:[#allocation8 + $0x8d8] sm:$0xf0] }
 0x22f   :  { %4636 = vmatpush.bf16.msrb.mxu1 %v6244_v43  ;;  %v8956_v43 = vpop.f32.mrf.mxu3  ;;  %v8131_v42 = vld [vmem:[#allocation8 + $0x9ac] sm:$0xf]  ;;  %v7057_v47 = vld [vmem:[#allocation8 + $0xbd8] sm:$0xf0] }
 0x230   :  { %4660 = vmatpush.bf16.msrb.mxu3 %v6532_v52  ;;  %v6081_v52 = vld [vmem:[#allocation8 + $0x438] sm:$0xf0]  ;;  %v8027_v19 = vld [vmem:[#allocation8 + $0x66c] sm:$0xf] }
 0x231   :  { %4622 = vmatpush.bf16.msra.mxu0 %v6132_v8  ;;  %4600 = vmatpush.bf16.msrb.mxu2 %v5812_v26  ;;  %v6084_v30 = vor.u32 %v7955_v60, %v6081_v52  ;;  %v6404_v8 = vor.u32 %v8035_v63, %v6401_v1  ;;  %v7073_v26 = vld [vmem:[#allocation8 + $0xbf8] sm:$0xf0]  ;;  %v8103_v55 = vld [vmem:[#allocation8 + $0x8cc] sm:$0xf]  ;;  %v6372_v34 = vor.u32 %v8027_v19, %v6369_v40 }
 0x232   :  { %v7076_v33 = vor.u32 %v8203_v10, %v7073_v26  ;;  %v8199_v62 = vld [vmem:[#allocation8 + $0xbcc] sm:$0xf]  ;;  %v6353_v5 = vld [vmem:[#allocation8 + $0x658] sm:$0xf0] }
 0x233   :  { %4637 = vmatpush.bf16.msrb.mxu1 %v6228_v20  ;;  %v8107_v20 = vld [vmem:[#allocation8 + $0x8ec] sm:$0xf]  ;;  %v7060_v58 = vor.u32 %v8199_v62, %v7057_v47  ;;  %v7041_v1 = vld [vmem:[#allocation8 + $0xbb8] sm:$0xf0] }
 0x234   :  { %4661 = vmatpush.bf16.msrb.mxu3 %v6516_v15  ;;  %4601 = vmatmul.bf16.vlgmr.msrb.gmra.mxu2 %v8812_v48  ;;  %v6468_v15 = vor.u32 %v8051_v3, %v6465_v0  ;;  %v6449_v48 = vld [vmem:[#allocation8 + $0x718] sm:$0xf0]  ;;  %v8127_v56 = vld [vmem:[#allocation8 + $0x98c] sm:$0xf] }
 0x235   :  { %4623 = vmatpush.bf16.msra.mxu0 %v6116_v31  ;;  %4645 = vmatpush.bf16.msra.mxu2 %v6436_v27  ;;  %v6452_v31 = vor.u32 %v8047_v25, %v6449_v48  ;;  %v6692_v27 = vor.u32 %v8107_v20, %v6689_v21  ;;  %v8099_v60 = vld [vmem:[#allocation8 + $0x8ac] sm:$0xf]  ;;  %v6753_v0 = vld [vmem:[#allocation8 + $0x978] sm:$0xf0] }
 0x236   :  { %v8195_v63 = vld [vmem:[#allocation8 + $0xbac] sm:$0xf]  ;;  %v6641_v13 = vld [vmem:[#allocation8 + $0x898] sm:$0xf0] }
 0x237   :  { %4638 = vmatpush.bf16.msrb.mxu1 %v6212_v36  ;;  %v6788_v36 = vor.u32 %v8131_v42, %v6785_v46  ;;  %v8123_v3 = vld [vmem:[#allocation8 + $0x96c] sm:$0xf]  ;;  %v4394_v16 = vpop.f32.mrf.mxu2  ;;  %v6737_v20 = vld [vmem:[#allocation8 + $0x958] sm:$0xf0] }
 0x238   :  { %4662 = vmatpush.bf16.msrb.mxu3 %v6500_v41  ;;  %v4409_v41 = vpop.f32.mrf.mxu3  ;;  %v8019_v6 = vld [vmem:[#allocation8 + $0x62c] sm:$0xf]  ;;  %v6321_v10 = vld [vmem:[#allocation8 + $0x618] sm:$0xf0] }
 0x239   :  { %4624 = vmatpush.bf16.msra.mxu0 %v6100_v57  ;;  %4646 = vmatpush.bf16.msra.mxu2 %v6420_v12  ;;  %v6769_v57 = vld [vmem:[#allocation8 + $0x998] sm:$0xf0]  ;;  %v8023_v12 = vld [vmem:[#allocation8 + $0x64c] sm:$0xf] }
 0x23a   :  { %v6772_v52 = vor.u32 %v8127_v56, %v6769_v57  ;;  %v8095_v11 = vld [vmem:[#allocation8 + $0x88c] sm:$0xf]  ;;  %v6945_v42 = vld [vmem:[#allocation8 + $0xaf8] sm:$0xf0] }
 0x23b   :  { %4639 = vmatpush.bf16.msrb.mxu1 %v6196_v38  ;;  %v6356_v38 = vor.u32 %v8023_v12, %v6353_v5  ;;  %v4433_v28 = vpop.f32.mrf.mxu1  ;;  %v8191_v18 = vld [vmem:[#allocation8 + $0xb8c] sm:$0xf]  ;;  %v6644_v21 = vor.u32 %v8095_v11, %v6641_v13  ;;  %v6721_v41 = vld [vmem:[#allocation8 + $0x938] sm:$0xf0] }
 0x23c   :  { %4663 = vmatpush.bf16.msrb.mxu3 %v6484_v54  ;;  %v6657_v54 = vld [vmem:[#allocation8 + $0x8b8] sm:$0xf0]  ;;  %v8119_v48 = vld [vmem:[#allocation8 + $0x94c] sm:$0xf] }
 0x23d   :  { %4625 = vmatpush.bf16.msra.mxu0 %v6084_v30  ;;  %4647 = vmatpush.bf16.msra.mxu2 %v6404_v8  ;;  %v6337_v30 = vld [vmem:[#allocation8 + $0x638] sm:$0xf0]  ;;  %v4395_v8 = vadd.f32 %v4394_v16, %v8954_v53  ;;  %v8091_v53 = vld [vmem:[#allocation8 + $0x86c] sm:$0xf]  ;;  %v6740_v46 = vor.u32 %v8119_v48, %v6737_v20 }
 0x23e   :  { %4640 = vmatmul.bf16.vlgmr.msrb.gmra.mxu1 %v8805_v24  ;;  %v6676_v24 = vor.u32 %v8103_v55, %v6673_v61  ;;  %v6340_v25 = vor.u32 %v8019_v6, %v6337_v30  ;;  %v8115_v40 = vld [vmem:[#allocation8 + $0x92c] sm:$0xf]  ;;  %v6609_v56 = vld [vmem:[#allocation8 + $0x858] sm:$0xf0] }
 0x23f   :  { %4684 = vmatpush.bf16.msra.mxu1 %v6820_v17  ;;  %v6660_v17 = vor.u32 %v8099_v60, %v6657_v54  ;;  %v4408_v2 = vadd.f32 %v8956_v43, %v4395_v8  ;;  %v4396_v55 = vpop.f32.mrf.mxu2  ;;  %v8087_v62 = vld [vmem:[#allocation8 + $0x84c] sm:$0xf]  ;;  %v6724_v12 = vor.u32 %v8115_v40, %v6721_v41  ;;  %v6913_v30 = vld [vmem:[#allocation8 + $0xab8] sm:$0xf0] }
 0x240   :  { %4664 = vmatpush.bf16.msrb.mxu3 %v6468_v15  ;;  %v6756_v15 = vor.u32 %v8123_v3, %v6753_v0  ;;  %v8167_v57 = vld [vmem:[#allocation8 + $0xacc] sm:$0xf]  ;;  %v7329_v3 = vld [vmem:[#allocation8 + $0xdf8] sm:$0xf0] }
 0x241   :  { %4626 = vmatpush.bf16.msra.mxu0 %v6068_v29  ;;  %4648 = vmatpush.bf16.msra.mxu2 %v6388_v37  ;;  %v6625_v29 = vld [vmem:[#allocation8 + $0x878] sm:$0xf0]  ;;  %v8171_v37 = vld [vmem:[#allocation8 + $0xaec] sm:$0xf]  ;;  %v4420_v19 = vpop.f32.mrf.mxu0 }
 0x242   :  { %v6628_v61 = vor.u32 %v8091_v53, %v6625_v29  ;;  %v8183_v5 = vld [vmem:[#allocation8 + $0xb4c] sm:$0xf]  ;;  %v6977_v11 = vld [vmem:[#allocation8 + $0xb38] sm:$0xf0] }
 0x243   :  { %4685 = vmatpush.bf16.msra.mxu1 %v6804_v14  ;;  %v8015_v14 = vld [vmem:[#allocation8 + $0x60c] sm:$0xf]  ;;  %v4435_v47 = vpop.f32.mrf.mxu1  ;;  %v6577_v20 = vld [vmem:[#allocation8 + $0x818] sm:$0xf0] }
 0x244   :  { %4665 = vmatpush.bf16.msrb.mxu3 %v6452_v31  ;;  %4627 = vmatmul.bf16.vlgmr.msra.gmra.mxu0 %v8814_v49  ;;  %v7044_v49 = vor.u32 %v8195_v63, %v7041_v1  ;;  %v8187_v31 = vld [vmem:[#allocation8 + $0xb6c] sm:$0xf]  ;;  %v6324_v43 = vor.u32 %v8015_v14, %v6321_v10  ;;  %v6612_v63 = vor.u32 %v8087_v62, %v6609_v56  ;;  %v6897_v10 = vld [vmem:[#allocation8 + $0xa98] sm:$0xf0] }
 0x245   :  { %4671 = vmatpush.bf16.msrb.mxu0 %v6692_v27  ;;  %4649 = vmatpush.bf16.msra.mxu2 %v6372_v34  ;;  %v7009_v27 = vld [vmem:[#allocation8 + $0xb78] sm:$0xf0]  ;;  %v8111_v54 = vld [vmem:[#allocation8 + $0x90c] sm:$0xf] }
 0x246   :  { %v7012_v34 = vor.u32 %v8187_v31, %v7009_v27  ;;  %v8083_v0 = vld [vmem:[#allocation8 + $0x82c] sm:$0xf]  ;;  %v7201_v29 = vld [vmem:[#allocation8 + $0xcf8] sm:$0xf0] }
 0x247   :  { %4686 = vmatpush.bf16.msra.mxu1 %v6788_v36  ;;  %4666 = vmatmul.bf16.vlgmr.msrb.gmra.mxu3 %v8818_v59  ;;  %v7025_v59 = vld [vmem:[#allocation8 + $0xb98] sm:$0xf0]  ;;  %v6948_v36 = vor.u32 %v8171_v37, %v6945_v42  ;;  %v8163_v6 = vld [vmem:[#allocation8 + $0xaac] sm:$0xf] }
 0x248   :  { %4710 = vmatpush.bf16.msra.mxu3 %v7076_v33  ;;  %v7028_v26 = vor.u32 %v8191_v18, %v7025_v59  ;;  %v4421_v33 = vadd.f32 %v4420_v19, %v4408_v2  ;;  %v8263_v18 = vld [vmem:[#allocation8 + $0xdcc] sm:$0xf]  ;;  %v6916_v2 = vor.u32 %v8163_v6, %v6913_v30  ;;  %v6881_v55 = vld [vmem:[#allocation8 + $0xa78] sm:$0xf0] }
 0x249   :  { %4672 = vmatpush.bf16.msrb.mxu0 %v6676_v24  ;;  %4650 = vmatpush.bf16.msra.mxu2 %v6356_v38  ;;  %v6929_v24 = vld [vmem:[#allocation8 + $0xad8] sm:$0xf0]  ;;  %v8267_v38 = vld [vmem:[#allocation8 + $0xdec] sm:$0xf]  ;;  %v4422_v13 = vpop.f32.mrf.mxu0 }
 0x24a   :  { %v8964_v60 = vadd.f32 %v4433_v28, %v4421_v33  ;;  %v6932_v1 = vor.u32 %v8167_v57, %v6929_v24  ;;  %v8966_v8 = vpop.f32.mrf.mxu3  ;;  %v8079_v48 = vld [vmem:[#allocation8 + $0x80c] sm:$0xf]  ;;  %v7185_v47 = vld [vmem:[#allocation8 + $0xcd8] sm:$0xf0] }
 0x24b   :  { %4687 = vmatpush.bf16.msra.mxu1 %v6772_v52  ;;  %v6705_v52 = vld [vmem:[#allocation8 + $0x918] sm:$0xf0]  ;;  %v8159_v14 = vld [vmem:[#allocation8 + $0xa8c] sm:$0xf]  ;;  %v6580_v31 = vor.u32 %v8079_v48, %v6577_v20 }
 0x24c   :  { %4711 = vmatpush.bf16.msra.mxu3 %v7060_v58  ;;  %v6993_v58 = vld [vmem:[#allocation8 + $0xb58] sm:$0xf0]  ;;  %v6708_v28 = vor.u32 %v8111_v54, %v6705_v52  ;;  %v8175_v53 = vld [vmem:[#allocation8 + $0xb0c] sm:$0xf]  ;;  %v6900_v27 = vor.u32 %v8159_v14, %v6897_v10 }
 0x24d   :  { %4673 = vmatpush.bf16.msrb.mxu0 %v6660_v17  ;;  %4651 = vmatpush.bf16.msra.mxu2 %v6340_v25  ;;  %v6996_v16 = vor.u32 %v8183_v5, %v6993_v58  ;;  %v6593_v17 = vld [vmem:[#allocation8 + $0x838] sm:$0xf0]  ;;  %v8331_v42 = vld [vmem:[#allocation8 + $0xfec] sm:$0xf] }
 0x24e   :  { %v6596_v59 = vor.u32 %v8083_v0, %v6593_v17  ;;  %v7313_v25 = vld [vmem:[#allocation8 + $0xdd8] sm:$0xf0]  ;;  %v8259_v19 = vld [vmem:[#allocation8 + $0xdac] sm:$0xf] }
 0x24f   :  { %4688 = vmatpush.bf16.msra.mxu1 %v6756_v15  ;;  %v7332_v15 = vor.u32 %v8267_v38, %v7329_v3  ;;  %v7316_v37 = vor.u32 %v8263_v18, %v7313_v25  ;;  %v8155_v33 = vld [vmem:[#allocation8 + $0xa6c] sm:$0xf]  ;;  %v7569_v57 = vld [vmem:[#allocation8 + $0xfd8] sm:$0xf0] }
 0x250   :  { %4712 = vmatpush.bf16.msra.mxu3 %v7044_v49  ;;  %v8179_v49 = vld [vmem:[#allocation8 + $0xb2c] sm:$0xf]  ;;  %v6884_v24 = vor.u32 %v8155_v33, %v6881_v55  ;;  %v7281_v5 = vld [vmem:[#allocation8 + $0xd98] sm:$0xf0] }
 0x251   :  { %4674 = vmatpush.bf16.msrb.mxu0 %v6644_v21  ;;  %4652 = vmatpush.bf16.msra.mxu2 %v6324_v43  ;;  %v6980_v21 = vor.u32 %v8179_v49, %v6977_v11  ;;  %v7297_v43 = vld [vmem:[#allocation8 + $0xdb8] sm:$0xf0]  ;;  %v8231_v62 = vld [vmem:[#allocation8 + $0xccc] sm:$0xf] }
 0x252   :  { %v8327_v56 = vld [vmem:[#allocation8 + $0xfcc] sm:$0xf]  ;;  %v6865_v54 = vld [vmem:[#allocation8 + $0xa58] sm:$0xf0] }
 0x253   :  { %4689 = vmatpush.bf16.msra.mxu1 %v6740_v46  ;;  %v7585_v46 = vld [vmem:[#allocation8 + $0xff8] sm:$0xf0]  ;;  %v8151_v58 = vld [vmem:[#allocation8 + $0xa4c] sm:$0xf]  ;;  %v7572_v52 = vor.u32 %v8327_v56, %v7569_v57 }
 0x254   :  { %4713 = vmatpush.bf16.msra.mxu3 %v7028_v26  ;;  %4653 = vmatmul.bf16.vlgmr.msra.gmra.mxu2 %v8827_v7  ;;  %v6961_v7 = vld [vmem:[#allocation8 + $0xb18] sm:$0xf0]  ;;  %v8235_v26 = vld [vmem:[#allocation8 + $0xcec] sm:$0xf] }
 0x255   :  { %4675 = vmatpush.bf16.msrb.mxu0 %v6628_v61  ;;  %4697 = vmatpush.bf16.msrb.mxu2 %v6948_v36  ;;  %v6964_v40 = vor.u32 %v8175_v53, %v6961_v7  ;;  %v7204_v41 = vor.u32 %v8235_v26, %v7201_v29  ;;  %v4461_v61 = vpop.f32.mrf.mxu3  ;;  %v7588_v36 = vor.u32 %v8331_v42, %v7585_v46  ;;  %v8323_v3 = vld [vmem:[#allocation8 + $0xfac] sm:$0xf]  ;;  %v7553_v0 = vld [vmem:[#allocation8 + $0xfb8] sm:$0xf0] }
 0x256   :  { %v8251_v17 = vld [vmem:[#allocation8 + $0xd6c] sm:$0xf]  ;;  %v7265_v6 = vld [vmem:[#allocation8 + $0xd78] sm:$0xf0] }
 0x257   :  { %4690 = vmatpush.bf16.msra.mxu1 %v6724_v12  ;;  %v8255_v12 = vld [vmem:[#allocation8 + $0xd8c] sm:$0xf]  ;;  %v4446_v30 = vpop.f32.mrf.mxu2  ;;  %v6849_v11 = vld [vmem:[#allocation8 + $0xa38] sm:$0xf0] }
 0x258   :  { %4714 = vmatpush.bf16.msra.mxu3 %v7012_v34  ;;  %v7300_v34 = vor.u32 %v8259_v19, %v7297_v43  ;;  %v7284_v38 = vor.u32 %v8255_v12, %v7281_v5  ;;  %v8147_v49 = vld [vmem:[#allocation8 + $0xa2c] sm:$0xf]  ;;  %v4447_v13 = vadd.f32 %v4446_v30, %v8964_v60  ;;  %v7537_v25 = vld [vmem:[#allocation8 + $0xf98] sm:$0xf0] }
 0x259   :  { %4676 = vmatpush.bf16.msrb.mxu0 %v6612_v63  ;;  %4698 = vmatpush.bf16.msrb.mxu2 %v6932_v1  ;;  %v8227_v63 = vld [vmem:[#allocation8 + $0xcac] sm:$0xf]  ;;  %v7169_v1 = vld [vmem:[#allocation8 + $0xcb8] sm:$0xf0]  ;;  %v6852_v20 = vor.u32 %v8147_v49, %v6849_v11 }
 0x25a   :  { %v8223_v18 = vld [vmem:[#allocation8 + $0xc8c] sm:$0xf]  ;;  %v8976_v48 = vadd.f32 %v8966_v8, %v4447_v13  ;;  %v7249_v14 = vld [vmem:[#allocation8 + $0xd58] sm:$0xf0] }
 0x25b   :  { %4691 = vmatpush.bf16.msra.mxu1 %v6708_v28  ;;  %v7172_v28 = vor.u32 %v8227_v63, %v7169_v1  ;;  %v8143_v60 = vld [vmem:[#allocation8 + $0xa0c] sm:$0xf]  ;;  %v6833_v53 = vld [vmem:[#allocation8 + $0xa18] sm:$0xf0] }
 0x25c   :  { %4715 = vmatpush.bf16.msra.mxu3 %v6996_v16  ;;  %v6868_v16 = vor.u32 %v8151_v58, %v6865_v54  ;;  %v8219_v7 = vld [vmem:[#allocation8 + $0xc6c] sm:$0xf]  ;;  %v7137_v29 = vld [vmem:[#allocation8 + $0xc78] sm:$0xf0]  ;;  %v6836_v8 = vor.u32 %v8143_v60, %v6833_v53 }
 0x25d   :  { %4677 = vmatpush.bf16.msrb.mxu0 %v6596_v59  ;;  %4699 = vmatpush.bf16.msrb.mxu2 %v6916_v2  ;;  %v7153_v59 = vld [vmem:[#allocation8 + $0xc98] sm:$0xf0]  ;;  %v7268_v2 = vor.u32 %v8251_v17, %v7265_v6  ;;  %v8243_v43 = vld [vmem:[#allocation8 + $0xd2c] sm:$0xf]  ;;  %v7140_v33 = vor.u32 %v8219_v7, %v7137_v29 }
 0x25e   :  { %4692 = vmatmul.bf16.vlgmr.msra.gmra.mxu1 %v8824_v51  ;;  %v7188_v51 = vor.u32 %v8231_v62, %v7185_v47  ;;  %v7156_v10 = vor.u32 %v8223_v18, %v7153_v59  ;;  %v7457_v42 = vld [vmem:[#allocation8 + $0xef8] sm:$0xf0]  ;;  %v8215_v61 = vld [vmem:[#allocation8 + $0xc4c] sm:$0xf] }
 0x25f   :  { %4736 = vmatpush.bf16.msrb.mxu1 %v7332_v15  ;;  %v8973_v15 = vpop.f32.mrf.mxu1  ;;  %v7121_v47 = vld [vmem:[#allocation8 + $0xc58] sm:$0xf0]  ;;  %v8239_v5 = vld [vmem:[#allocation8 + $0xd0c] sm:$0xf] }
 0x260   :  { %4716 = vmatpush.bf16.msra.mxu3 %v6980_v21  ;;  %v8247_v21 = vld [vmem:[#allocation8 + $0xd4c] sm:$0xf]  ;;  %v7441_v56 = vld [vmem:[#allocation8 + $0xed8] sm:$0xf0]  ;;  %v7124_v58 = vor.u32 %v8215_v61, %v7121_v47  ;;  %v8338_v61 = vld [vmem:[#allocation11 + $0x20] sm:$0xff] }
 0x261   :  { %4678 = vmatpush.bf16.msrb.mxu0 %v6580_v31  ;;  %4700 = vmatpush.bf16.msrb.mxu2 %v6900_v27  ;;  %v7252_v46 = vor.u32 %v8247_v21, %v7249_v14  ;;  %v8315_v31 = vld [vmem:[#allocation8 + $0xf6c] sm:$0xf]  ;;  %v7521_v27 = vld [vmem:[#allocation8 + $0xf78] sm:$0xf0]  ;;  %v8978_v19 = vpop.f32.mrf.mxu0 }
 0x262   :  { %v7524_v62 = vor.u32 %v8315_v31, %v7521_v27  ;;  %v7505_v12 = vld [vmem:[#allocation8 + $0xf58] sm:$0xf0]  ;;  %v8307_v17 = vld [vmem:[#allocation8 + $0xf2c] sm:$0xf]  ;;  %v8346_v31 = vld [vmem:[#allocation11 + $0x60] sm:$0xff] }
 0x263   :  { %4737 = vmatpush.bf16.msrb.mxu1 %v7316_v37  ;;  %v8299_v37 = vld [vmem:[#allocation8 + $0xeec] sm:$0xf]  ;;  %v7105_v1 = vld [vmem:[#allocation8 + $0xc38] sm:$0xf0] }
 0x264   :  { %4717 = vmatpush.bf16.msra.mxu3 %v6964_v40  ;;  %4679 = vmatmul.bf16.vlgmr.msrb.gmra.mxu0 %v8829_v9  ;;  %v7556_v9 = vor.u32 %v8323_v3, %v7553_v0  ;;  %v7233_v40 = vld [vmem:[#allocation8 + $0xd38] sm:$0xf0]  ;;  %v7460_v55 = vor.u32 %v8299_v37, %v7457_v42  ;;  %v8207_v13 = vld [vmem:[#allocation8 + $0xc0c] sm:$0xf]  ;;  %v8340_v37 = vld [vmem:[#allocation11 + $0x30] sm:$0xff] }
 0x265   :  { %4723 = vmatpush.bf16.msra.mxu0 %v7204_v41  ;;  %4701 = vmatpush.bf16.msrb.mxu2 %v6884_v24  ;;  %v4448_v41 = vpop.f32.mrf.mxu2  ;;  %v7236_v57 = vor.u32 %v8243_v43, %v7233_v40  ;;  %v8311_v24 = vld [vmem:[#allocation8 + $0xf4c] sm:$0xf]  ;;  %v7425_v3 = vld [vmem:[#allocation8 + $0xeb8] sm:$0xf0] }
 0x266   :  { %v7508_v63 = vor.u32 %v8311_v24, %v7505_v12  ;;  %v7489_v6 = vld [vmem:[#allocation8 + $0xf38] sm:$0xf0]  ;;  %v8287_v59 = vld [vmem:[#allocation8 + $0xe8c] sm:$0xf] }
 0x267   :  { %4738 = vmatpush.bf16.msrb.mxu1 %v7300_v34  ;;  %4718 = vmatmul.bf16.vlgmr.msra.gmra.mxu3 %v8832_v22  ;;  %v8319_v22 = vld [vmem:[#allocation8 + $0xf8c] sm:$0xf]  ;;  %v7089_v18 = vld [vmem:[#allocation8 + $0xc18] sm:$0xf0] }
 0x268   :  { %4762 = vmatpush.bf16.msrb.mxu3 %v7588_v36  ;;  %v7540_v26 = vor.u32 %v8319_v22, %v7537_v25  ;;  %v4487_v36 = vpop.f32.mrf.mxu1  ;;  %v8295_v34 = vld [vmem:[#allocation8 + $0xecc] sm:$0xf]  ;;  %v7473_v25 = vld [vmem:[#allocation8 + $0xf18] sm:$0xf0] }
 0x269   :  { %4724 = vmatpush.bf16.msra.mxu0 %v7188_v51  ;;  %4702 = vmatpush.bf16.msrb.mxu2 %v6868_v16  ;;  %v7217_v51 = vld [vmem:[#allocation8 + $0xd18] sm:$0xf0]  ;;  %v7444_v54 = vor.u32 %v8295_v34, %v7441_v56  ;;  %v4474_v30 = vpop.f32.mrf.mxu0  ;;  %v8303_v22 = vld [vmem:[#allocation8 + $0xf0c] sm:$0xf] }
 0x26a   :  { %v8980_v0 = vpop.f32.mrf.mxu3  ;;  %v7220_v16 = vor.u32 %v8239_v5, %v7217_v51  ;;  %v7476_v14 = vor.u32 %v8303_v22, %v7473_v25  ;;  %v8283_v60 = vld [vmem:[#allocation8 + $0xe6c] sm:$0xf]  ;;  %v7393_v53 = vld [vmem:[#allocation8 + $0xe78] sm:$0xf0]  ;;  %v4473_v5 = vadd.f32 %v8978_v19, %v8976_v48  ;;  %v8336_v51 = vld [vmem:[#allocation11 + $0x10] sm:$0xff] }
 0x26b   :  { %4739 = vmatpush.bf16.msrb.mxu1 %v7284_v38  ;;  %v8291_v38 = vld [vmem:[#allocation8 + $0xeac] sm:$0xf]  ;;  %v7396_v29 = vor.u32 %v8283_v60, %v7393_v53  ;;  %v7361_v40 = vld [vmem:[#allocation8 + $0xe38] sm:$0xf0]  ;;  %v8334_v19 = vld [vmem:[#allocation11] sm:$0xff] }
 0x26c   :  { %4763 = vmatpush.bf16.msrb.mxu3 %v7572_v52  ;;  %v8211_v52 = vld [vmem:[#allocation8 + $0xc2c] sm:$0xf]  ;;  %v7428_v11 = vor.u32 %v8291_v38, %v7425_v3  ;;  %v8337_v56 = vld [vmem:[#allocation11 + $0x18] sm:$0xff]  ;;  %v4486_v38 = vadd.f32 %v8973_v15, %v4473_v5  ;;  %v8360_v5 = vld [vmem:[#allocation11 + $0xd0] sm:$0xff] }
 0x26d   :  { %4725 = vmatpush.bf16.msra.mxu0 %v7172_v28  ;;  %4703 = vmatpush.bf16.msrb.mxu2 %v6852_v20  ;;  %v8349_v28 = vld [vmem:[#allocation11 + $0x78] sm:$0xff]  ;;  %v7108_v49 = vor.u32 %v8211_v52, %v7105_v1  ;;  %v7092_v20 = vor.u32 %v8207_v13, %v7089_v18  ;;  %v8279_v42 = vld [vmem:[#allocation8 + $0xe4c] sm:$0xf]  ;;  %v8342_v52 = vld [vmem:[#allocation11 + $0x40] sm:$0xff]  ;;  %v1374_v18 = vperm.slane %v8867_v39, 6 }
 0x26e   :  { %v8275_v43 = vld [vmem:[#allocation8 + $0xe2c] sm:$0xf]  ;;  %v8353_v15 = vld [vmem:[#allocation11 + $0x98] sm:$0xff]  ;;  %v8352_v13 = vld [vmem:[#allocation11 + $0x90] sm:$0xff] }
 0x26f   :  { %4740 = vmatpush.bf16.msrb.mxu1 %v7268_v2  ;;  %v7409_v2 = vld [vmem:[#allocation8 + $0xe98] sm:$0xf0]  ;;  %v8271_v36 = vld [vmem:[#allocation8 + $0xe0c] sm:$0xf]  ;;  %v1382_v25 = vperm.slane %v1374_v18, 0 }
 0x270   :  { %4764 = vmatpush.bf16.msrb.mxu3 %v7556_v9  ;;  %v7492_v9 = vor.u32 %v8307_v17, %v7489_v6  ;;  %v7412_v21 = vor.u32 %v8287_v59, %v7409_v2  ;;  %v8343_v12 = vld [vmem:[#allocation11 + $0x48] sm:$0xff]  ;;  %v8354_v6 = vld [vmem:[#allocation11 + $0xa0] sm:$0xff] }
 0x271   :  { %4726 = vmatpush.bf16.msra.mxu0 %v7156_v10  ;;  %4704 = vmatpush.bf16.msrb.mxu2 %v6836_v8  ;;  %v8341_v10 = vld [vmem:[#allocation11 + $0x38] sm:$0xff]  ;;  %v8339_v8 = vld [vmem:[#allocation11 + $0x28] sm:$0xff] }
 0x272   :  { %v4513_v7 = vpop.f32.mrf.mxu3  ;;  %v8335_v3 = vld [vmem:[#allocation11 + $0x8] sm:$0xff] }
 0x273   :  { %4741 = vmatpush.bf16.msrb.mxu1 %v7252_v46  ;;  %v7377_v46 = vld [vmem:[#allocation8 + $0xe58] sm:$0xf0] }
 0x274   :  { %4765 = vmatpush.bf16.msrb.mxu3 %v7540_v26  ;;  %4705 = vmatmul.bf16.vlgmr.msrb.gmra.mxu2 %v8845_v35  ;;  %v8348_v35 = vld [vmem:[#allocation11 + $0x70] sm:$0xff]  ;;  %v8347_v26 = vld [vmem:[#allocation11 + $0x68] sm:$0xff] }
 0x275   :  { %4727 = vmatpush.bf16.msra.mxu0 %v7140_v33  ;;  %4749 = vmatpush.bf16.msra.mxu2 %v7460_v55  ;;  %v8345_v33 = vld [vmem:[#allocation11 + $0x58] sm:$0xff]  ;;  %v7364_v55 = vor.u32 %v8275_v43, %v7361_v40 }
 0x277   :  { %4742 = vmatpush.bf16.msrb.mxu1 %v7236_v57  ;;  %v4498_v27 = vpop.f32.mrf.mxu2  ;;  %v8357_v57 = vld [vmem:[#allocation11 + $0xb8] sm:$0xff] }
 0x278   :  { %4766 = vmatpush.bf16.msrb.mxu3 %v7524_v62  ;;  %v8344_v62 = vld [vmem:[#allocation11 + $0x50] sm:$0xff]  ;;  %v4499_v17 = vadd.f32 %v4498_v27, %v4486_v38 }
 0x279   :  { %4728 = vmatpush.bf16.msra.mxu0 %v7124_v58  ;;  %4750 = vmatpush.bf16.msra.mxu2 %v7444_v54  ;;  %v8356_v58 = vld [vmem:[#allocation11 + $0xb0] sm:$0xff] }
 0x27a   :  { %v4512_v30 = vadd.f32 %v8980_v0, %v4499_v17 }
 0x27b   :  { %4743 = vmatpush.bf16.msrb.mxu1 %v7220_v16  ;;  %v4537_v41 = vpop.f32.mrf.mxu1  ;;  %v8355_v16 = vld [vmem:[#allocation11 + $0xa8] sm:$0xff] }
 0x27c   :  { %4767 = vmatpush.bf16.msrb.mxu3 %v7508_v63  ;;  %v4776_v63 = vmax.f32 %v8952_v23, 0.0 }
 0x27d   :  { %4729 = vmatpush.bf16.msra.mxu0 %v7108_v49  ;;  %4751 = vmatpush.bf16.msra.mxu2 %v7428_v11 }
 0x27e   :  { %4744 = vmatmul.bf16.vlgmr.msrb.gmra.mxu1 %v8849_v4  ;;  %v7380_v4 = vor.u32 %v8279_v42, %v7377_v46  ;;  %v4780_v48 = vpack.c.bf16 %v4776_v63, %v4776_v63  ;;  %v8358_v63 = vld [vmem:[#allocation11 + $0xc0] sm:$0xff] }
 0x27f   :  { %5055 = vmatpush.bf16.msra.mxu1 %v8349_v28  ;;  %v4500_v34 = vpop.f32.mrf.mxu2 }
 0x280   :  { %4768 = vmatpush.bf16.msrb.mxu3 %v7492_v9  ;;  %v8363_v34 = vld [vmem:[#allocation11 + $0xe8] sm:$0xff] }
 0x281   :  { %4730 = vmatpush.bf16.msra.mxu0 %v7092_v20  ;;  %4752 = vmatpush.bf16.msra.mxu2 %v7412_v21  ;;  %v4524_v47 = vpop.f32.mrf.mxu0 }
 0x282   :  { %v4525_v28 = vadd.f32 %v4524_v47, %v4512_v30 }
 0x283   :  { %5056 = vmatpush.bf16.msra.mxu1 %v8348_v35  ;;  %v4539_v24 = vpop.f32.mrf.mxu1  ;;  %v8350_v35 = vld [vmem:[#allocation11 + $0x80] sm:$0xff] }
 0x284   :  { %4769 = vmatpush.bf16.msrb.mxu3 %v7476_v14  ;;  %4731 = vmatmul.bf16.vlgmr.msra.gmra.mxu0 %v8852_v50  ;;  %v7345_v50 = vld [vmem:[#allocation8 + $0xe18] sm:$0xf0]  ;;  %v4538_v11 = vadd.f32 %v4537_v41, %v4525_v28 }
 0x285   :  { %5042 = vmatpush.bf16.msrb.mxu0 %v8341_v10  ;;  %4753 = vmatpush.bf16.msra.mxu2 %v7396_v29 }
 0x287   :  { %5057 = vmatpush.bf16.msra.mxu1 %v8347_v26  ;;  %4770 = vmatmul.bf16.vlgmr.msrb.gmra.mxu3 %v8855_v44  ;;  %v7348_v44 = vor.u32 %v8271_v36, %v7345_v50  ;;  %v8365_v36 = vld [vmem:[#allocation11 + $0xf8] sm:$0xff]  ;;  %v8364_v50 = vld [vmem:[#allocation11 + $0xf0] sm:$0xff] }
 0x288   :  { %5081 = vmatpush.bf16.msra.mxu3 %v8365_v36 }
 0x289   :  { %5043 = vmatpush.bf16.msrb.mxu0 %v8340_v37  ;;  %4754 = vmatpush.bf16.msra.mxu2 %v7380_v4  ;;  %v4526_v1 = vpop.f32.mrf.mxu0 }
 0x28a   :  { %v4563_v54 = vpop.f32.mrf.mxu3 }
 0x28b   :  { %5058 = vmatpush.bf16.msra.mxu1 %v8346_v31 }
 0x28c   :  { %5082 = vmatpush.bf16.msra.mxu3 %v8364_v50 }
 0x28d   :  { %5044 = vmatpush.bf16.msrb.mxu0 %v8339_v8  ;;  %4755 = vmatpush.bf16.msra.mxu2 %v7364_v55 }
 0x28f   :  { %5059 = vmatpush.bf16.msra.mxu1 %v8345_v33 }
 0x290   :  { %5083 = vmatpush.bf16.msra.mxu3 %v8363_v34 }
 0x291   :  { %5045 = vmatpush.bf16.msrb.mxu0 %v8338_v61  ;;  %4756 = vmatpush.bf16.msra.mxu2 %v7348_v44 }
 0x292   :  { %v4565_v23 = vpop.f32.mrf.mxu3 }
 0x293   :  { %5060 = vmatpush.bf16.msra.mxu1 %v8344_v62 }
 0x294   :  { %4757 = vmatmul.bf16.vlgmr.msra.gmra.mxu2 %v8859_v45  ;;  %v4775_v45 = vmax.f32 %v8909_v32, 0.0  ;;  %v8351_v32 = vld [vmem:[#allocation11 + $0x88] sm:$0xff] }
 0x295   :  { %5046 = vmatpush.bf16.msrb.mxu0 %v8337_v56  ;;  %5068 = vmatpush.bf16.msrb.mxu2 %v8357_v57  ;;  %v8362_v56 = vld [vmem:[#allocation11 + $0xe0] sm:$0xff] }
 0x296   :  { %v4779_v49 = vpack.c.bf16 %v4775_v45, %v4775_v45  ;;  %5084 = vmatpush.bf16.msra.mxu3 %v8362_v56 }
 0x297   :  { %5061 = vmatpush.bf16.msra.mxu1 %v8343_v12  ;;  %v4550_v9 = vpop.f32.mrf.mxu2  ;;  %v8361_v12 = vld [vmem:[#allocation11 + $0xd8] sm:$0xff] }
 0x298   :  { %v4551_v59 = vadd.f32 %v4550_v9, %v4538_v11 }
 0x299   :  { %5047 = vmatpush.bf16.msrb.mxu0 %v8336_v51  ;;  %5069 = vmatpush.bf16.msrb.mxu2 %v8356_v58  ;;  %v8359_v58 = vld [vmem:[#allocation11 + $0xc8] sm:$0xff] }
 0x29a   :  { %v4564_v22 = vadd.f32 %v4563_v54, %v4551_v59  ;;  %5085 = vmatpush.bf16.msra.mxu3 %v8361_v12 }
 0x29b   :  { %5062 = vmatpush.bf16.msra.mxu1 %v8342_v52  ;;  %v4589_v2 = vpop.f32.mrf.mxu1 }
 0x29c   :  { %v4777_v20 = vmax.f32 %v4564_v22, 0.0 }
 0x29d   :  { %5048 = vmatpush.bf16.msrb.mxu0 %v8335_v3  ;;  %5070 = vmatpush.bf16.msrb.mxu2 %v8355_v16 }
 0x29e   :  { %5063 = vmatmul.bf16.vlgmr.msra.gmra.mxu1 %v4780_v48  ;;  %v4781_v53 = vpack.c.bf16 %v4777_v20, %v4777_v20  ;;  %5086 = vmatpush.bf16.msra.mxu3 %v8360_v5  ;;  %v8372_v20 = vld [vmem:[%s9037_s7 + $0x30] sm:$0xff] }
 0x29f   :  { %v4552_v14 = vpop.f32.mrf.mxu2 }
 0x2a1   :  { %5049 = vmatpush.bf16.msrb.mxu0 %v8334_v19  ;;  %5071 = vmatpush.bf16.msrb.mxu2 %v8354_v6  ;;  %v4576_v0 = vpop.f32.mrf.mxu0 }
 0x2a2   :  { %v4577_v21 = vadd.f32 %v4576_v0, %v1382_v25  ;;  %5087 = vmatpush.bf16.msra.mxu3 %v8359_v58  ;;  %v8373_v25 = vld [vmem:[%s9037_s7 + $0x38] sm:$0xff] }
 0x2a3   :  { %v4591_v10 = vpop.f32.mrf.mxu1 }
 0x2a4   :  { %5050 = vmatmul.bf16.vlgmr.msrb.gmra.mxu0 %v4779_v49  ;;  %v4590_v60 = vadd.f32 %v4589_v2, %v4577_v21  ;;  %v4847_v49 = vld [vmem:[#allocation13] sm:$0x1] }
 0x2a5   :  { %5072 = vmatpush.bf16.msrb.mxu2 %v8353_v15  ;;  %v4848_v9 = vunpack.c.l.bf16 %v4847_v49  ;;  %5163 = vmatpush.bf16.msra.mxu0 %v8373_v25 }
 0x2a6   :  { %5088 = vmatpush.bf16.msra.mxu3 %v8358_v63 }
 0x2a9   :  { %5073 = vmatpush.bf16.msrb.mxu2 %v8352_v13  ;;  %v4578_v26 = vpop.f32.mrf.mxu0  ;;  %5164 = vmatpush.bf16.msra.mxu0 %v8372_v20 }
 0x2aa   :  { %v4615_v7 = vpop.f32.mrf.mxu3  ;;  %v8370_v26 = vld [vmem:[%s9037_s7 + $0x20] sm:$0xff] }
 0x2ad   :  { %5074 = vmatpush.bf16.msrb.mxu2 %v8351_v32  ;;  %v4849_v32 = vperm.slane %v4848_v9, 0 }
 0x2b1   :  { %5075 = vmatpush.bf16.msrb.mxu2 %v8350_v35 }
 0x2b2   :  { %v4617_v39 = vpop.f32.mrf.mxu3 }
 0x2b3   :  { %v8369_v39 = vld [vmem:[%s9037_s7 + $0x18] sm:$0xff] }
 0x2b4   :  { %5076 = vmatmul.bf16.vlgmr.msrb.gmra.mxu2 %v4781_v53  ;;  %v8371_v53 = vld [vmem:[%s9037_s7 + $0x28] sm:$0xff] }
 0x2b5   :  { %5165 = vmatpush.bf16.msra.mxu0 %v8371_v53 }
 0x2b7   :  { %v4602_v29 = vpop.f32.mrf.mxu2 }
 0x2b8   :  { %v4603_v37 = vadd.f32 %v4602_v29, %v4590_v60  ;;  %v8368_v29 = vld [vmem:[%s9037_s7 + $0x10] sm:$0xff] }
 0x2b9   :  { %5166 = vmatpush.bf16.msra.mxu0 %v8370_v26 }
 0x2ba   :  { %v4616_v46 = vadd.f32 %v4615_v7, %v4603_v37 }
 0x2bb   :  { %v4641_v42 = vpop.f32.mrf.mxu1 }
 0x2bd   :  { %5167 = vmatpush.bf16.msra.mxu0 %v8369_v39 }
 0x2bf   :  { %v4604_v27 = vpop.f32.mrf.mxu2 }
 0x2c0   :  { %v8375_v27 = vld [vmem:[%s9039_s9 + $0x8] sm:$0xff] }
 0x2c1   :  { %v4628_v31 = vpop.f32.mrf.mxu0  ;;  %5168 = vmatpush.bf16.msra.mxu0 %v8368_v29  ;;  %5207 = vmatpush.bf16.msrb.mxu1 %v8375_v27 }
 0x2c2   :  { %v4629_v4 = vadd.f32 %v4628_v31, %v4616_v46  ;;  %v8367_v31 = vld [vmem:[%s9037_s7 + $0x8] sm:$0xff] }
 0x2c3   :  { %v4643_v8 = vpop.f32.mrf.mxu1 }
 0x2c4   :  { %v4642_v43 = vadd.f32 %v4641_v42, %v4629_v4  ;;  %v8366_v4 = vld [vmem:[%s9037_s7] sm:$0xff]  ;;  %s8661_s7 = smov [#allocation17]  }
 0x2c5   :  { %5169 = vmatpush.bf16.msra.mxu0 %v8367_v31  ;;  %v8374_v8 = vld [vmem:[%s9039_s9] sm:$0xff]  ;;  %s5253_s9 = sshll.u32 %s8661_s7, 4  ;;  %s5254_s9 = int_to_ptr.vmem [resolvable:$true] %s5253_s9 }
 0x2c6   :  { %5208 = vmatpush.bf16.msrb.mxu1 %v8374_v8 }
 0x2c9   :  { %v4630_v41 = vpop.f32.mrf.mxu0  ;;  %5170 = vmatpush.bf16.msra.mxu0 %v8366_v4 }
 0x2ca   :  { %v4667_v40 = vpop.f32.mrf.mxu3 }
 0x2d2   :  { %v4669_v33 = vpop.f32.mrf.mxu3 }
 0x2d7   :  { %v4654_v55 = vpop.f32.mrf.mxu2 }
 0x2d8   :  { %v4655_v1 = vadd.f32 %v4654_v55, %v4642_v43 }
 0x2da   :  { %v4668_v17 = vadd.f32 %v4667_v40, %v4655_v1 }
 0x2db   :  { %v4693_v61 = vpop.f32.mrf.mxu1 }
 0x2df   :  { %v4656_v47 = vpop.f32.mrf.mxu2 }
 0x2e1   :  { %v4680_v62 = vpop.f32.mrf.mxu0 }
 0x2e2   :  { %v4681_v48 = vadd.f32 %v4680_v62, %v4668_v17 }
 0x2e3   :  { %v4695_v44 = vpop.f32.mrf.mxu1 }
 0x2e4   :  { %v4694_v45 = vadd.f32 %v4693_v61, %v4681_v48  ;;  %v5112_v61 = vld [vmem:[#allocation14] sm:$0x1] }
 0x2e5   :  { %v5113_v36 = vunpack.c.l.bf16 %v5112_v61 }
 0x2e7   :  { %v5114_v50 = vperm.slane %v5113_v36, 0 }
 0x2e9   :  { %v4682_v24 = vpop.f32.mrf.mxu0 }
 0x2ea   :  { %v4719_v57 = vpop.f32.mrf.mxu3 }
 0x2f2   :  { %v4721_v51 = vpop.f32.mrf.mxu3 }
 0x2f7   :  { %v4706_v54 = vpop.f32.mrf.mxu2 }
 0x2f8   :  { %v4707_v30 = vadd.f32 %v4706_v54, %v4694_v45 }
 0x2fa   :  { %v4720_v23 = vadd.f32 %v4719_v57, %v4707_v30  ;;  %v5182_v57 = vld [vmem:[#allocation16] sm:$0x1] }
 0x2fb   :  { %v4745_v52 = vpop.f32.mrf.mxu1  ;;  %v5183_v24 = vunpack.c.l.bf16 %v5182_v57 }
 0x2fd   :  { %v5184_v12 = vperm.slane %v5183_v24, 0 }
 0x2ff   :  { %v4708_v3 = vpop.f32.mrf.mxu2 }
 0x301   :  { %v4732_v38 = vpop.f32.mrf.mxu0 }
 0x302   :  { %v4733_v15 = vadd.f32 %v4732_v38, %v4720_v23 }
 0x303   :  { %v4747_v16 = vpop.f32.mrf.mxu1 }
 0x304   :  { %v4746_v11 = vadd.f32 %v4745_v52, %v4733_v15 }
 0x309   :  { %v4734_v6 = vpop.f32.mrf.mxu0 }
 0x30a   :  { %v4771_v19 = vpop.f32.mrf.mxu3 }
 0x312   :  { %v4773_v28 = vpop.f32.mrf.mxu3 }
 0x317   :  { %v4758_v13 = vpop.f32.mrf.mxu2 }
 0x318   :  { %v4759_v18 = vadd.f32 %v4758_v13, %v4746_v11 }
 0x31a   :  { %v4772_v2 = vadd.f32 %v4771_v19, %v4759_v18 }
 0x31b   :  { %v5064_v59 = vpop.f32.mrf.mxu1 }
 0x31c   :  { %v4778_v22 = vmax.f32 %v4772_v2, 0.0 }
 0x31e   :  { %v4782_v0 = vpack.c.bf16 %v4778_v22, %v4778_v22 }
 0x31f   :  { %v4760_v14 = vpop.f32.mrf.mxu2 }
 0x320   :  { %5089 = vmatmul.bf16.vlgmr.msra.gmra.mxu3 %v4782_v0 }
 0x321   :  { %v5051_v35 = vpop.f32.mrf.mxu0 }
 0x322   :  { %v5052_v21 = vadd.f32 %v5051_v35, %v4849_v32 }
 0x323   :  { %v5066_v10 = vpop.f32.mrf.mxu1 }
 0x324   :  { %v5065_v60 = vadd.f32 %v5064_v59, %v5052_v21 }
 0x329   :  { %v5053_v7 = vpop.f32.mrf.mxu0 }
 0x337   :  { %v5077_v37 = vpop.f32.mrf.mxu2 }
 0x338   :  { %v5078_v42 = vadd.f32 %v5077_v37, %v5065_v60 }
 0x33f   :  { %v5079_v46 = vpop.f32.mrf.mxu2 }
 0x3a3   :  { %v5090_v43 = vpop.f32.mrf.mxu3 }
 0x3a4   :  { %v5091_v40 = vadd.f32 %v5090_v43, %v5078_v42 }
 0x3a6   :  { %v5094_v41 = vmax.f32 %v5091_v40, 0.0 }
 0x3a8   :  { %v5095_v33 = vpack.c.bf16 %v5094_v41, %v5094_v41 }
 0x3aa   :  { %5171 = vmatmul.bf16.vlgmr.msra.gmra.mxu0 %v5095_v33 }
 0x3ab   :  { %v5092_v55 = vpop.f32.mrf.mxu3 }
 0x427   :  { %v5172_v62 = vpop.f32.mrf.mxu0 }
 0x428   :  { %v5173_v47 = vadd.f32 %v5172_v62, %v5114_v50 }
 0x42a   :  { %v5176_v44 = vmax.f32 %v5173_v47, 0.0 }
 0x42c   :  { %v5177_v34 = vpack.c.bf16 %v5176_v44, %v5176_v44 }
 0x42e   :  { %7757 = vmatmul.msk.bf16.vlgmr.msrb.gmra.mxu1 %vm5197_vm1, %v5177_v34 }
 0x42f   :  { %v5174_v56 = vpop.f32.mrf.mxu0 }
 0x4ab   :  { %v5210_v5 = vpop.f32.mrf.mxu1 }
 0x4ac   :  { %v5211_v51 = vadd.f32 %v5210_v5, %v5184_v12 }
 0x4ae   :  { %v5215_v58 = vsel %vm5214_vm2, %v5211_v51, -inf }
 0x4af   :  { %v5216_v54 = vrot.slane %v5215_v58, 4 }
 0x4b1   :  { %v5217_v52 = vmax.f32 %v5215_v58, %v5216_v54 }
 0x4b3   :  { %v5218_v63 = vrot.slane %v5217_v52, 2  ;;  %v5212_v1 = vpop.f32.mrf.mxu1 }
 0x4b5   :  { %v5219_v38 = vmax.f32 %v5217_v52, %v5218_v63 }
 0x4b7   :  { %v5220_v3 = vrot.slane %v5219_v38, 1 }
 0x4b9   :  { %v5221_v16 = vmax.f32 %v5219_v38, %v5220_v3 }
 0x4bb   :  { %v5222_v17 = vsub.f32 %v5211_v51, %v5221_v16 }
 0x4bd   :  { %v5223_v48 = vmul.f32 1.442695, %v5222_v17 }
 0x4bf   :  { %8391 = vpow2.f32 %v5223_v48 }
 0x4c5   :  { %v8392_v19 = vpop.eup %8391 }
 0x4c6   :  { %v5225_v6 = vsel %vm5214_vm2, %v8392_v19, 0.0 }
 0x4c7   :  { %v5226_v45 = vrot.slane %v5225_v6, 4 }
 0x4c9   :  { %v5227_v30 = vadd.f32 %v5226_v45, %v5225_v6 }
 0x4cb   :  { %v5228_v23 = vrot.slane %v5227_v30, 2 }
 0x4cd   :  { %v5229_v28 = vadd.f32 %v5228_v23, %v5227_v30 }
 0x4cf   :  { %v5230_v15 = vrot.slane %v5229_v28, 1 }
 0x4d1   :  { %v5231_v49 = vadd.f32 %v5230_v15, %v5229_v28 }
 0x4d3   :  { %8393 = vrcp.f32 %v5231_v49  ;;  %v5243_v18 = vand.u32 2147483648, %v5231_v49  ;;  %v5241_v2 = vand.u32 2147483647, %v5231_v49  ;;  %vm5237_vm4 = vweird.f32 %v5231_v49 }
 0x4d5   :  { %v5244_v22 = vor.u32 1.1754944e-38, %v5243_v18  ;;  %vm5242_vm6 = vcmp.eq.f32.partialorder %v5241_v2, 8.507059e+37 }
 0x4d9   :  { %v8394_v11 = vpop.eup %8393 }
 0x4da   :  { %v5233_v13 = vmul.f32 %v8394_v11, %v5231_v49  ;;  %vm5238_vm3 = vweird.f32 %v8394_v11 }
 0x4db   :  { %vm5239_vm5 = vmor %vm5237_vm4, %vm5238_vm3 }
 0x4dc   :  { %v5234_v9 = vsub.f32 1.0, %v5233_v13 }
 0x4de   :  { %v5235_v59 = vmul.f32 %v8394_v11, %v5234_v9 }
 0x4e0   :  { %v5236_v32 = vadd.f32 %v8394_v11, %v5235_v59 }
 0x4e2   :  { %v5240_v25 = vsel %vm5239_vm5, %v8394_v11, %v5236_v32 }
 0x4e3   :  { %v5245_v0 = vsel %vm5242_vm6, %v5244_v22, %v5240_v25 }
 0x4e4   :  { %v5246_v35 = vmul.f32 %v8392_v19, %v5245_v0 }
 0x4e6   :  { %5247 = vst.msk [vmem:[#allocation17] sm:$0xf] %vm5214_vm2, %v5246_v35 }
 0x4e7   :  { %5258 = dma.vmem_to_hbm [thread:$0]  %s5254_s9, 64, %s5256_s16, [#allocation4]  }
 0x4e8   :  { %8645 = dma.done.wait [#allocation4], 64  }
 0x4e9   :  { %8646 = vsyncadd [#allocation4], 4294967232 }
 0x4ea   :  { %5263 = vsyncpa [#allocation3], 1 }
 0x4eb   :  { %5264 = vsyncpa [#allocation6], 1 }
 0x4ec   :  { %5265 = vsyncpa [#allocation9], 1 }
 0x4ed   :  { %5266 = vsyncpa [#allocation12], 1 }
 0x4ee   :  { %5267 = vsyncpa [#allocation15], 1 }
 0x4ef   :  { %5268 = vsyncpa [#allocation4], 1 }

</bundles_post_ra>
